<compile_context>
chip_gen: v7x
topology: tpu7x:2x2x1
jax: 0.10.0
libtpu: 0.0.40
codegen_flags: <defaults>
</compile_context>

<pallas_src>
import numpy as np
import jax
import jax.numpy as jnp
from jax.experimental import pallas as pl
from jax.experimental.pallas import tpu as pltpu


def _posenc_kernel(x_ref, freq_ref, selx_ref, selt_ref, o_ref):
    """Encode one (tile_rows, 2) block into the full-width (tile_rows, 4F) block."""
    x0 = x_ref[:, 0:1]                               # (tile_rows, 1)
    x1 = x_ref[:, 1:2]                               # (tile_rows, 1)
    use_x0 = selx_ref[...] > 0.5                     # (1, W)
    use_sin = selt_ref[...] > 0.5                    # (1, W)
    arg = jnp.where(use_x0, x0, x1) * freq_ref[...]  # (tile_rows, W)
    # sin and cos are EUP transcendentals: free filler under the HBM DMA.
    enc = jnp.where(use_sin, jnp.sin(arg), jnp.cos(arg))
    o_ref[...] = enc.astype(o_ref.dtype)


def _round_up(a: int, b: int) -> int:
    return (a + b - 1) // b * b


def _tables(num_freqs: int, dtype):
    """Per-output-column tables, exact powers of two built on the host."""
    f = np.array([2.0 ** i for i in range(num_freqs)], dtype=np.float64)
    freq = np.tile(f, 4)                                                    # 2^i, repeated 4x
    selx = np.concatenate([np.ones(2 * num_freqs), np.zeros(2 * num_freqs)])  # 1 -> x0, 0 -> x1
    selt = np.tile(np.concatenate([np.ones(num_freqs), np.zeros(num_freqs)]), 2)  # 1 -> sin, 0 -> cos
    to = lambda a: jnp.asarray(a.reshape(1, -1), dtype=dtype)
    return to(freq), to(selx), to(selt)


def pallas_positional_encoding(X: jax.Array, out_size: int, *, tile_rows: int = 4096) -> jax.Array:
    """Pallas TPU forward of nerf2d PositionalEncoding. X: (N, 2) -> (N, 4*(out_size//4))."""
    if X.ndim != 2 or X.shape[1] < 2:
        raise ValueError(f"expected X of shape (N, >=2), got {X.shape}")
    num_freqs = out_size // 4
    if num_freqs < 1:
        raise ValueError("out_size must be >= 4")
    if not jnp.issubdtype(X.dtype, jnp.floating):
        X = X.astype(jnp.float32)
    dtype = X.dtype
    width = 4 * num_freqs
    N = X.shape[0]
    X2 = X[:, :2]

    freq_w, selx_w, selt_w = _tables(num_freqs, dtype)

    # Tiny inputs: pallas_call fixed overhead would dominate -> plain XLA path.
    if N * width < 4096:
        arg = jnp.where(selx_w > 0.5, X2[:, 0:1], X2[:, 1:2]) * freq_w
        return jnp.where(selt_w > 0.5, jnp.sin(arg), jnp.cos(arg)).astype(dtype)

    # Block sizing: the output block dominates VMEM. Cap at ~2 MiB so that
    # double-buffered in+out stays well under every generation's scoped-VMEM
    # default, while still amortizing per-grid-step overhead for large N.
    itemsize = jnp.dtype(dtype).itemsize
    max_rows = max(8, ((2 << 20) // (width * itemsize)) // 8 * 8)
    tr = max(8, min(tile_rows, max_rows, _round_up(N, 8)))
    tr = _round_up(tr, 8)

    padded_N = _round_up(N, tr)
    if padded_N != N:
        X2 = jnp.pad(X2, ((0, padded_N - N), (0, 0)))      # single (tiny) pad copy

    out = pl.pallas_call(
        _posenc_kernel,
        out_shape=jax.ShapeDtypeStruct((padded_N, width), dtype),
        grid_spec=pltpu.PrefetchScalarGridSpec(
            num_scalar_prefetch=0,
            grid=(padded_N // tr,),
            in_specs=[
                pl.BlockSpec((tr, 2), lambda i: (i, 0)),      # coordinates
                pl.BlockSpec((1, width), lambda i: (0, 0)),   # frequency table
                pl.BlockSpec((1, width), lambda i: (0, 0)),   # x0-vs-x1 select
                pl.BlockSpec((1, width), lambda i: (0, 0)),   # sin-vs-cos select
            ],
            out_specs=pl.BlockSpec((tr, width), lambda i: (i, 0)),
        ),
        compiler_params=pltpu.CompilerParams(
            dimension_semantics=("parallel",),   # row grid shards across TCs on v7x
        ),
    )(X2, freq_w, selx_w, selt_w)

    if padded_N != N:
        out = out[:N]
    return out


def posenc_reference(X, out_size):
    """Pure-JAX mirror of the PyTorch module (validation only)."""
    F = out_size // 4
    x0, x1 = X[:, 0], X[:, 1]
    s0 = jnp.stack([jnp.sin((2.0 ** i) * x0) for i in range(F)], -1)
    c0 = jnp.stack([jnp.cos((2.0 ** i) * x0) for i in range(F)], -1)
    s1 = jnp.stack([jnp.sin((2.0 ** i) * x1) for i in range(F)], -1)
    c1 = jnp.stack([jnp.cos((2.0 ** i) * x1) for i in range(F)], -1)
    return jnp.concatenate([s0, c0, s1, c1], -1)


if __name__ == "__main__":
    key = jax.random.PRNGKey(0)
    N, out_size = 256, 32                     # e.g. 16x16 pixel coordinates, 32-dim encoding
    X = jax.random.uniform(key, (N, 2), dtype=jnp.float32)

    y = pallas_positional_encoding(X, out_size)
    jax.block_until_ready(y)

    y_ref = posenc_reference(X, out_size)
    assert y.shape == (N, out_size), y.shape
    assert y.dtype == X.dtype
    assert jnp.allclose(y, y_ref, atol=1e-4, rtol=1e-4), float(jnp.max(jnp.abs(y - y_ref)))

    print("KERNEL_OK")
</pallas_src>

<mosaic_0001>
module attributes {stable_mosaic.version = 11 : i64} {
  func.func @_posenc_kernel(%arg0: i32, %arg1: memref<256x2xf32, #tpu.memory_space<vmem>>, %arg2: memref<1x32xf32, #tpu.memory_space<vmem>>, %arg3: memref<1x32xf32, #tpu.memory_space<vmem>>, %arg4: memref<1x32xf32, #tpu.memory_space<vmem>>, %arg5: memref<256x32xf32, #tpu.memory_space<vmem>>) attributes {dimension_semantics = [#tpu.dimension_semantics<parallel>], iteration_bounds = array<i64: 1>, scalar_prefetch = 0 : i64, scratch_operands = 0 : i64, tpu.core_type = #tpu.core_type<tc>, window_params = [{transform_indices = @transform_0, window_bounds = array<i64: 256, 2>}, {pipeline_mode = #tpu.pipeline_mode<synchronous>, transform_indices = @transform_1, window_bounds = array<i64: 1, 32>}, {pipeline_mode = #tpu.pipeline_mode<synchronous>, transform_indices = @transform_2, window_bounds = array<i64: 1, 32>}, {pipeline_mode = #tpu.pipeline_mode<synchronous>, transform_indices = @transform_3, window_bounds = array<i64: 1, 32>}, {transform_indices = @transform_4, window_bounds = array<i64: 256, 32>}]} {
    %c0 = arith.constant 0 : index
    %c0_0 = arith.constant 0 : index
    %0 = vector.load %arg1[%c0, %c0_0] : memref<256x2xf32, #tpu.memory_space<vmem>>, vector<256x1xf32>
    %c0_1 = arith.constant 0 : index
    %c1 = arith.constant 1 : index
    %1 = vector.load %arg1[%c0_1, %c1] : memref<256x2xf32, #tpu.memory_space<vmem>>, vector<256x1xf32>
    %c0_2 = arith.constant 0 : index
    %c0_3 = arith.constant 0 : index
    %2 = vector.load %arg3[%c0_2, %c0_3] : memref<1x32xf32, #tpu.memory_space<vmem>>, vector<1x32xf32>
    %cst = arith.constant 5.000000e-01 : f32
    %3 = vector.broadcast %cst : f32 to vector<1x32xf32>
    %4 = arith.cmpf ogt, %2, %3 : vector<1x32xf32>
    %c0_4 = arith.constant 0 : index
    %c0_5 = arith.constant 0 : index
    %5 = vector.load %arg4[%c0_4, %c0_5] : memref<1x32xf32, #tpu.memory_space<vmem>>, vector<1x32xf32>
    %cst_6 = arith.constant 5.000000e-01 : f32
    %6 = vector.broadcast %cst_6 : f32 to vector<1x32xf32>
    %7 = arith.cmpf ogt, %5, %6 : vector<1x32xf32>
    %8 = vector.shape_cast %4 : vector<1x32xi1> to vector<1x32xi1>
    %9 = vector.broadcast %8 : vector<1x32xi1> to vector<256x32xi1>
    %10 = vector.shape_cast %0 : vector<256x1xf32> to vector<256x1xf32>
    %11 = vector.broadcast %10 : vector<256x1xf32> to vector<256x32xf32>
    %12 = vector.shape_cast %1 : vector<256x1xf32> to vector<256x1xf32>
    %13 = vector.broadcast %12 : vector<256x1xf32> to vector<256x32xf32>
    %14 = arith.select %9, %11, %13 : vector<256x32xi1>, vector<256x32xf32>
    %c0_7 = arith.constant 0 : index
    %c0_8 = arith.constant 0 : index
    %15 = vector.load %arg2[%c0_7, %c0_8] : memref<1x32xf32, #tpu.memory_space<vmem>>, vector<1x32xf32>
    %16 = vector.broadcast %15 : vector<1x32xf32> to vector<256x32xf32>
    %17 = arith.mulf %14, %16 : vector<256x32xf32>
    %18 = math.sin %17 : vector<256x32xf32>
    %19 = math.cos %17 : vector<256x32xf32>
    %20 = vector.shape_cast %7 : vector<1x32xi1> to vector<1x32xi1>
    %21 = vector.broadcast %20 : vector<1x32xi1> to vector<256x32xi1>
    %22 = arith.select %21, %18, %19 : vector<256x32xi1>, vector<256x32xf32>
    %c0_9 = arith.constant 0 : index
    %c0_10 = arith.constant 0 : index
    %23 = vector.load %arg5[%c0_9, %c0_10] : memref<256x32xf32, #tpu.memory_space<vmem>>, vector<256x32xf32>
    tpu.vector_store %arg5[%c0_9, %c0_10], %22 {strides = array<i32>} : memref<256x32xf32, #tpu.memory_space<vmem>>, vector<256x32xf32>,
    return
  }
  func.func @transform_0(%arg0: i32) -> (i32, i32) {
    %c0_i32 = arith.constant 0 : i32
    %c0_i32_0 = arith.constant 0 : i32
    return %arg0, %c0_i32 : i32, i32
  }
  func.func @transform_1(%arg0: i32) -> (i32, i32) {
    %c0_i32 = arith.constant 0 : i32
    %c0_i32_0 = arith.constant 0 : i32
    %c0_i32_1 = arith.constant 0 : i32
    return %c0_i32, %c0_i32_0 : i32, i32
  }
  func.func @transform_2(%arg0: i32) -> (i32, i32) {
    %c0_i32 = arith.constant 0 : i32
    %c0_i32_0 = arith.constant 0 : i32
    %c0_i32_1 = arith.constant 0 : i32
    return %c0_i32, %c0_i32_0 : i32, i32
  }
  func.func @transform_3(%arg0: i32) -> (i32, i32) {
    %c0_i32 = arith.constant 0 : i32
    %c0_i32_0 = arith.constant 0 : i32
    %c0_i32_1 = arith.constant 0 : i32
    return %c0_i32, %c0_i32_0 : i32, i32
  }
  func.func @transform_4(%arg0: i32) -> (i32, i32) {
    %c0_i32 = arith.constant 0 : i32
    %c0_i32_0 = arith.constant 0 : i32
    return %arg0, %c0_i32 : i32, i32
  }
}

</mosaic_0001>

<bundles_post_ra>
// kernel: tpu_custom_call.1
= control target key start
LH: loop header
LB: loop body
LE: loop exit
PB: predicated region body
PF: predicated region fallthrough
CT: control target
= control target key end

     0   :  { %v7647_v0 = vmov 0   ;;  %v54_v31 = vlaneseq  ;;  %v7648_v39 = vmov 1   ;;  %s11397_s0 = inlined_call_operand.vmem [shape: f32[256,2], index: 0, kind: input, shape index: {}]   ;;  %s11398_s3 = inlined_call_operand.vmem [shape: f32[1,32], index: 3, kind: input, shape index: {}]   ;;  %s11399_s2 = inlined_call_operand.vmem [shape: f32[1,32], index: 2, kind: input, shape index: {}]   ;;  %s11400_s1 = inlined_call_operand.vmem [shape: f32[1,32], index: 1, kind: input, shape index: {}]   ;;  %s11401_s4 = inlined_call_operand.vmem [shape: f32[256,32], index: 4, kind: output, shape index: {}]  }
   0x1   :  { %7511 = vset.pattern.permute.xlu1 %v7647_v0  ;;  %7510 = vset.pattern.permute.xlu0 %v7647_v0  ;;  %v7685_v1 = vld [vmem:[%s11397_s0 + $0x10] sm:$0xff]  ;;  %v7690_v2 = vld [vmem:[%s11397_s0] sm:$0xff]  ;;  %v7697_v3 = vld [vmem:[%s11397_s0 + $0x18] sm:$0xff] }
   0x2   :  { %71 = vperm.xlu1 %7511, %v7685_v1   ;;  %61 = vperm.xlu0 %7510, %v7690_v2   ;;  %v7702_v4 = vld [vmem:[%s11397_s0 + $0x8] sm:$0xff]  ;;  %v7714_v6 = vld [vmem:[%s11397_s0 + $0x20] sm:$0xff]  ;;  %v7721_v7 = vld [vmem:[%s11397_s0 + $0x38] sm:$0xff]  ;;  %v7817_v34 = vshrl.u32 %v54_v31, 7 }
   0x3   :  { %v7709_v5 = vld [vmem:[%s11397_s0 + $0x28] sm:$0xff]  ;;  %v7726_v8 = vld [vmem:[%s11397_s0 + $0x30] sm:$0xff]  ;;  %v7738_v10 = vld [vmem:[%s11397_s0 + $0x40] sm:$0xff] }
   0x4   :  { %v7733_v9 = vld [vmem:[%s11397_s0 + $0x48] sm:$0xff]  ;;  %v7745_v11 = vld [vmem:[%s11397_s0 + $0x58] sm:$0xff]  ;;  %v7750_v12 = vld [vmem:[%s11397_s0 + $0x50] sm:$0xff]  ;;  %v56_v36 = vsub.s32 0, %v7817_v34 }
   0x5   :  { %v7757_v13 = vld [vmem:[%s11397_s0 + $0x68] sm:$0xff]  ;;  %v29_v14 = vld [vmem:[%s11397_s0 + $0x60] sm:$0xff]  ;;  %v32_v15 = vld [vmem:[%s11397_s0 + $0x78] sm:$0xff] }
   0x6   :  { %76 = vperm.xlu1 %7511, %v7697_v3   ;;  %66 = vperm.xlu0 %7510, %v7702_v4   ;;  %v31_v16 = vld [vmem:[%s11397_s0 + $0x70] sm:$0xff]  ;;  %v34_v17 = vld [vmem:[%s11397_s0 + $0x88] sm:$0xff]  ;;  %v33_v18 = vld [vmem:[%s11397_s0 + $0x80] sm:$0xff] }
   0x7   :  { %v36_v19 = vld [vmem:[%s11397_s0 + $0x98] sm:$0xff]  ;;  %v35_v20 = vld [vmem:[%s11397_s0 + $0x90] sm:$0xff]  ;;  %v38_v21 = vld [vmem:[%s11397_s0 + $0xa8] sm:$0xff] }
   0x8   :  { %v37_v22 = vld [vmem:[%s11397_s0 + $0xa0] sm:$0xff]  ;;  %v40_v23 = vld [vmem:[%s11397_s0 + $0xb8] sm:$0xff]  ;;  %v39_v24 = vld [vmem:[%s11397_s0 + $0xb0] sm:$0xff] }
   0x9   :  { %v42_v25 = vld [vmem:[%s11397_s0 + $0xc8] sm:$0xff]  ;;  %v41_v26 = vld [vmem:[%s11397_s0 + $0xc0] sm:$0xff]  ;;  %v44_v27 = vld [vmem:[%s11397_s0 + $0xd8] sm:$0xff] }
   0xa   :  { %86 = vperm.xlu1 %7511, %v7709_v5   ;;  %81 = vperm.xlu0 %7510, %v7714_v6   ;;  %v43_v28 = vld [vmem:[%s11397_s0 + $0xd0] sm:$0xff]  ;;  %v46_v29 = vld [vmem:[%s11397_s0 + $0xe8] sm:$0xff]  ;;  %v45_v30 = vld [vmem:[%s11397_s0 + $0xe0] sm:$0xff] }
   0xb   :  { %v48_v32 = vld [vmem:[%s11397_s0 + $0xf8] sm:$0xff]  ;;  %v47_v33 = vld [vmem:[%s11397_s0 + $0xf0] sm:$0xff]  ;;  %v51_v35 = vld [vmem:[%s11398_s3] sm:$0x1] }
   0xc   :  { %vm52_vm0 = vcmp.gt.f32.partialorder %v51_v35, 0.5 }
   0xd   :  { %v7042_v37 = vsel %vm52_vm0, 1, %v7647_v0 }
   0xe   :  { %96 = vperm.xlu1 %7511, %v7721_v7   ;;  %91 = vperm.xlu0 %7510, %v7726_v8   ;;  %v7826_v38 = vrot.slane %v7042_v37, %v56_v36 }
  0x12   :  { %106 = vperm.xlu1 %7511, %v7733_v9   ;;  %101 = vperm.xlu0 %7510, %v7738_v10  }
  0x16   :  { %116 = vperm.xlu1 %7511, %v7745_v11   ;;  %111 = vperm.xlu0 %7510, %v7750_v12  }
  0x1a   :  { %126 = vperm.xlu1 %7511, %v7757_v13   ;;  %121 = vperm.xlu0 %7510, %v29_v14  }
  0x1e   :  { %136 = vperm.xlu1 %7511, %v32_v15   ;;  %131 = vperm.xlu0 %7510, %v31_v16  }
  0x22   :  { %146 = vperm.xlu1 %7511, %v34_v17   ;;  %141 = vperm.xlu0 %7510, %v33_v18  }
  0x26   :  { %156 = vperm.xlu1 %7511, %v36_v19   ;;  %151 = vperm.xlu0 %7510, %v35_v20  }
  0x2a   :  { %166 = vperm.xlu1 %7511, %v38_v21   ;;  %161 = vperm.xlu0 %7510, %v37_v22  }
  0x2e   :  { %176 = vperm.xlu1 %7511, %v40_v23   ;;  %171 = vperm.xlu0 %7510, %v39_v24  }
  0x32   :  { %186 = vperm.xlu1 %7511, %v42_v25   ;;  %181 = vperm.xlu0 %7510, %v41_v26  }
  0x36   :  { %196 = vperm.xlu1 %7511, %v44_v27   ;;  %191 = vperm.xlu0 %7510, %v43_v28  }
  0x3a   :  { %206 = vperm.xlu1 %7511, %v46_v29   ;;  %201 = vperm.xlu0 %7510, %v45_v30  }
  0x3e   :  { %216 = vperm.xlu1 %7511, %v48_v32   ;;  %211 = vperm.xlu0 %7510, %v47_v33  }
  0x42   :  { %7513 = vset.pattern.permute.xlu1 %v7648_v39  ;;  %7512 = vset.pattern.permute.xlu0 %v7648_v39 }
  0x43   :  { %224 = vperm.xlu1 %7513, %v7702_v4   ;;  %220 = vperm.xlu0 %7512, %v7690_v2  }
  0x47   :  { %228 = vperm.xlu1 %7513, %v7685_v1   ;;  %232 = vperm.xlu0 %7512, %v7697_v3   ;;  %v49_v3 = vld [vmem:[%s11399_s2] sm:$0x1] }
  0x48   :  { %vm50_vm1 = vcmp.gt.f32.partialorder %v49_v3, 0.5 }
  0x4b   :  { %236 = vperm.xlu1 %7513, %v7714_v6   ;;  %240 = vperm.xlu0 %7512, %v7709_v5  }
  0x4f   :  { %244 = vperm.xlu1 %7513, %v7726_v8   ;;  %248 = vperm.xlu0 %7512, %v7721_v7   ;;  %v53_v8 = vsel %vm50_vm1, 1, %v7647_v0 }
  0x53   :  { %252 = vperm.xlu1 %7513, %v7738_v10   ;;  %256 = vperm.xlu0 %7512, %v7733_v9   ;;  %v7901_v9 = vrot.slane %v53_v8, %v56_v36 }
  0x55   :  { %vm11417_vm2 = vcmp.eq.s32.totalorder %v7901_v9, 1 }
  0x57   :  { %260 = vperm.xlu1 %7513, %v7750_v12   ;;  %264 = vperm.xlu0 %7512, %v7745_v11   ;;  %v7911_v12 = vld [vmem:[%s11400_s1] ss:$0 sm:$0xff] }
  0x5b   :  { %268 = vperm.xlu1 %7513, %v29_v14   ;;  %272 = vperm.xlu0 %7512, %v7757_v13  }
  0x5f   :  { %276 = vperm.xlu1 %7513, %v31_v16   ;;  %280 = vperm.xlu0 %7512, %v32_v15  }
  0x63   :  { %284 = vperm.xlu1 %7513, %v33_v18   ;;  %288 = vperm.xlu0 %7512, %v34_v17  }
  0x67   :  { %292 = vperm.xlu1 %7513, %v35_v20   ;;  %296 = vperm.xlu0 %7512, %v36_v19  }
  0x6b   :  { %300 = vperm.xlu1 %7513, %v37_v22   ;;  %304 = vperm.xlu0 %7512, %v38_v21  }
  0x6f   :  { %308 = vperm.xlu1 %7513, %v39_v24   ;;  %312 = vperm.xlu0 %7512, %v40_v23  }
  0x73   :  { %316 = vperm.xlu1 %7513, %v41_v26   ;;  %320 = vperm.xlu0 %7512, %v42_v25  }
  0x77   :  { %324 = vperm.xlu1 %7513, %v43_v28   ;;  %328 = vperm.xlu0 %7512, %v44_v27  }
  0x7b   :  { %332 = vperm.xlu1 %7513, %v45_v30   ;;  %336 = vperm.xlu0 %7512, %v46_v29  }
  0x7f   :  { %340 = vperm.xlu1 %7513, %v47_v33   ;;  %344 = vperm.xlu0 %7512, %v48_v32  }
  0x81   :  { %v72_v40 = vpop.permute.xlu1 %71  ;;  %v62_v41 = vpop.permute.xlu0 %61 }
  0x85   :  { %v7841_v42 = vpop.permute.xlu1 %76  ;;  %v67_v43 = vpop.permute.xlu0 %66 }
  0x89   :  { %v7843_v44 = vpop.permute.xlu1 %86  ;;  %v7845_v45 = vpop.permute.xlu0 %81 }
  0x8d   :  { %v7847_v46 = vpop.permute.xlu1 %96  ;;  %v7849_v47 = vpop.permute.xlu0 %91 }
  0x91   :  { %v7851_v48 = vpop.permute.xlu1 %106  ;;  %v7853_v49 = vpop.permute.xlu0 %101 }
  0x95   :  { %v7855_v50 = vpop.permute.xlu1 %116  ;;  %v7857_v51 = vpop.permute.xlu0 %111 }
  0x99   :  { %v7859_v52 = vpop.permute.xlu1 %126  ;;  %v7861_v53 = vpop.permute.xlu0 %121 }
  0x9d   :  { %v7863_v54 = vpop.permute.xlu1 %136  ;;  %v7865_v55 = vpop.permute.xlu0 %131 }
  0xa1   :  { %v7867_v56 = vpop.permute.xlu1 %146  ;;  %v7869_v57 = vpop.permute.xlu0 %141 }
  0xa5   :  { %v7871_v58 = vpop.permute.xlu1 %156  ;;  %v7873_v59 = vpop.permute.xlu0 %151 }
  0xa6   :  { %11418 = vst [vmem:[#allocation2_spill] sm:$0xff] %v7871_v58  ;;  %11419 = vst [vmem:[#allocation3_spill] sm:$0xff] %v7873_v59 }
  0xa9   :  { %v7875_v60 = vpop.permute.xlu1 %166  ;;  %v7877_v61 = vpop.permute.xlu0 %161 }
  0xaa   :  { %11420 = vst [vmem:[#allocation4_spill] sm:$0xff] %v7875_v60  ;;  %11421 = vst [vmem:[#allocation5_spill] sm:$0xff] %v7877_v61 }
  0xad   :  { %v7879_v62 = vpop.permute.xlu1 %176  ;;  %v7881_v63 = vpop.permute.xlu0 %171 }
  0xae   :  { %11422 = vst [vmem:[#allocation6_spill] sm:$0xff] %v7879_v62  ;;  %11423 = vst [vmem:[#allocation7_spill] sm:$0xff] %v7881_v63 }
  0xb1   :  { %v7883_v1 = vpop.permute.xlu1 %186  ;;  %v7885_v2 = vpop.permute.xlu0 %181 }
  0xb2   :  { %11424 = vst [vmem:[#allocation8_spill] sm:$0xff] %v7883_v1  ;;  %11425 = vst [vmem:[#allocation9_spill] sm:$0xff] %v7885_v2 }
  0xb5   :  { %v7890_v4 = vpop.permute.xlu1 %196  ;;  %v7892_v5 = vpop.permute.xlu0 %191 }
  0xb6   :  { %11426 = vst [vmem:[#allocation10_spill] sm:$0xff] %v7890_v4  ;;  %11427 = vst [vmem:[#allocation11_spill] sm:$0xff] %v7892_v5 }
  0xb9   :  { %v7894_v6 = vpop.permute.xlu1 %206  ;;  %v7896_v7 = vpop.permute.xlu0 %201 }
  0xba   :  { %11428 = vst [vmem:[#allocation12_spill] sm:$0xff] %v7894_v6  ;;  %11429 = vst [vmem:[#allocation13_spill] sm:$0xff] %v7896_v7 }
  0xbd   :  { %v7903_v10 = vpop.permute.xlu1 %216  ;;  %v7905_v11 = vpop.permute.xlu0 %211 }
  0xbe   :  { %11430 = vst [vmem:[#allocation14_spill] sm:$0xff] %v7903_v10  ;;  %11431 = vst [vmem:[#allocation15_spill] sm:$0xff] %v7905_v11 }
  0xc2   :  { %v225_v13 = vpop.permute.xlu1 %224  ;;  %v221_v14 = vpop.permute.xlu0 %220 }
  0xc3   :  { %v348_v0 = vsel %vm11417_vm2, %v67_v43, %v225_v13  ;;  %v347_v15 = vsel %vm11417_vm2, %v62_v41, %v221_v14 }
  0xc4   :  { %v7918_v16 = vmul.f32 %v7911_v12, %v348_v0  ;;  %v7921_v17 = vmul.f32 %v7911_v12, %v347_v15  ;;  %v11410_v0 = vmov 683565275  }
  0xc6   :  { %v11403_v18 = vand.u32 2147483647, %v7918_v16  ;;  %v525_v19 = vand.u32 2139095040, %v7918_v16  ;;  %v229_v20 = vpop.permute.xlu1 %228  ;;  %v11402_v21 = vand.u32 2147483647, %v7921_v17  ;;  %v421_v22 = vand.u32 2139095040, %v7921_v17 }
  0xc7   :  { %v349_v24 = vsel %vm11417_vm2, %v72_v40, %v229_v20  ;;  %vm524_vm1 = vcmp.lt.s32.totalorder %v7918_v16, 0 }
  0xc8   :  { %v526_v23 = vshrl.u32 %v525_v19, 23  ;;  %v529_v25 = vand.u32 8388607, %v11403_v18  ;;  %v422_v26 = vshrl.u32 %v421_v22, 23  ;;  %v425_v27 = vand.u32 8388607, %v11402_v21 }
  0xc9   :  { %v7934_v28 = vmul.f32 %v7911_v12, %v349_v24  ;;  %v11408_v22 = vmov 2475754826   ;;  %v11404_v24 = vmov 2131351028  }
  0xca   :  { %v7122_v29 = vadd.s32 4294967169, %v526_v23  ;;  %v7118_v30 = vadd.s32 4294967169, %v422_v26  ;;  %v530_v33 = vor.u32 8388608, %v529_v25  ;;  %v426_v34 = vor.u32 8388608, %v425_v27 }
  0xcb   :  { %v629_v32 = vand.u32 2139095040, %v7934_v28  ;;  %v11406_v26 = vmov 2102212464  }
  0xcc   :  { %v532_v31 = vadd.s32 1, %v7122_v29  ;;  %v428_v35 = vadd.s32 1, %v7118_v30  ;;  %v7937_v43 = vshll.u32 %v530_v33, 8  ;;  %v7939_v3 = vshll.u32 %v426_v34, 8 }
  0xcd   :  { %v630_v36 = vshrl.u32 %v629_v32, 23  ;;  %v11412_v29 = vmov 920167782  }
  0xce   :  { %vm533_vm3 = vcmp.gt.s32.totalorder %v532_v31, 0  ;;  %vm429_vm4 = vcmp.gt.s32.totalorder %v428_v35, 0 }
  0xcf   :  { %v534_v37 = vsel %vm533_vm3, %v532_v31, 0  ;;  %v430_v41 = vsel %vm429_vm4, %v428_v35, 0  ;;  %v7942_v13 = vadd.s32 4294967169, %v630_v36  ;;  %v11414_v36 = vmov 1326507024  }
  0xd0   :  { %v535_v39 = vshrl.u32 %v534_v37, 5  ;;  %v536_v40 = vand.u32 31, %v534_v37  ;;  %v7945_v19 = vshrl.u32 %v430_v41, 5  ;;  %v432_v20 = vand.u32 31, %v430_v41 }
  0xd2   :  { %v537_v14 = vsub.s32 32, %v536_v40  ;;  %v539_v15 = vshll.u32 %v11410_v0, %v536_v40  ;;  %v542_v23 = vshll.u32 %v11408_v22, %v536_v40  ;;  %v545_v25 = vshll.u32 %v11404_v24, %v536_v40 }
  0xd3   :  { %v548_v27 = vshll.u32 %v11406_v26, %v536_v40  ;;  %v551_v30 = vshll.u32 %v11412_v29, %v536_v40  ;;  %vm554_vm5 = vcmp.lt.s32.totalorder %v535_v39, 1  ;;  %vm555_vm6 = vcmp.lt.s32.totalorder %v535_v39, 2 }
  0xd4   :  { %v540_v31 = vshrl.u32 %v11408_v22, %v537_v14  ;;  %v543_v32 = vshrl.u32 %v11404_v24, %v537_v14  ;;  %v546_v33 = vshrl.u32 %v11406_v26, %v537_v14  ;;  %v538_v34 = vshrl.u32 %v11410_v0, %v537_v14 }
  0xd5   :  { %v549_v35 = vshrl.u32 %v11412_v29, %v537_v14  ;;  %v552_v37 = vshrl.u32 %v11414_v36, %v537_v14  ;;  %v433_v8 = vsub.s32 32, %v432_v20  ;;  %vm556_vm7 = vcmp.lt.s32.totalorder %v535_v39, 3 }
  0xd6   :  { %v541_v41 = vor.u32 %v540_v31, %v539_v15  ;;  %v544_v21 = vor.u32 %v543_v32, %v542_v23  ;;  %v547_v18 = vor.u32 %v546_v33, %v545_v25  ;;  %vm557_vm8 = vcmp.lt.s32.totalorder %v535_v39, 4 }
  0xd7   :  { %v550_v40 = vor.u32 %v549_v35, %v548_v27  ;;  %v553_v10 = vor.u32 %v552_v37, %v551_v30  ;;  %v11432_v14 = vmov 683565275   ;;  %v11433_v25 = vmov 2475754826  }
  0xd8   :  { %v558_v24 = vsel %vm554_vm5, %v538_v34, %v541_v41  ;;  %v559_v26 = vsel %vm557_vm8, %v547_v18, 2102212464  ;;  %v562_v22 = vsel %vm554_vm5, %v541_v41, %v544_v21  ;;  %v566_v0 = vsel %vm554_vm5, %v544_v21, %v547_v18 }
  0xd9   :  { %v560_v29 = vsel %vm556_vm7, %v544_v21, %v559_v26  ;;  %v563_v11 = vsel %vm557_vm8, %v550_v40, 920167782  ;;  %v567_v6 = vsel %vm557_vm8, %v553_v10, 1326507024  ;;  %v435_v36 = vshll.u32 %v11432_v14, %v432_v20 }
  0xda   :  { %v564_v15 = vsel %vm556_vm7, %v547_v18, %v563_v11  ;;  %v568_v23 = vsel %vm556_vm7, %v550_v40, %v567_v6  ;;  %v436_v31 = vshrl.u32 %v11433_v25, %v433_v8  ;;  %v438_v27 = vshll.u32 %v11433_v25, %v432_v20 }
  0xdb   :  { %v561_v30 = vsel %vm555_vm6, %v558_v24, %v560_v29  ;;  %v565_v32 = vsel %vm555_vm6, %v562_v22, %v564_v15  ;;  %v569_v33 = vsel %vm555_vm6, %v566_v0, %v568_v23  ;;  %v11434_v34 = vmov 2131351028  }
  0xdc   :  { %v439_v35 = vshrl.u32 %v11434_v34, %v433_v8  ;;  %v7968_v21 = vmul.u32.u64.low %v7937_v43, %v569_v33  ;;  %v7969_v26 = vmul.u32.u64.high %v7937_v43, %v569_v33, %v7968_v21  ;;  %v437_v6 = vor.u32 %v436_v31, %v435_v36 }
  0xdd   :  { %v7972_v10 = vmul.u32.u64.low %v7937_v43, %v565_v32  ;;  %v7973_v11 = vmul.u32.u64.high %v7937_v43, %v565_v32, %v7972_v10  ;;  %v441_v37 = vshll.u32 %v11434_v34, %v432_v20  ;;  %v11435_v24 = vmov 2102212464  }
  0xde   :  { %v440_v18 = vor.u32 %v439_v35, %v438_v27  ;;  %v442_v29 = vshrl.u32 %v11435_v24, %v433_v8  ;;  %v434_v39 = vshrl.u32 %v11432_v14, %v433_v8  ;;  %v444_v0 = vshll.u32 %v11435_v24, %v432_v20 }
  0xdf   :  { %v11436_v22 = vmov 920167782   ;;  %v11437_v40 = vmov 1326507024   ;;  %v577_v23 = vmul.u32 %v7937_v43, %v561_v30  ;;  %vm450_vm9 = vcmp.lt.s32.totalorder %v7945_v19, 1 }
  0xe0   :  { %v445_v41 = vshrl.u32 %v11436_v22, %v433_v8  ;;  %v448_v15 = vshrl.u32 %v11437_v40, %v433_v8  ;;  %v443_v33 = vor.u32 %v442_v29, %v441_v37  ;;  %v447_v32 = vshll.u32 %v11436_v22, %v432_v20 }
  0xe1   :  { %vm579_vm10 = vc.u32 %v7969_v26, %v7972_v10  ;;  %v580_v36 = vadd.s32 1, %v7973_v11  ;;  %vm451_vm11 = vcmp.lt.s32.totalorder %v7945_v19, 2  ;;  %vm452_vm12 = vcmp.lt.s32.totalorder %v7945_v19, 3 }
  0xe2   :  { %v446_v31 = vor.u32 %v445_v41, %v444_v0  ;;  %v449_v27 = vor.u32 %v448_v15, %v447_v32  ;;  %vm453_vm13 = vcmp.lt.s32.totalorder %v7945_v19, 4  ;;  %v458_v8 = vsel %vm450_vm9, %v437_v6, %v440_v18 }
  0xe3   :  { %v581_v43 = vsel %vm579_vm10, %v580_v36, %v7973_v11  ;;  %v455_v30 = vsel %vm453_vm13, %v443_v33, 2102212464  ;;  %v462_v35 = vsel %vm450_vm9, %v440_v18, %v443_v33  ;;  %v454_v37 = vsel %vm450_vm9, %v434_v39, %v437_v6 }
  0xe4   :  { %v459_v20 = vsel %vm453_vm13, %v446_v31, 920167782  ;;  %v582_v21 = vadd.s32 %v581_v43, %v577_v23  ;;  %v463_v7 = vsel %vm453_vm13, %v449_v27, 1326507024  ;;  %v456_v4 = vsel %vm452_vm12, %v440_v18, %v455_v30  ;;  %v233_v18 = vpop.permute.xlu0 %232 }
  0xe5   :  { %v460_v29 = vsel %vm452_vm12, %v443_v33, %v459_v20  ;;  %v464_v41 = vsel %vm452_vm12, %v446_v31, %v463_v7  ;;  %v636_v15 = vadd.s32 1, %v7942_v13  ;;  %v457_v7 = vsel %vm451_vm11, %v454_v37, %v456_v4  ;;  %v237_v20 = vpop.permute.xlu1 %236 }
  0xe6   :  { %v461_v0 = vsel %vm451_vm11, %v458_v8, %v460_v29  ;;  %v583_v32 = vadd.s32 536870912, %v582_v21  ;;  %v465_v5 = vsel %vm451_vm11, %v462_v35, %v464_v41  ;;  %v11438_v13 = vand.u32 2147483647, %v7934_v28 }
  0xe7   :  { %v7998_v11 = vmul.u32.u64.low %v7939_v3, %v461_v0  ;;  %v7999_v36 = vmul.u32.u64.high %v7939_v3, %v461_v0, %v7998_v11  ;;  %v8002_v23 = vmul.u32.u64.low %v7939_v3, %v465_v5  ;;  %v8003_v6 = vmul.u32.u64.high %v7939_v3, %v465_v5, %v8002_v23 }
  0xe8   :  { %vm637_vm14 = vcmp.gt.s32.totalorder %v636_v15, 0  ;;  %v584_v39 = vshrl.u32 %v583_v32, 30  ;;  %v633_v31 = vand.u32 8388607, %v11438_v13  ;;  %v350_v30 = vsel %vm11417_vm2, %v7841_v42, %v233_v18 }
  0xe9   :  { %v638_v33 = vsel %vm637_vm14, %v636_v15, 0  ;;  %v476_v8 = vadd.s32 1, %v7999_v36  ;;  %v473_v5 = vmul.u32 %v7939_v3, %v457_v7  ;;  %vm475_vm15 = vc.u32 %v8003_v6, %v7998_v11 }
  0xea   :  { %v585_v27 = vshll.u32 %v584_v39, 30  ;;  %v640_v43 = vand.u32 31, %v638_v33  ;;  %v634_v37 = vor.u32 8388608, %v633_v31  ;;  %v8017_v29 = vmul.f32 %v7911_v12, %v350_v30 }
  0xeb   :  { %v477_v4 = vsel %vm475_vm15, %v476_v8, %v7999_v36  ;;  %v608_v41 = vsub.s32 4, %v584_v39  ;;  %v351_v42 = vsel %vm11417_vm2, %v7845_v45, %v237_v20  ;;  %v11439_v3 = vand.u32 2147483647, %v7918_v16 }
  0xec   :  { %v586_v35 = vsub.s32 %v582_v21, %v585_v27  ;;  %v478_v19 = vadd.s32 %v477_v4, %v473_v5  ;;  %v641_v15 = vsub.s32 32, %v640_v43  ;;  %v8031_v18 = vshll.u32 %v634_v37, 8 }
  0xed   :  { %vm8024_vm0 = vcmp.le.f32.partialorder %v11439_v3, 0.7853982  ;;  %v8035_v13 = vmul.f32 %v7911_v12, %v351_v42  ;;  %v578_v45 = vadd.s32 %v7972_v10, %v7969_v26  ;;  %v609_v27 = vsel %vm524_vm1, %v608_v41, %v584_v39 }
  0xee   :  { %v588_v0 = vsub.s32 0, %v586_v35  ;;  %v479_v32 = vadd.s32 536870912, %v478_v19  ;;  %v644_v8 = vshrl.u32 %v11433_v25, %v641_v15  ;;  %v8043_v30 = vadd.s32 %v7998_v11, %v8003_v6 }
  0xef   :  { %v8046_v20 = vshrl.u32 %v638_v33, 5  ;;  %v733_v4 = vand.u32 2139095040, %v8017_v29  ;;  %v647_v26 = vshrl.u32 %v11434_v34, %v641_v15  ;;  %v650_v10 = vshrl.u32 %v11435_v24, %v641_v15 }
  0xf0   :  { %v7123_v21 = vmin.u32 %v588_v0, %v586_v35  ;;  %v8029_v36 = vshrl.u32 %v479_v32, 30  ;;  %v643_v0 = vshll.u32 %v11432_v14, %v640_v43  ;;  %v8054_v39 = vsel %vm8024_vm0, 0, %v609_v27 }
  0xf1   :  { %v646_v11 = vshll.u32 %v11433_v25, %v640_v43  ;;  %v653_v6 = vshrl.u32 %v11436_v22, %v641_v15  ;;  %v642_v33 = vshrl.u32 %v11432_v14, %v641_v15  ;;  %v649_v32 = vshll.u32 %v11434_v34, %v640_v43 }
  0xf2   :  { %v590_v31 = vclz %v7123_v21  ;;  %v481_v5 = vshll.u32 %v8029_v36, 30  ;;  %v645_v42 = vor.u32 %v644_v8, %v643_v0  ;;  %v656_v27 = vshrl.u32 %v11437_v40, %v641_v15 }
  0xf3   :  { %v651_v1 = vor.u32 %v650_v10, %v649_v32  ;;  %v504_v62 = vsub.s32 4, %v8029_v36  ;;  %v655_v8 = vshll.u32 %v11436_v22, %v640_v43  ;;  %vm658_vm4 = vcmp.lt.s32.totalorder %v8046_v20, 1 }
  0xf4   :  { %v7124_v37 = vadd.s32 4294967294, %v590_v31  ;;  %v8056_v41 = vsub.s32 %v478_v19, %v481_v5  ;;  %v652_v31 = vshll.u32 %v11435_v24, %v640_v43  ;;  %v648_v5 = vor.u32 %v647_v26, %v646_v11 }
  0xf5   :  { %vm420_vm5 = vcmp.lt.s32.totalorder %v7921_v17, 0  ;;  %v657_v15 = vor.u32 %v656_v27, %v655_v8  ;;  %vm659_vm6 = vcmp.lt.s32.totalorder %v8046_v20, 2  ;;  %vm661_vm7 = vcmp.lt.s32.totalorder %v8046_v20, 4 }
  0xf6   :  { %vm7125_vm3 = vcmp.lt.s32.totalorder %v7124_v37, 0  ;;  %v484_v21 = vsub.s32 0, %v8056_v41  ;;  %v654_v63 = vor.u32 %v653_v6, %v652_v31  ;;  %v663_v11 = vsel %vm661_vm7, %v651_v1, 2102212464 }
  0xf7   :  { %v593_v3 = vsel %vm7125_vm3, 0, %v7124_v37  ;;  %v666_v43 = vsel %vm658_vm4, %v645_v42, %v648_v5  ;;  %vm660_vm8 = vcmp.lt.s32.totalorder %v8046_v20, 3  ;;  %v11442_v6 = vand.u32 2147483647, %v7921_v17 }
  0xf8   :  { %v594_v7 = vsub.s32 32, %v593_v3  ;;  %v598_v19 = vsub.s32 4294967266, %v593_v3  ;;  %v7119_v2 = vmin.u32 %v484_v21, %v8056_v41  ;;  %v595_v0 = vshll.u32 %v586_v35, %v593_v3 }
  0xf9   :  { %vm8083_vm9 = vcmp.le.f32.partialorder %v11442_v6, 0.7853982  ;;  %v664_v32 = vsel %vm660_vm8, %v648_v5, %v663_v11  ;;  %v734_v8 = vshrl.u32 %v733_v4, 23  ;;  %vm7047_vm3 = vcmp.eq.s32.totalorder %v7826_v38, 1 }
  0xfa   :  { %v596_v60 = vshrl.u32 %v578_v45, %v594_v7  ;;  %v599_v37 = vadd.s32 127, %v598_v19  ;;  %v486_v61 = vclz %v7119_v2  ;;  %v662_v7 = vsel %vm658_vm4, %v642_v33, %v645_v42 }
  0xfb   :  { %v667_v2 = vsel %vm661_vm7, %v654_v63, 920167782  ;;  %v671_v42 = vsel %vm661_vm7, %v657_v15, 1326507024  ;;  %vm7080_vm7 = vcmask 261120  }
  0xfc   :  { %v597_v26 = vor.u32 %v596_v60, %v595_v0  ;;  %v600_v10 = vshll.u32 %v599_v37, 23  ;;  %v7120_v35 = vadd.s32 4294967294, %v486_v61  ;;  %v668_v3 = vsel %vm660_vm8, %v651_v1, %v667_v2 }
  0xfd   :  { %v670_v61 = vsel %vm658_vm4, %v648_v5, %v651_v1  ;;  %v669_v33 = vsel %vm659_vm6, %v666_v43, %v668_v3  ;;  %v672_v19 = vsel %vm660_vm8, %v654_v63, %v671_v42  ;;  %v7130_v43 = vadd.s32 4294967169, %v734_v8 }
  0xfe   :  { %v601_v45 = vor.u32 4788187, %v600_v10  ;;  %v604_v21 = vcvt.s32.f32 %v597_v26  ;;  %vm7121_vm10 = vcmp.lt.s32.totalorder %v7120_v35, 0  ;;  %v673_v11 = vsel %vm659_vm6, %v670_v61, %v672_v19 }
  0xff   :  { %v489_v27 = vsel %vm7121_vm10, 0, %v7120_v35  ;;  %v8097_v5 = vmul.u32.u64.low %v8031_v18, %v673_v11  ;;  %v8098_v26 = vmul.u32.u64.high %v8031_v18, %v673_v11, %v8097_v5  ;;  %v740_v6 = vadd.s32 1, %v7130_v43 }
 0x100   :  { %v602_v31 = vand.u32 2147483647, %v601_v45  ;;  %v490_v0 = vsub.s32 32, %v489_v27  ;;  %v491_v37 = vshll.u32 %v8056_v41, %v489_v27  ;;  %v494_v10 = vsub.s32 4294967266, %v489_v27 }
 0x101   :  { %v8102_v35 = vmul.u32.u64.low %v8031_v18, %v669_v33  ;;  %v8103_v63 = vmul.u32.u64.high %v8031_v18, %v669_v33, %v8102_v35  ;;  %v615_v41 = vadd.s32 3, %v8054_v39  ;;  %v505_v45 = vsel %vm420_vm5, %v504_v62, %v8029_v36 }
 0x102   :  { %v605_v1 = vmul.f32 %v604_v21, %v602_v31  ;;  %v492_v2 = vshrl.u32 %v8043_v30, %v490_v0  ;;  %v495_v15 = vadd.s32 127, %v494_v10  ;;  %v665_v21 = vsel %vm659_vm6, %v662_v7, %v664_v32 }
 0x103   :  { %v11445_v30 = vand.u32 2147483647, %v8017_v29  ;;  %v8116_v31 = vand.u32 3, %v8054_v39  ;;  %vm683_vm11 = vc.u32 %v8098_v26, %v8102_v35  ;;  %vm741_vm12 = vcmp.gt.s32.totalorder %v740_v6, 0 }
 0x104   :  { %v606_v4 = vxor.u32 2147483648, %v605_v1  ;;  %v493_v3 = vor.u32 %v492_v2, %v491_v37  ;;  %v496_v61 = vshll.u32 %v495_v15, 23  ;;  %v507_v20 = vsel %vm8083_vm9, 0, %v505_v45 }
 0x105   :  { %v737_v42 = vand.u32 8388607, %v11445_v30  ;;  %v684_v7 = vadd.s32 1, %v8103_v63  ;;  %v8125_v32 = vand.u32 3, %v615_v41  ;;  %v681_v27 = vmul.u32 %v8031_v18, %v665_v21 }
 0x106   :  { %v607_v33 = vsel %vm524_vm1, %v606_v4, %v605_v1  ;;  %v497_v36 = vor.u32 4788187, %v496_v61  ;;  %v742_v39 = vsel %vm741_vm12, %v740_v6, 0  ;;  %v500_v8 = vcvt.s32.f32 %v493_v3 }
 0x107   :  { %v610_v62 = vsel %vm8024_vm0, %v7918_v16, %v607_v33  ;;  %v685_v0 = vsel %vm683_vm11, %v684_v7, %v8103_v63  ;;  %v511_v37 = vadd.s32 3, %v507_v20  ;;  %v738_v10 = vor.u32 8388608, %v737_v42 }
 0x108   :  { %7514 = vcosq.f32 %v610_v62  ;;  %v498_v19 = vand.u32 2147483647, %v497_v36  ;;  %v686_v23 = vadd.s32 %v685_v0, %v681_v27  ;;  %v744_v11 = vand.u32 31, %v742_v39 }
 0x109   :  { %7516 = vsinq.f32 %v610_v62  ;;  %v11416_v5 = vand.u32 2147483647, %v8035_v13  ;;  %v837_v43 = vand.u32 2139095040, %v8035_v13  ;;  %vm3947_vm13 = vcmp.eq.s32.totalorder %v8116_v31, 2 }
 0x10a   :  { %v501_v1 = vmul.f32 %v500_v8, %v498_v19  ;;  %v687_v2 = vadd.s32 536870912, %v686_v23  ;;  %v8132_v15 = vsub.s32 32, %v744_v11  ;;  %vm618_vm14 = vcmp.eq.s32.totalorder %v8125_v32, 0 }
 0x10b   :  { %vm621_vm15 = vcmp.eq.s32.totalorder %v8125_v32, 2  ;;  %vm3944_vm0 = vcmp.eq.s32.totalorder %v8116_v31, 0  ;;  %v8137_v63 = vand.u32 3, %v507_v20  ;;  %vm628_vm1 = vcmp.lt.s32.totalorder %v7934_v28, 0 }
 0x10c   :  { %v502_v18 = vxor.u32 2147483648, %v501_v1  ;;  %v8140_v4 = vshrl.u32 %v742_v39, 5  ;;  %vm617_vm4 = vcmp.lt.s32.totalorder %v8125_v32, 2  ;;  %vm3943_vm6 = vcmp.lt.s32.totalorder %v8116_v31, 2 }
 0x10d   :  { %v8145_v41 = vand.u32 3, %v511_v37  ;;  %v8148_v45 = vadd.s32 %v8102_v35, %v8098_v26  ;;  %v688_v6 = vshrl.u32 %v687_v2, 30  ;;  %v8150_v3 = vshll.u32 %v738_v10, 8 }
 0x10e   :  { %vm614_vm8 = vweird.f32 %v7918_v16  ;;  %v503_v61 = vsel %vm420_vm5, %v502_v18, %v501_v1  ;;  %v747_v21 = vshll.u32 %v11432_v14, %v744_v11  ;;  %v8156_v30 = vshrl.u32 %v837_v43, 23 }
 0x10f   :  { %v8160_v42 = vand.u32 8388607, %v11416_v5  ;;  %v506_v26 = vsel %vm8083_vm9, %v7921_v17, %v503_v61  ;;  %v11446_v35 = vand.u32 2147483647, %v7934_v28  ;;  %v689_v62 = vshll.u32 %v688_v6, 30 }
 0x110   :  { %v748_v36 = vshrl.u32 %v11433_v25, %v8132_v15  ;;  %v751_v20 = vshrl.u32 %v11434_v34, %v8132_v15  ;;  %7518 = vcosq.f32 %v506_v26  ;;  %v750_v7 = vshll.u32 %v11433_v25, %v744_v11 }
 0x111   :  { %vm8167_vm10 = vcmp.le.f32.partialorder %v11446_v35, 0.7853982  ;;  %v754_v60 = vshrl.u32 %v11435_v24, %v8132_v15  ;;  %v757_v27 = vshrl.u32 %v11436_v22, %v8132_v15  ;;  %vm762_vm5 = vcmp.lt.s32.totalorder %v8140_v4, 1 }
 0x112   :  { %v7515_v39 = vpop.eup %7514  ;;  %7520 = vsinq.f32 %v506_v26  ;;  %v8181_v19 = vsub.s32 %v686_v23, %v689_v62  ;;  %v712_v8 = vsub.s32 4, %v688_v6  ;;  %v753_v0 = vshll.u32 %v11434_v34, %v744_v11 }
 0x113   :  { %v7517_v37 = vpop.eup %7516  ;;  %v622_v10 = vxor.u32 2147483648, %v7515_v39  ;;  %v756_v1 = vshll.u32 %v11435_v24, %v744_v11  ;;  %v759_v43 = vshll.u32 %v11436_v22, %v744_v11  ;;  %v760_v2 = vshrl.u32 %v11437_v40, %v8132_v15 }
 0x114   :  { %v619_v18 = vxor.u32 2147483648, %v7517_v37  ;;  %v692_v61 = vsub.s32 0, %v8181_v19  ;;  %v749_v35 = vor.u32 %v748_v36, %v747_v21  ;;  %v752_v5 = vor.u32 %v751_v20, %v750_v7 }
 0x115   :  { %v623_v23 = vsel %vm621_vm15, %v622_v10, %v7517_v37  ;;  %v3949_v26 = vsel %vm3947_vm13, %v622_v10, %v7517_v37  ;;  %vm517_vm9 = vcmp.eq.s32.totalorder %v8145_v41, 2  ;;  %vm3844_vm11 = vcmp.eq.s32.totalorder %v8137_v63, 2 }
 0x116   :  { %v755_v62 = vor.u32 %v754_v60, %v753_v0  ;;  %v758_v11 = vor.u32 %v757_v27, %v756_v1  ;;  %v620_v58 = vsel %vm618_vm14, %v7515_v39, %v619_v18  ;;  %v3946_v59 = vsel %vm3944_vm0, %v7515_v39, %v619_v18 }
 0x117   :  { %vm514_vm12 = vcmp.eq.s32.totalorder %v8145_v41, 0  ;;  %vm3841_vm2 = vcmp.eq.s32.totalorder %v8137_v63, 0  ;;  %v7127_v21 = vmin.u32 %v692_v61, %v8181_v19  ;;  %v713_v36 = vsel %vm628_vm1, %v712_v8, %v688_v6 }
 0x118   :  { %v624_v20 = vsel %vm617_vm4, %v620_v58, %v623_v23  ;;  %v3950_v7 = vsel %vm3943_vm6, %v3946_v59, %v3949_v26  ;;  %vm513_vm13 = vcmp.lt.s32.totalorder %v8145_v41, 2  ;;  %vm3840_vm14 = vcmp.lt.s32.totalorder %v8137_v63, 2 }
 0x119   :  { %v761_v60 = vor.u32 %v760_v2, %v759_v43  ;;  %vm763_vm15 = vcmp.lt.s32.totalorder %v8140_v4, 2  ;;  %v625_v27 = vsel %vm614_vm8, nan, %v624_v20  ;;  %v3951_v39 = vsel %vm614_vm8, nan, %v3950_v7 }
 0x11a   :  { %vm510_vm0 = vweird.f32 %v7921_v17  ;;  %v694_v32 = vclz %v7127_v21  ;;  %vm764_vm4 = vcmp.lt.s32.totalorder %v8140_v4, 3  ;;  %v7049_v58 = vsel %vm7047_vm3, %v625_v27, %v3951_v39  ;;  %v7519_v37 = vpop.eup %7518 }
 0x11b   :  { %v715_v59 = vsel %vm8167_vm10, 0, %v713_v36  ;;  %v746_v31 = vshrl.u32 %v11432_v14, %v8132_v15  ;;  %vm765_vm6 = vcmp.lt.s32.totalorder %v8140_v4, 4  ;;  %7082 = vst.msk [vmem:[%s11401_s4 + $0x8] sm:$0xff] %vm7080_vm7, %v7049_v58  ;;  %v770_v8 = vsel %vm762_vm5, %v749_v35, %v752_v5 }
 0x11c   :  { %v7128_v16 = vadd.s32 4294967294, %v694_v32  ;;  %v767_v6 = vsel %vm765_vm6, %v755_v62, 2102212464  ;;  %v771_v0 = vsel %vm765_vm6, %v758_v11, 920167782  ;;  %v774_v1 = vsel %vm762_vm5, %v752_v5, %v755_v62  ;;  %v7521_v2 = vpop.eup %7520 }
 0x11d   :  { %v766_v10 = vsel %vm762_vm5, %v746_v31, %v749_v35  ;;  %v772_v15 = vsel %vm764_vm4, %v755_v62, %v771_v0  ;;  %v775_v43 = vsel %vm765_vm6, %v761_v60, 1326507024  ;;  %v518_v18 = vxor.u32 2147483648, %v7519_v37 }
 0x11e   :  { %vm7129_vm8 = vcmp.lt.s32.totalorder %v7128_v16, 0  ;;  %v776_v61 = vsel %vm764_vm4, %v758_v11, %v775_v43  ;;  %v7134_v23 = vadd.s32 4294967169, %v8156_v30  ;;  %v515_v26 = vxor.u32 2147483648, %v7521_v2 }
 0x11f   :  { %v697_v21 = vsel %vm7129_vm8, 0, %v7128_v16  ;;  %v768_v35 = vsel %vm764_vm4, %v752_v5, %v767_v6  ;;  %v773_v36 = vsel %vm763_vm15, %v770_v8, %v772_v15  ;;  %v519_v62 = vsel %vm517_vm9, %v518_v18, %v7521_v2 }
 0x120   :  { %v3846_v20 = vsel %vm3844_vm11, %v518_v18, %v7521_v2  ;;  %v698_v7 = vsub.s32 32, %v697_v21  ;;  %v777_v11 = vsel %vm763_vm15, %v774_v1, %v776_v61  ;;  %v516_v30 = vsel %vm514_vm12, %v7519_v37, %v515_v26 }
 0x121   :  { %v3843_v60 = vsel %vm3841_vm2, %v7519_v37, %v515_v26  ;;  %v699_v5 = vshll.u32 %v8181_v19, %v697_v21  ;;  %v702_v27 = vsub.s32 4294967266, %v697_v21  ;;  %v520_v39 = vsel %vm513_vm13, %v516_v30, %v519_v62 }
 0x122   :  { %v3847_v32 = vsel %vm3840_vm14, %v3843_v60, %v3846_v20  ;;  %v700_v58 = vshrl.u32 %v8148_v45, %v698_v7  ;;  %v844_v31 = vadd.s32 1, %v7134_v23  ;;  %v521_v16 = vsel %vm510_vm0, nan, %v520_v39 }
 0x123   :  { %v3848_v6 = vsel %vm510_vm0, nan, %v3847_v32  ;;  %v703_v8 = vadd.s32 127, %v702_v27  ;;  %v769_v19 = vsel %vm763_vm15, %v766_v10, %v768_v35  ;;  %v241_v10 = vpop.permute.xlu0 %240  ;;  %v719_v43 = vadd.s32 3, %v715_v59 }
 0x124   :  { %v7048_v41 = vsel %vm7047_vm3, %v521_v16, %v3848_v6  ;;  %v701_v0 = vor.u32 %v700_v58, %v699_v5  ;;  %v8268_v63 = vmul.u32.u64.low %v8150_v3, %v777_v11  ;;  %v8269_v37 = vmul.u32.u64.high %v8150_v3, %v777_v11, %v8268_v63 }
 0x125   :  { %7081 = vst.msk [vmem:[%s11401_s4] sm:$0xff] %vm7080_vm7, %v7048_v41  ;;  %v704_v45 = vshll.u32 %v703_v8, 23  ;;  %v8276_v17 = vmul.u32.u64.low %v8150_v3, %v773_v36  ;;  %v8277_v15 = vmul.u32.u64.high %v8150_v3, %v773_v36, %v8276_v17  ;;  %vm845_vm2 = vcmp.gt.s32.totalorder %v844_v31, 0 }
 0x126   :  { %v846_v4 = vsel %vm845_vm2, %v844_v31, 0  ;;  %v8280_v2 = vand.u32 3, %v715_v59  ;;  %v708_v61 = vcvt.s32.f32 %v701_v0  ;;  %v785_v23 = vmul.u32 %v8150_v3, %v769_v19 }
 0x127   :  { %v705_v1 = vor.u32 4788187, %v704_v45  ;;  %v848_v18 = vand.u32 31, %v846_v4  ;;  %vm787_vm5 = vc.u32 %v8269_v37, %v8276_v17  ;;  %v842_v26 = vor.u32 8388608, %v8160_v42 }
 0x128   :  { %v788_v35 = vadd.s32 1, %v8277_v15  ;;  %vm11449_vm9 = vcmp.eq.s32.totalorder %v7901_v9, 1  ;;  %v847_v20 = vshrl.u32 %v846_v4, 5  ;;  %vm718_vm14 = vweird.f32 %v7934_v28 }
 0x129   :  { %v706_v21 = vand.u32 2147483647, %v705_v1  ;;  %v849_v36 = vsub.s32 32, %v848_v18  ;;  %v352_v62 = vsel %vm11449_vm9, %v7843_v44, %v241_v10  ;;  %v851_v59 = vshll.u32 %v11432_v14, %v848_v18 }
 0x12a   :  { %v854_v7 = vshll.u32 %v11433_v25, %v848_v18  ;;  %v857_v3 = vshll.u32 %v11434_v34, %v848_v18  ;;  %v789_v30 = vsel %vm787_vm5, %v788_v35, %v8277_v15  ;;  %v860_v60 = vshll.u32 %v11435_v24, %v848_v18 }
 0x12b   :  { %v709_v11 = vmul.f32 %v708_v61, %v706_v21  ;;  %v852_v42 = vshrl.u32 %v11433_v25, %v849_v36  ;;  %v790_v5 = vadd.s32 %v789_v30, %v785_v23  ;;  %v855_v27 = vshrl.u32 %v11434_v34, %v849_v36 }
 0x12c   :  { %v858_v39 = vshrl.u32 %v11435_v24, %v849_v36  ;;  %v861_v44 = vshrl.u32 %v11436_v22, %v849_v36  ;;  %v863_v31 = vshll.u32 %v11436_v22, %v848_v18  ;;  %v864_v16 = vshrl.u32 %v11437_v40, %v849_v36 }
 0x12d   :  { %v710_v32 = vxor.u32 2147483648, %v709_v11  ;;  %v853_v58 = vor.u32 %v852_v42, %v851_v59  ;;  %v791_v6 = vadd.s32 536870912, %v790_v5  ;;  %v856_v8 = vor.u32 %v855_v27, %v854_v7 }
 0x12e   :  { %v859_v19 = vor.u32 %v858_v39, %v857_v3  ;;  %v862_v41 = vor.u32 %v861_v44, %v860_v60  ;;  %v865_v63 = vor.u32 %v864_v16, %v863_v31  ;;  %v882_v45 = vshll.u32 %v842_v26, 8 }
 0x12f   :  { %v711_v0 = vsel %vm628_vm1, %v710_v32, %v709_v11  ;;  %v8304_v15 = vmul.f32 %v7911_v12, %v352_v62  ;;  %v792_v10 = vshrl.u32 %v791_v6, 30  ;;  %vm866_vm11 = vcmp.lt.s32.totalorder %v847_v20, 1 }
 0x130   :  { %v714_v4 = vsel %vm8167_vm10, %v7934_v28, %v711_v0  ;;  %vm869_vm12 = vcmp.lt.s32.totalorder %v847_v20, 4  ;;  %v850_v1 = vshrl.u32 %v11432_v14, %v849_v36  ;;  %v874_v18 = vsel %vm866_vm11, %v853_v58, %v856_v8 }
 0x131   :  { %7522 = vcosq.f32 %v714_v4  ;;  %v875_v61 = vsel %vm869_vm12, %v862_v41, 920167782  ;;  %v793_v23 = vshll.u32 %v792_v10, 30  ;;  %vm868_vm1 = vcmp.lt.s32.totalorder %v847_v20, 3 }
 0x132   :  { %7524 = vsinq.f32 %v714_v4  ;;  %v871_v21 = vsel %vm869_vm12, %v859_v19, 2102212464  ;;  %vm867_vm13 = vcmp.lt.s32.totalorder %v847_v20, 2  ;;  %v876_v26 = vsel %vm868_vm1, %v859_v19, %v875_v61 }
 0x133   :  { %v878_v35 = vsel %vm866_vm11, %v856_v8, %v859_v19  ;;  %v879_v62 = vsel %vm869_vm12, %v865_v63, 1326507024  ;;  %v8310_v59 = vsub.s32 %v790_v5, %v793_v23  ;;  %v870_v33 = vsel %vm866_vm11, %v850_v1, %v853_v58 }
 0x134   :  { %v877_v7 = vsel %vm867_vm13, %v874_v18, %v876_v26  ;;  %v880_v3 = vsel %vm868_vm1, %v862_v41, %v879_v62  ;;  %v872_v11 = vsel %vm868_vm1, %v856_v8, %v871_v21  ;;  %v720_v60 = vand.u32 3, %v719_v43 }
 0x135   :  { %v881_v30 = vsel %vm867_vm13, %v878_v35, %v880_v3  ;;  %v8314_v36 = vmul.u32.u64.low %v882_v45, %v877_v7  ;;  %v8315_v42 = vmul.u32.u64.high %v882_v45, %v877_v7, %v8314_v36  ;;  %v796_v27 = vsub.s32 0, %v8310_v59 }
 0x136   :  { %v11450_v39 = vand.u32 2147483647, %v8017_v29  ;;  %v8325_v5 = vmul.u32.u64.low %v882_v45, %v881_v30  ;;  %v8326_v32 = vmul.u32.u64.high %v882_v45, %v881_v30, %v8325_v5  ;;  %vm4046_vm15 = vcmp.lt.s32.totalorder %v8280_v2, 2 }
 0x137   :  { %vm732_vm0 = vcmp.lt.s32.totalorder %v8017_v29, 0  ;;  %v7131_v58 = vmin.u32 %v796_v27, %v8310_v59  ;;  %v873_v43 = vsel %vm867_vm13, %v870_v33, %v872_v11  ;;  %vm4047_vm4 = vcmp.eq.s32.totalorder %v8280_v2, 0 }
 0x138   :  { %vm8321_vm10 = vcmp.le.f32.partialorder %v11450_v39, 0.7853982  ;;  %v816_v31 = vsub.s32 4, %v792_v10  ;;  %v892_v16 = vadd.s32 1, %v8315_v42  ;;  %v941_v6 = vand.u32 2139095040, %v8304_v15 }
 0x139   :  { %vm721_vm6 = vcmp.lt.s32.totalorder %v720_v60, 2  ;;  %vm722_vm8 = vcmp.eq.s32.totalorder %v720_v60, 0  ;;  %vm725_vm2 = vcmp.eq.s32.totalorder %v720_v60, 2  ;;  %v798_v8 = vclz %v7131_v58 }
 0x13a   :  { %vm4050_vm5 = vcmp.eq.s32.totalorder %v8280_v2, 2  ;;  %v889_v41 = vmul.u32 %v882_v45, %v873_v43  ;;  %vm891_vm9 = vc.u32 %v8326_v32, %v8314_v36  ;;  %v942_v20 = vshrl.u32 %v941_v6, 23 }
 0x13b   :  { %v7523_v19 = vpop.eup %7522  ;;  %v786_v4 = vadd.s32 %v8276_v17, %v8269_v37  ;;  %v7132_v1 = vadd.s32 4294967294, %v798_v8  ;;  %v893_v18 = vsel %vm891_vm9, %v892_v16, %v8315_v42  ;;  %v817_v23 = vsel %vm732_vm0, %v816_v31, %v792_v10  ;;  %v245_v42 = vpop.permute.xlu1 %244 }
 0x13c   :  { %v7525_v0 = vpop.eup %7524  ;;  %v726_v63 = vxor.u32 2147483648, %v7523_v19  ;;  %v894_v21 = vadd.s32 %v893_v18, %v889_v41  ;;  %v938_v26 = vand.u32 2147483647, %v8304_v15  ;;  %v7138_v62 = vadd.s32 4294967169, %v942_v20 }
 0x13d   :  { %v723_v61 = vxor.u32 2147483648, %v7525_v0  ;;  %vm7133_vm11 = vcmp.lt.s32.totalorder %v7132_v1, 0  ;;  %v819_v30 = vsel %vm8321_vm10, 0, %v817_v23  ;;  %vm11453_vm12 = vcmp.eq.s32.totalorder %v7901_v9, 1 }
 0x13e   :  { %v727_v45 = vsel %vm725_vm2, %v726_v63, %v7525_v0  ;;  %v4052_v35 = vsel %vm4050_vm5, %v726_v63, %v7525_v0  ;;  %v801_v17 = vsel %vm7133_vm11, 0, %v7132_v1  ;;  %v895_v7 = vadd.s32 536870912, %v894_v21 }
 0x13f   :  { %v724_v33 = vsel %vm722_vm8, %v7523_v19, %v723_v61  ;;  %v4049_v37 = vsel %vm4047_vm4, %v7523_v19, %v723_v61  ;;  %v802_v11 = vsub.s32 32, %v801_v17  ;;  %v806_v5 = vsub.s32 4294967266, %v801_v17 }
 0x140   :  { %v728_v3 = vsel %vm721_vm6, %v724_v33, %v727_v45  ;;  %v4053_v10 = vsel %vm4046_vm15, %v4049_v37, %v4052_v35  ;;  %v896_v58 = vshrl.u32 %v895_v7, 30  ;;  %v945_v2 = vand.u32 8388607, %v938_v26 }
 0x141   :  { %v729_v27 = vsel %vm718_vm14, nan, %v728_v3  ;;  %v4054_v39 = vsel %vm718_vm14, nan, %v4053_v10  ;;  %v804_v43 = vshrl.u32 %v786_v4, %v802_v11  ;;  %v948_v31 = vadd.s32 1, %v7138_v62 }
 0x142   :  { %v7050_v60 = vsel %vm7047_vm3, %v729_v27, %v4054_v39  ;;  %v803_v16 = vshll.u32 %v8310_v59, %v801_v17  ;;  %v807_v6 = vadd.s32 127, %v806_v5  ;;  %v897_v28 = vshll.u32 %v896_v58, 30 }
 0x143   :  { %7083 = vst.msk [vmem:[%s11401_s4 + $0x10] sm:$0xff] %vm7080_vm7, %v7050_v60  ;;  %v353_v8 = vsel %vm11453_vm12, %v7849_v47, %v245_v42  ;;  %v823_v19 = vadd.s32 3, %v819_v30  ;;  %vm949_vm1 = vcmp.gt.s32.totalorder %v948_v31, 0  ;;  %v946_v4 = vor.u32 8388608, %v945_v2 }
 0x144   :  { %v805_v41 = vor.u32 %v804_v43, %v803_v16  ;;  %v808_v20 = vshll.u32 %v807_v6, 23  ;;  %v898_v0 = vsub.s32 %v894_v21, %v897_v28  ;;  %v950_v63 = vsel %vm949_vm1, %v948_v31, 0 }
 0x145   :  { %v952_v1 = vand.u32 31, %v950_v63  ;;  %v8371_v18 = vmul.f32 %v7911_v12, %v353_v8  ;;  %v920_v59 = vsub.s32 4, %v896_v58  ;;  %v8373_v45 = vand.u32 3, %v819_v30 }
 0x146   :  { %v809_v61 = vor.u32 4788187, %v808_v20  ;;  %v900_v23 = vsub.s32 0, %v898_v0  ;;  %vm836_vm13 = vcmp.lt.s32.totalorder %v8035_v13, 0  ;;  %v812_v62 = vcvt.s32.f32 %v805_v41 }
 0x147   :  { %v953_v35 = vsub.s32 32, %v952_v1  ;;  %v8376_v33 = vand.u32 3, %v823_v19  ;;  %v890_v21 = vadd.s32 %v8314_v36, %v8326_v32  ;;  %v8381_v12 = vshll.u32 %v946_v4, 8 }
 0x148   :  { %v810_v47 = vand.u32 2147483647, %v809_v61  ;;  %v7135_v37 = vmin.u32 %v900_v23, %v898_v0  ;;  %v1045_v7 = vand.u32 2139095040, %v8371_v18  ;;  %v921_v11 = vsel %vm836_vm13, %v920_v59, %v896_v58 }
 0x149   :  { %v956_v17 = vshrl.u32 %v11433_v25, %v953_v35  ;;  %v8386_v30 = vshrl.u32 %v950_v63, 5  ;;  %v955_v42 = vshll.u32 %v11432_v14, %v952_v1  ;;  %v958_v27 = vshll.u32 %v11433_v25, %v952_v1 }
 0x14a   :  { %v813_v3 = vmul.f32 %v812_v62, %v810_v47  ;;  %v902_v10 = vclz %v7135_v37  ;;  %v959_v39 = vshrl.u32 %v11434_v34, %v953_v35  ;;  %v962_v36 = vshrl.u32 %v11435_v24, %v953_v35 }
 0x14b   :  { %v11454_v5 = vand.u32 2147483647, %v8035_v13  ;;  %v961_v58 = vshll.u32 %v11434_v34, %v952_v1  ;;  %v965_v2 = vshrl.u32 %v11436_v22, %v953_v35  ;;  %v957_v31 = vor.u32 %v956_v17, %v955_v42 }
 0x14c   :  { %v814_v32 = vxor.u32 2147483648, %v813_v3  ;;  %v7136_v43 = vadd.s32 4294967294, %v902_v10  ;;  %v964_v16 = vshll.u32 %v11435_v24, %v952_v1  ;;  %v967_v6 = vshll.u32 %v11436_v22, %v952_v1 }
 0x14d   :  { %vm8394_vm14 = vcmp.le.f32.partialorder %v11454_v5, 0.7853982  ;;  %v968_v28 = vshrl.u32 %v11437_v40, %v953_v35  ;;  %v960_v19 = vor.u32 %v959_v39, %v958_v27  ;;  %v963_v41 = vor.u32 %v962_v36, %v961_v58 }
 0x14e   :  { %v815_v8 = vsel %vm732_vm0, %v814_v32, %v813_v3  ;;  %vm7137_vm15 = vcmp.lt.s32.totalorder %v7136_v43, 0  ;;  %v966_v4 = vor.u32 %v965_v2, %v964_v16  ;;  %v954_v1 = vshrl.u32 %v11432_v14, %v953_v35 }
 0x14f   :  { %v818_v20 = vsel %vm8321_vm10, %v8017_v29, %v815_v8  ;;  %v905_v63 = vsel %vm7137_vm15, 0, %v7136_v43  ;;  %v969_v61 = vor.u32 %v968_v28, %v967_v6  ;;  %vm970_vm4 = vcmp.lt.s32.totalorder %v8386_v30, 1 }
 0x150   :  { %7526 = vcosq.f32 %v818_v20  ;;  %v906_v23 = vsub.s32 32, %v905_v63  ;;  %v910_v59 = vsub.s32 4294967266, %v905_v63  ;;  %v907_v47 = vshll.u32 %v898_v0, %v905_v63 }
 0x151   :  { %7528 = vsinq.f32 %v818_v20  ;;  %vm972_vm0 = vcmp.lt.s32.totalorder %v8386_v30, 3  ;;  %vm973_vm6 = vcmp.lt.s32.totalorder %v8386_v30, 4  ;;  %v978_v44 = vsel %vm970_vm4, %v957_v31, %v960_v19 }
 0x152   :  { %v908_v62 = vshrl.u32 %v890_v21, %v906_v23  ;;  %v911_v37 = vadd.s32 127, %v910_v59  ;;  %v975_v17 = vsel %vm973_vm6, %v963_v41, 2102212464  ;;  %v979_v3 = vsel %vm973_vm6, %v966_v4, 920167782 }
 0x153   :  { %v982_v10 = vsel %vm970_vm4, %v960_v19, %v963_v41  ;;  %v983_v42 = vsel %vm973_vm6, %v969_v61, 1326507024  ;;  %vm971_vm10 = vcmp.lt.s32.totalorder %v8386_v30, 2  ;;  %v980_v0 = vsel %vm972_vm0, %v963_v41, %v979_v3 }
 0x154   :  { %v909_v35 = vor.u32 %v908_v62, %v907_v47  ;;  %v912_v27 = vshll.u32 %v911_v37, 23  ;;  %vm4150_vm8 = vcmp.eq.s32.totalorder %v8373_v45, 0  ;;  %v923_v21 = vsel %vm8394_vm14, 0, %v921_v11 }
 0x155   :  { %v974_v39 = vsel %vm970_vm4, %v954_v1, %v957_v31  ;;  %v981_v36 = vsel %vm971_vm10, %v978_v44, %v980_v0  ;;  %v984_v32 = vsel %vm972_vm0, %v966_v4, %v983_v42  ;;  %vm4149_vm2 = vcmp.lt.s32.totalorder %v8373_v45, 2 }
 0x156   :  { %v913_v5 = vor.u32 4788187, %v912_v27  ;;  %v976_v43 = vsel %vm972_vm0, %v960_v19, %v975_v17  ;;  %v985_v58 = vsel %vm971_vm10, %v982_v10, %v984_v32  ;;  %v1046_v2 = vshrl.u32 %v1045_v7, 23 }
 0x157   :  { %vm822_vm5 = vweird.f32 %v8017_v29  ;;  %v8435_v11 = vmul.u32.u64.low %v8381_v12, %v985_v58  ;;  %v8436_v31 = vmul.u32.u64.high %v8381_v12, %v985_v58, %v8435_v11  ;;  %vm4153_vm9 = vcmp.eq.s32.totalorder %v8373_v45, 2 }
 0x158   :  { %v8439_v16 = vmul.u32.u64.low %v8381_v12, %v981_v36  ;;  %v8440_v6 = vmul.u32.u64.high %v8381_v12, %v981_v36, %v8439_v16  ;;  %v914_v28 = vand.u32 2147483647, %v913_v5  ;;  %v916_v8 = vcvt.s32.f32 %v909_v35 }
 0x159   :  { %v7142_v19 = vadd.s32 4294967169, %v1046_v2  ;;  %vm825_vm11 = vcmp.lt.s32.totalorder %v8376_v33, 2  ;;  %vm826_vm12 = vcmp.eq.s32.totalorder %v8376_v33, 0  ;;  %vm829_vm1 = vcmp.eq.s32.totalorder %v8376_v33, 2  ;;  %v249_v33 = vpop.permute.xlu0 %248 }
 0x15a   :  { %v977_v7 = vsel %vm971_vm10, %v974_v39, %v976_v43  ;;  %v7527_v41 = vpop.eup %7526  ;;  %v917_v20 = vmul.f32 %v916_v8, %v914_v28  ;;  %v927_v63 = vadd.s32 3, %v923_v21  ;;  %v1042_v4 = vand.u32 2147483647, %v8371_v18 }
 0x15b   :  { %v1052_v61 = vadd.s32 1, %v7142_v19  ;;  %v7529_v23 = vpop.eup %7528  ;;  %v830_v59 = vxor.u32 2147483648, %v7527_v41  ;;  %v8450_v1 = vand.u32 3, %v923_v21  ;;  %vm995_vm15 = vc.u32 %v8436_v31, %v8439_v16 }
 0x15c   :  { %v996_v47 = vadd.s32 1, %v8440_v6  ;;  %v827_v62 = vxor.u32 2147483648, %v7529_v23  ;;  %v918_v37 = vxor.u32 2147483648, %v917_v20  ;;  %v993_v30 = vmul.u32 %v8381_v12, %v977_v7 }
 0x15d   :  { %vm1053_vm4 = vcmp.gt.s32.totalorder %v1052_v61, 0  ;;  %v831_v44 = vsel %vm829_vm1, %v830_v59, %v7529_v23  ;;  %v4155_v17 = vsel %vm4153_vm9, %v830_v59, %v7529_v23  ;;  %v1049_v36 = vand.u32 8388607, %v1042_v4 }
 0x15e   :  { %v997_v3 = vsel %vm995_vm15, %v996_v47, %v8440_v6  ;;  %v1054_v10 = vsel %vm1053_vm4, %v1052_v61, 0  ;;  %v828_v42 = vsel %vm826_vm12, %v7527_v41, %v827_v62  ;;  %v4152_v35 = vsel %vm4150_vm8, %v7527_v41, %v827_v62  ;;  %v8512_v62 = vld [vmem:[%s11400_s1] ss:$0 sm:$0xff] }
 0x15f   :  { %v919_v27 = vsel %vm836_vm13, %v918_v37, %v917_v20  ;;  %v998_v12 = vadd.s32 %v997_v3, %v993_v30  ;;  %v832_v0 = vsel %vm825_vm11, %v828_v42, %v831_v44  ;;  %v4156_v21 = vsel %vm4149_vm2, %v4152_v35, %v4155_v17 }
 0x160   :  { %v922_v39 = vsel %vm8394_vm14, %v8035_v13, %v919_v27  ;;  %v833_v32 = vsel %vm822_vm5, nan, %v832_v0  ;;  %v4157_v5 = vsel %vm822_vm5, nan, %v4156_v21  ;;  %v928_v58 = vand.u32 3, %v927_v63 }
 0x161   :  { %7530 = vcosq.f32 %v922_v39  ;;  %v999_v43 = vadd.s32 536870912, %v998_v12  ;;  %v7051_v45 = vsel %vm7047_vm3, %v833_v32, %v4157_v5  ;;  %v1056_v2 = vand.u32 31, %v1054_v10 }
 0x162   :  { %7532 = vsinq.f32 %v922_v39  ;;  %7084 = vst.msk [vmem:[%s11401_s4 + $0x18] sm:$0xff] %vm7080_vm7, %v7051_v45  ;;  %vm11457_vm13 = vcmp.eq.s32.totalorder %v7901_v9, 1  ;;  %vm4256_vm14 = vcmp.eq.s32.totalorder %v8450_v1, 2  ;;  %v1050_v28 = vor.u32 8388608, %v1049_v36 }
 0x163   :  { %v8486_v60 = vshrl.u32 %v999_v43, 30  ;;  %v1057_v11 = vsub.s32 32, %v1056_v2  ;;  %v354_v29 = vsel %vm11457_vm13, %v7847_v46, %v249_v33  ;;  %v8493_v8 = vshrl.u32 %v1054_v10, 5  ;;  %vm11458_vm4 = vmmov %vm11457_vm13 }
 0x164   :  { %vm930_vm0 = vcmp.eq.s32.totalorder %v928_v58, 0  ;;  %vm4253_vm6 = vcmp.eq.s32.totalorder %v8450_v1, 0  ;;  %v1059_v19 = vshll.u32 %v11432_v14, %v1056_v2  ;;  %vm929_vm10 = vcmp.lt.s32.totalorder %v928_v58, 2 }
 0x165   :  { %v1001_v6 = vshll.u32 %v8486_v60, 30  ;;  %v1060_v7 = vshrl.u32 %v11433_v25, %v1057_v11  ;;  %v1063_v41 = vshrl.u32 %v11434_v34, %v1057_v11  ;;  %v1066_v20 = vshrl.u32 %v11435_v24, %v1057_v11 }
 0x166   :  { %vm4252_vm8 = vcmp.lt.s32.totalorder %v8450_v1, 2  ;;  %v1062_v63 = vshll.u32 %v11433_v25, %v1056_v2  ;;  %v1068_v61 = vshll.u32 %v11435_v24, %v1056_v2  ;;  %v1069_v23 = vshrl.u32 %v11436_v22, %v1057_v11 }
 0x167   :  { %v8501_v46 = vsub.s32 %v998_v12, %v1001_v6  ;;  %vm926_vm2 = vweird.f32 %v8035_v13  ;;  %vm933_vm5 = vcmp.eq.s32.totalorder %v928_v58, 2  ;;  %v1065_v59 = vshll.u32 %v11434_v34, %v1056_v2 }
 0x168   :  { %v1072_v47 = vshrl.u32 %v11437_v40, %v1057_v11  ;;  %v8515_v37 = vmul.f32 %v8512_v62, %v354_v29  ;;  %v1061_v44 = vor.u32 %v1060_v7, %v1059_v19  ;;  %v1064_v17 = vor.u32 %v1063_v41, %v1062_v63 }
 0x169   :  { %v1004_v30 = vsub.s32 0, %v8501_v46  ;;  %v1070_v3 = vor.u32 %v1069_v23, %v1068_v61  ;;  %v994_v10 = vadd.s32 %v8439_v16, %v8436_v31  ;;  %v1067_v42 = vor.u32 %v1066_v20, %v1065_v59 }
 0x16a   :  { %vm1074_vm9 = vcmp.lt.s32.totalorder %v8493_v8, 1  ;;  %v8521_v35 = vshll.u32 %v1050_v28, 8  ;;  %v1071_v0 = vshll.u32 %v11436_v22, %v1056_v2  ;;  %vm1075_vm11 = vcmp.lt.s32.totalorder %v8493_v8, 2 }
 0x16b   :  { %v7531_v27 = vpop.eup %7530  ;;  %v7139_v12 = vmin.u32 %v1004_v30, %v8501_v46  ;;  %vm1077_vm12 = vcmp.lt.s32.totalorder %v8493_v8, 4  ;;  %v1024_v36 = vsub.s32 4, %v8486_v60  ;;  %vm1076_vm1 = vcmp.lt.s32.totalorder %v8493_v8, 3 }
 0x16c   :  { %v7533_v21 = vpop.eup %7532  ;;  %v934_v39 = vxor.u32 2147483648, %v7531_v27  ;;  %v1083_v31 = vsel %vm1077_vm12, %v1070_v3, 920167782  ;;  %v1073_v5 = vor.u32 %v1072_v47, %v1071_v0  ;;  %v1082_v43 = vsel %vm1074_vm9, %v1061_v44, %v1064_v17 }
 0x16d   :  { %v931_v16 = vxor.u32 2147483648, %v7533_v21  ;;  %v1006_v32 = vclz %v7139_v12  ;;  %v1058_v2 = vshrl.u32 %v11432_v14, %v1057_v11  ;;  %v1079_v29 = vsel %vm1077_vm12, %v1067_v42, 2102212464 }
 0x16e   :  { %v935_v33 = vsel %vm933_vm5, %v934_v39, %v7533_v21  ;;  %v4258_v45 = vsel %vm4256_vm14, %v934_v39, %v7533_v21  ;;  %v1084_v7 = vsel %vm1076_vm1, %v1067_v42, %v1083_v31  ;;  %v1086_v63 = vsel %vm1074_vm9, %v1064_v17, %v1067_v42  ;;  %v253_v42 = vpop.permute.xlu1 %252 }
 0x16f   :  { %v932_v6 = vsel %vm930_vm0, %v7531_v27, %v931_v16  ;;  %v4255_v28 = vsel %vm4253_vm6, %v7531_v27, %v931_v16  ;;  %v7140_v19 = vadd.s32 4294967294, %v1006_v32  ;;  %v1085_v11 = vsel %vm1075_vm11, %v1082_v43, %v1084_v7 }
 0x170   :  { %v936_v41 = vsel %vm929_vm10, %v932_v6, %v935_v33  ;;  %v4259_v20 = vsel %vm4252_vm8, %v4255_v28, %v4258_v45  ;;  %v1087_v58 = vsel %vm1077_vm12, %v1073_v5, 1326507024  ;;  %v1078_v47 = vsel %vm1074_vm9, %v1058_v2, %v1061_v44  ;;  %vm11461_vm8 = vmmov %vm11458_vm4 }
 0x171   :  { %v937_v61 = vsel %vm926_vm2, nan, %v936_v41  ;;  %v4260_v23 = vsel %vm926_vm2, nan, %v4259_v20  ;;  %vm7141_vm15 = vcmp.lt.s32.totalorder %v7140_v19, 0  ;;  %v1088_v30 = vsel %vm1076_vm1, %v1070_v3, %v1087_v58  ;;  %v257_v58 = vpop.permute.xlu0 %256 }
 0x172   :  { %v7052_v1 = vsel %vm7047_vm3, %v937_v61, %v4260_v23  ;;  %v1009_v59 = vsel %vm7141_vm15, 0, %v7140_v19  ;;  %v1080_v12 = vsel %vm1076_vm1, %v1064_v17, %v1079_v29  ;;  %v1089_v0 = vsel %vm1075_vm11, %v1086_v63, %v1088_v30 }
 0x173   :  { %7085 = vst.msk [vmem:[%s11401_s4 + $0x20] sm:$0xff] %vm7080_vm7, %v7052_v1  ;;  %v1010_v13 = vsub.s32 32, %v1009_v59  ;;  %v1014_v27 = vsub.s32 4294967266, %v1009_v59  ;;  %v8572_v21 = vmul.u32.u64.low %v8521_v35, %v1089_v0  ;;  %v8573_v44 = vmul.u32.u64.high %v8521_v35, %v1089_v0, %v8572_v21 }
 0x174   :  { %v8576_v3 = vmul.u32.u64.low %v8521_v35, %v1085_v11  ;;  %v8577_v39 = vmul.u32.u64.high %v8521_v35, %v1085_v11, %v8576_v3  ;;  %v1011_v31 = vshll.u32 %v8501_v46, %v1009_v59  ;;  %v355_v17 = vsel %vm11458_vm4, %v7853_v49, %v253_v42 }
 0x175   :  { %v1012_v16 = vshrl.u32 %v994_v10, %v1010_v13  ;;  %v1015_v32 = vadd.s32 127, %v1014_v27  ;;  %vm940_vm13 = vcmp.lt.s32.totalorder %v8304_v15, 0  ;;  %v1081_v5 = vsel %vm1075_vm11, %v1078_v47, %v1080_v12 }
 0x176   :  { %v1149_v43 = vand.u32 2139095040, %v8515_v37  ;;  %v1025_v2 = vsel %vm940_vm13, %v1024_v36, %v8486_v60  ;;  %vm1099_vm14 = vc.u32 %v8573_v44, %v8576_v3  ;;  %v1100_v46 = vadd.s32 1, %v8577_v39 }
 0x177   :  { %v1013_v33 = vor.u32 %v1012_v16, %v1011_v31  ;;  %v1016_v45 = vshll.u32 %v1015_v32, 23  ;;  %v8595_v49 = vmul.f32 %v8512_v62, %v355_v17  ;;  %vm8599_vm0 = vcmp.le.f32.partialorder %v938_v26, 0.7853982 }
 0x178   :  { %v1150_v10 = vshrl.u32 %v1149_v43, 23  ;;  %v1097_v6 = vmul.u32 %v8521_v35, %v1081_v5  ;;  %v1027_v60 = vsel %vm8599_vm0, 0, %v1025_v2  ;;  %v1101_v36 = vsel %vm1099_vm14, %v1100_v46, %v8577_v39 }
 0x179   :  { %v1017_v29 = vor.u32 4788187, %v1016_v45  ;;  %v1020_v7 = vcvt.s32.f32 %v1013_v33  ;;  %v1146_v20 = vand.u32 2147483647, %v8515_v37  ;;  %v1253_v26 = vand.u32 2139095040, %v8595_v49 }
 0x17a   :  { %v7146_v28 = vadd.s32 4294967169, %v1150_v10  ;;  %v1102_v41 = vadd.s32 %v1101_v36, %v1097_v6  ;;  %v1031_v23 = vadd.s32 3, %v1027_v60  ;;  %v1250_v35 = vand.u32 2147483647, %v8595_v49 }
 0x17b   :  { %v1018_v19 = vand.u32 2147483647, %v1017_v29  ;;  %v1153_v47 = vand.u32 8388607, %v1146_v20  ;;  %v1254_v13 = vshrl.u32 %v1253_v26, 23  ;;  %vm1044_vm10 = vcmp.lt.s32.totalorder %v8371_v18, 0 }
 0x17c   :  { %v1156_v11 = vadd.s32 1, %v7146_v28  ;;  %v1103_v61 = vadd.s32 536870912, %v1102_v41  ;;  %v356_v0 = vsel %vm11461_vm8, %v7851_v48, %v257_v58  ;;  %v8621_v39 = vand.u32 3, %v1031_v23 }
 0x17d   :  { %v1021_v63 = vmul.f32 %v1020_v7, %v1018_v19  ;;  %v8623_v31 = vand.u32 3, %v1027_v60  ;;  %v1154_v17 = vor.u32 8388608, %v1153_v47  ;;  %v8629_v5 = vand.u32 8388607, %v1250_v35 }
 0x17e   :  { %vm1157_vm6 = vcmp.gt.s32.totalorder %v1156_v11, 0  ;;  %v1104_v59 = vshrl.u32 %v1103_v61, 30  ;;  %v7150_v33 = vadd.s32 4294967169, %v1254_v13  ;;  %vm1037_vm2 = vcmp.eq.s32.totalorder %v8621_v39, 2 }
 0x17f   :  { %v1022_v1 = vxor.u32 2147483648, %v1021_v63  ;;  %v1158_v30 = vsel %vm1157_vm6, %v1156_v11, 0  ;;  %vm4359_vm5 = vcmp.eq.s32.totalorder %v8623_v31, 2  ;;  %v1098_v36 = vadd.s32 %v8576_v3, %v8573_v44 }
 0x180   :  { %v1160_v42 = vand.u32 31, %v1158_v30  ;;  %v1105_v12 = vshll.u32 %v1104_v59, 30  ;;  %v1128_v43 = vsub.s32 4, %v1104_v59  ;;  %v8645_v19 = vshrl.u32 %v1158_v30, 5 }
 0x181   :  { %v1023_v27 = vsel %vm940_vm13, %v1022_v1, %v1021_v63  ;;  %v8647_v7 = vshll.u32 %v1154_v17, 8  ;;  %vm1034_vm9 = vcmp.eq.s32.totalorder %v8621_v39, 0  ;;  %vm4356_vm11 = vcmp.eq.s32.totalorder %v8623_v31, 0 }
 0x182   :  { %v1026_v21 = vsel %vm8599_vm0, %v8304_v15, %v1023_v27  ;;  %v1161_v16 = vsub.s32 32, %v1160_v42  ;;  %v8625_v32 = vsub.s32 %v1102_v41, %v1105_v12  ;;  %v1163_v2 = vshll.u32 %v11432_v14, %v1160_v42 }
 0x183   :  { %7534 = vcosq.f32 %v1026_v21  ;;  %v1166_v46 = vshll.u32 %v11433_v25, %v1160_v42  ;;  %v1169_v8 = vshll.u32 %v11434_v34, %v1160_v42  ;;  %v1172_v6 = vshll.u32 %v11435_v24, %v1160_v42 }
 0x184   :  { %7536 = vsinq.f32 %v1026_v21  ;;  %v1164_v48 = vshrl.u32 %v11433_v25, %v1161_v16  ;;  %v1108_v45 = vsub.s32 0, %v8625_v32  ;;  %v1167_v10 = vshrl.u32 %v11434_v34, %v1161_v16 }
 0x185   :  { %v1170_v29 = vshrl.u32 %v11435_v24, %v1161_v16  ;;  %v1173_v60 = vshrl.u32 %v11436_v22, %v1161_v16  ;;  %vm1033_vm12 = vcmp.lt.s32.totalorder %v8621_v39, 2  ;;  %vm4355_vm1 = vcmp.lt.s32.totalorder %v8623_v31, 2 }
 0x186   :  { %v7143_v28 = vmin.u32 %v1108_v45, %v8625_v32  ;;  %v1165_v41 = vor.u32 %v1164_v48, %v1163_v2  ;;  %v1168_v11 = vor.u32 %v1167_v10, %v1166_v46  ;;  %v1258_v44 = vor.u32 8388608, %v8629_v5 }
 0x187   :  { %v1171_v26 = vor.u32 %v1170_v29, %v1169_v8  ;;  %v1174_v63 = vor.u32 %v1173_v60, %v1172_v6  ;;  %v1260_v3 = vadd.s32 1, %v7150_v33  ;;  %v8655_v23 = vmul.f32 %v8512_v62, %v356_v0 }
 0x188   :  { %v1110_v61 = vclz %v7143_v28  ;;  %vm1030_vm15 = vweird.f32 %v8304_v15  ;;  %v1129_v58 = vsel %vm1044_vm10, %v1128_v43, %v1104_v59  ;;  %v1162_v1 = vshrl.u32 %v11432_v14, %v1161_v16 }
 0x189   :  { %v1175_v47 = vshll.u32 %v11436_v22, %v1160_v42  ;;  %v1176_v30 = vshrl.u32 %v11437_v40, %v1161_v16  ;;  %vm1178_vm4 = vcmp.lt.s32.totalorder %v8645_v19, 1  ;;  %vm1180_vm13 = vcmp.lt.s32.totalorder %v8645_v19, 3 }
 0x18a   :  { %v7144_v13 = vadd.s32 4294967294, %v1110_v61  ;;  %vm1181_vm14 = vcmp.lt.s32.totalorder %v8645_v19, 4  ;;  %vm8668_vm0 = vcmp.le.f32.partialorder %v1042_v4, 0.7853982  ;;  %v1186_v42 = vsel %vm1178_vm4, %v1165_v41, %v1168_v11 }
 0x18b   :  { %v1177_v59 = vor.u32 %v1176_v30, %v1175_v47  ;;  %v1183_v12 = vsel %vm1181_vm14, %v1171_v26, 2102212464  ;;  %v1187_v0 = vsel %vm1181_vm14, %v1174_v63, 920167782  ;;  %vm1179_vm8 = vcmp.lt.s32.totalorder %v8645_v19, 2 }
 0x18c   :  { %vm7145_vm6 = vcmp.lt.s32.totalorder %v7144_v13, 0  ;;  %v1182_v4 = vsel %vm1178_vm4, %v1162_v1, %v1165_v41  ;;  %v1188_v16 = vsel %vm1180_vm13, %v1171_v26, %v1187_v0  ;;  %v1184_v48 = vsel %vm1180_vm13, %v1168_v11, %v1183_v12 }
 0x18d   :  { %v7535_v21 = vpop.eup %7534  ;;  %v1113_v43 = vsel %vm7145_vm6, 0, %v7144_v13  ;;  %v1190_v33 = vsel %vm1178_vm4, %v1168_v11, %v1171_v26  ;;  %v1189_v10 = vsel %vm1179_vm8, %v1186_v42, %v1188_v16  ;;  %v1191_v60 = vsel %vm1181_vm14, %v1177_v59, 1326507024 }
 0x18e   :  { %v7537_v17 = vpop.eup %7536  ;;  %v1038_v5 = vxor.u32 2147483648, %v7535_v21  ;;  %v1114_v2 = vsub.s32 32, %v1113_v43  ;;  %v1118_v46 = vsub.s32 4294967266, %v1113_v43  ;;  %v1115_v6 = vshll.u32 %v8625_v32, %v1113_v43 }
 0x18f   :  { %v1035_v45 = vxor.u32 2147483648, %v7537_v17  ;;  %v1192_v32 = vsel %vm1180_vm13, %v1174_v63, %v1191_v60  ;;  %v8715_v31 = vmul.u32.u64.low %v8647_v7, %v1189_v10  ;;  %v8716_v12 = vmul.u32.u64.high %v8647_v7, %v1189_v10, %v8715_v31 }
 0x190   :  { %v1039_v8 = vsel %vm1037_vm2, %v1038_v5, %v7537_v17  ;;  %v4361_v29 = vsel %vm4359_vm5, %v1038_v5, %v7537_v17  ;;  %v1116_v11 = vshrl.u32 %v1098_v36, %v1114_v2  ;;  %v1119_v26 = vadd.s32 127, %v1118_v46 }
 0x191   :  { %v1036_v28 = vsel %vm1034_vm9, %v7535_v21, %v1035_v45  ;;  %v4358_v41 = vsel %vm4356_vm11, %v7535_v21, %v1035_v45  ;;  %vm1261_vm2 = vcmp.gt.s32.totalorder %v1260_v3, 0  ;;  %v1193_v39 = vsel %vm1179_vm8, %v1190_v33, %v1192_v32 }
 0x192   :  { %v1040_v61 = vsel %vm1033_vm12, %v1036_v28, %v1039_v8  ;;  %v4362_v1 = vsel %vm4355_vm1, %v4358_v41, %v4361_v29  ;;  %v1117_v13 = vor.u32 %v1116_v11, %v1115_v6  ;;  %v1120_v59 = vshll.u32 %v1119_v26, 23 }
 0x193   :  { %v1041_v47 = vsel %vm1030_vm15, nan, %v1040_v61  ;;  %v4363_v30 = vsel %vm1030_vm15, nan, %v4362_v1  ;;  %v1131_v63 = vsel %vm8668_vm0, 0, %v1129_v58  ;;  %v1185_v21 = vsel %vm1179_vm8, %v1182_v4, %v1184_v48 }
 0x194   :  { %v7053_v36 = vsel %vm7047_vm3, %v1041_v47, %v4363_v30  ;;  %v1121_v15 = vor.u32 4788187, %v1120_v59  ;;  %v8726_v42 = vmul.u32.u64.low %v8647_v7, %v1193_v39  ;;  %v8727_v0 = vmul.u32.u64.high %v8647_v7, %v1193_v39, %v8726_v42 }
 0x195   :  { %7086 = vst.msk [vmem:[%s11401_s4 + $0x28] sm:$0xff] %vm7080_vm7, %v7053_v36  ;;  %v1262_v16 = vsel %vm1261_vm2, %v1260_v3, 0  ;;  %v1124_v5 = vcvt.s32.f32 %v1117_v13  ;;  %v1135_v33 = vadd.s32 3, %v1131_v63  ;;  %v1204_v45 = vadd.s32 1, %v8716_v12 }
 0x196   :  { %v1122_v17 = vand.u32 2147483647, %v1121_v15  ;;  %v1264_v43 = vand.u32 31, %v1262_v16  ;;  %v8732_v2 = vshll.u32 %v1258_v44, 8  ;;  %v1357_v46 = vand.u32 2139095040, %v8655_v23 }
 0x197   :  { %v1201_v58 = vmul.u32 %v8647_v7, %v1185_v21  ;;  %vm1203_vm5 = vc.u32 %v8727_v0, %v8715_v31  ;;  %v8738_v19 = vand.u32 3, %v1131_v63  ;;  %v1263_v1 = vshrl.u32 %v1262_v16, 5 }
 0x198   :  { %v1125_v10 = vmul.f32 %v1124_v5, %v1122_v17  ;;  %v1265_v8 = vsub.s32 32, %v1264_v43  ;;  %v1205_v3 = vsel %vm1203_vm5, %v1204_v45, %v8716_v12  ;;  %v1267_v4 = vshll.u32 %v11432_v14, %v1264_v43 }
 0x199   :  { %v1270_v48 = vshll.u32 %v11433_v25, %v1264_v43  ;;  %v1206_v44 = vadd.s32 %v1205_v3, %v1201_v58  ;;  %v1273_v60 = vshll.u32 %v11434_v34, %v1264_v43  ;;  %v1276_v41 = vshll.u32 %v11435_v24, %v1264_v43 }
 0x19a   :  { %v1126_v29 = vxor.u32 2147483648, %v1125_v10  ;;  %v1268_v6 = vshrl.u32 %v11433_v25, %v1265_v8  ;;  %v1271_v7 = vshrl.u32 %v11434_v34, %v1265_v8  ;;  %v1274_v28 = vshrl.u32 %v11435_v24, %v1265_v8 }
 0x19b   :  { %v1277_v11 = vshrl.u32 %v11436_v22, %v1265_v8  ;;  %v1207_v61 = vadd.s32 536870912, %v1206_v44  ;;  %v1279_v39 = vshll.u32 %v11436_v22, %v1264_v43  ;;  %v1280_v12 = vshrl.u32 %v11437_v40, %v1265_v8 }
 0x19c   :  { %v1127_v26 = vsel %vm1044_vm10, %v1126_v29, %v1125_v10  ;;  %v1269_v32 = vor.u32 %v1268_v6, %v1267_v4  ;;  %v1272_v30 = vor.u32 %v1271_v7, %v1270_v48  ;;  %v1275_v13 = vor.u32 %v1274_v28, %v1273_v60 }
 0x19d   :  { %v1130_v47 = vsel %vm8668_vm0, %v8371_v18, %v1127_v26  ;;  %v1278_v59 = vor.u32 %v1277_v11, %v1276_v41  ;;  %v8754_v36 = vshrl.u32 %v1207_v61, 30  ;;  %v1136_v15 = vand.u32 3, %v1135_v33 }
 0x19e   :  { %7538 = vcosq.f32 %v1130_v47  ;;  %v1266_v63 = vshrl.u32 %v11432_v14, %v1265_v8  ;;  %v1358_v42 = vshrl.u32 %v1357_v46, 23  ;;  %v1281_v16 = vor.u32 %v1280_v12, %v1279_v39 }
 0x19f   :  { %7540 = vsinq.f32 %v1130_v47  ;;  %v1209_v21 = vshll.u32 %v8754_v36, 30  ;;  %vm1282_vm10 = vcmp.lt.s32.totalorder %v1263_v1, 1  ;;  %vm1285_vm9 = vcmp.lt.s32.totalorder %v1263_v1, 4 }
 0x1a0   :  { %vm1284_vm11 = vcmp.lt.s32.totalorder %v1263_v1, 3  ;;  %v1287_v27 = vsel %vm1285_vm9, %v1275_v13, 2102212464  ;;  %v1290_v17 = vsel %vm1282_vm10, %v1269_v32, %v1272_v30  ;;  %v1291_v5 = vsel %vm1285_vm9, %v1278_v59, 920167782 }
 0x1a1   :  { %v8760_v45 = vsub.s32 %v1206_v44, %v1209_v21  ;;  %vm1283_vm12 = vcmp.lt.s32.totalorder %v1263_v1, 2  ;;  %v1292_v43 = vsel %vm1284_vm11, %v1275_v13, %v1291_v5  ;;  %v1294_v10 = vsel %vm1282_vm10, %v1272_v30, %v1275_v13  ;;  %v261_v5 = vpop.permute.xlu1 %260 }
 0x1a2   :  { %v1293_v58 = vsel %vm1283_vm12, %v1290_v17, %v1292_v43  ;;  %v1295_v33 = vsel %vm1285_vm9, %v1281_v16, 1326507024  ;;  %v1354_v8 = vand.u32 2147483647, %v8655_v23  ;;  %v7154_v46 = vadd.s32 4294967169, %v1358_v42 }
 0x1a3   :  { %v1212_v3 = vsub.s32 0, %v8760_v45  ;;  %v1286_v4 = vsel %vm1282_vm10, %v1266_v63, %v1269_v32  ;;  %v1288_v48 = vsel %vm1284_vm11, %v1272_v30, %v1287_v27  ;;  %v1296_v29 = vsel %vm1284_vm11, %v1278_v59, %v1295_v33 }
 0x1a4   :  { %vm1134_vm1 = vweird.f32 %v8371_v18  ;;  %vm4458_vm15 = vcmp.lt.s32.totalorder %v8738_v19, 2  ;;  %vm1148_vm4 = vcmp.lt.s32.totalorder %v8515_v37, 0  ;;  %v1297_v44 = vsel %vm1283_vm12, %v1294_v10, %v1296_v29 }
 0x1a5   :  { %v8770_v6 = vmul.u32.u64.low %v8732_v2, %v1293_v58  ;;  %v8771_v60 = vmul.u32.u64.high %v8732_v2, %v1293_v58, %v8770_v6  ;;  %vm1137_vm13 = vcmp.lt.s32.totalorder %v1136_v15, 2  ;;  %vm4459_vm14 = vcmp.eq.s32.totalorder %v8738_v19, 0 }
 0x1a6   :  { %vm4462_vm0 = vcmp.eq.s32.totalorder %v8738_v19, 2  ;;  %v7147_v7 = vmin.u32 %v1212_v3, %v8760_v45  ;;  %v1289_v28 = vsel %vm1283_vm12, %v1286_v4, %v1288_v48  ;;  %v1364_v26 = vadd.s32 1, %v7154_v46 }
 0x1a7   :  { %v8779_v41 = vmul.u32.u64.low %v8732_v2, %v1297_v44  ;;  %v8780_v11 = vmul.u32.u64.high %v8732_v2, %v1297_v44, %v8779_v41  ;;  %vm1138_vm6 = vcmp.eq.s32.totalorder %v1136_v15, 0  ;;  %vm1141_vm8 = vcmp.eq.s32.totalorder %v1136_v15, 2 }
 0x1a8   :  { %v7539_v61 = vpop.eup %7538  ;;  %v1214_v32 = vclz %v7147_v7  ;;  %v1361_v47 = vand.u32 8388607, %v1354_v8  ;;  %v1202_v59 = vadd.s32 %v8715_v31, %v8727_v0  ;;  %v1308_v1 = vadd.s32 1, %v8771_v60 }
 0x1a9   :  { %v7541_v30 = vpop.eup %7540  ;;  %v1142_v13 = vxor.u32 2147483648, %v7539_v61  ;;  %vm1365_vm2 = vcmp.gt.s32.totalorder %v1364_v26, 0  ;;  %v1232_v63 = vsub.s32 4, %v8754_v36  ;;  %v1305_v42 = vmul.u32 %v8732_v2, %v1289_v28 }
 0x1aa   :  { %v1139_v39 = vxor.u32 2147483648, %v7541_v30  ;;  %v7148_v12 = vadd.s32 4294967294, %v1214_v32  ;;  %vm1307_vm5 = vc.u32 %v8780_v11, %v8770_v6  ;;  %v1366_v27 = vsel %vm1365_vm2, %v1364_v26, 0 }
 0x1ab   :  { %v1143_v21 = vsel %vm1141_vm8, %v1142_v13, %v7541_v30  ;;  %v4464_v16 = vsel %vm4462_vm0, %v1142_v13, %v7541_v30  ;;  %v1309_v0 = vsel %vm1307_vm5, %v1308_v1, %v8771_v60  ;;  %v1233_v4 = vsel %vm1148_vm4, %v1232_v63, %v8754_v36 }
 0x1ac   :  { %v1140_v17 = vsel %vm1138_vm6, %v7539_v61, %v1139_v39  ;;  %v4461_v31 = vsel %vm4459_vm14, %v7539_v61, %v1139_v39  ;;  %vm7149_vm10 = vcmp.lt.s32.totalorder %v7148_v12, 0  ;;  %v1310_v58 = vadd.s32 %v1309_v0, %v1305_v42 }
 0x1ad   :  { %v1144_v43 = vsel %vm1137_vm13, %v1140_v17, %v1143_v21  ;;  %v4465_v2 = vsel %vm4458_vm15, %v4461_v31, %v4464_v16  ;;  %v1217_v10 = vsel %vm7149_vm10, 0, %v7148_v12  ;;  %vm11464_vm9 = vcmp.eq.s32.totalorder %v7901_v9, 1 }
 0x1ae   :  { %v1145_v33 = vsel %vm1134_vm1, nan, %v1144_v43  ;;  %v4466_v46 = vsel %vm1134_vm1, nan, %v4465_v2  ;;  %v1218_v3 = vsub.s32 32, %v1217_v10  ;;  %v1222_v48 = vsub.s32 4294967266, %v1217_v10 }
 0x1af   :  { %v7054_v15 = vsel %vm7047_vm3, %v1145_v33, %v4466_v46  ;;  %v1311_v29 = vadd.s32 536870912, %v1310_v58  ;;  %v357_v19 = vsel %vm11464_vm9, %v7857_v51, %v261_v5  ;;  %vm8818_vm11 = vcmp.le.f32.partialorder %v1146_v20, 0.7853982 }
 0x1b0   :  { %7087 = vst.msk [vmem:[%s11401_s4 + $0x30] sm:$0xff] %vm7080_vm7, %v7054_v15  ;;  %v1220_v36 = vshrl.u32 %v1202_v59, %v1218_v3  ;;  %v1362_v44 = vor.u32 8388608, %v1361_v47  ;;  %v1368_v60 = vand.u32 31, %v1366_v27  ;;  %v1219_v7 = vshll.u32 %v8760_v45, %v1217_v10 }
 0x1b1   :  { %v1223_v28 = vadd.s32 127, %v1222_v48  ;;  %v1235_v51 = vsel %vm8818_vm11, 0, %v1233_v4  ;;  %v8825_v41 = vshrl.u32 %v1311_v29, 30  ;;  %v8833_v47 = vmul.f32 %v8512_v62, %v357_v19 }
 0x1b2   :  { %v1369_v26 = vsub.s32 32, %v1368_v60  ;;  %v1221_v61 = vor.u32 %v1220_v36, %v1219_v7  ;;  %v1239_v20 = vadd.s32 3, %v1235_v51  ;;  %v8828_v13 = vand.u32 3, %v1235_v51 }
 0x1b3   :  { %v1224_v32 = vshll.u32 %v1223_v28, 23  ;;  %v1313_v30 = vshll.u32 %v8825_v41, 30  ;;  %v8830_v1 = vshll.u32 %v1362_v44, 8  ;;  %v1306_v63 = vadd.s32 %v8770_v6, %v8780_v11 }
 0x1b4   :  { %v1372_v39 = vshrl.u32 %v11433_v25, %v1369_v26  ;;  %v1375_v12 = vshrl.u32 %v11434_v34, %v1369_v26  ;;  %v1367_v42 = vshrl.u32 %v1366_v27, 5  ;;  %v1371_v21 = vshll.u32 %v11432_v14, %v1368_v60 }
 0x1b5   :  { %v1225_v45 = vor.u32 4788187, %v1224_v32  ;;  %v8835_v59 = vsub.s32 %v1310_v58, %v1313_v30  ;;  %v1378_v16 = vshrl.u32 %v11435_v24, %v1369_v26  ;;  %v1228_v31 = vcvt.s32.f32 %v1221_v61 }
 0x1b6   :  { %v1374_v5 = vshll.u32 %v11433_v25, %v1368_v60  ;;  %v1377_v43 = vshll.u32 %v11434_v34, %v1368_v60  ;;  %v1380_v2 = vshll.u32 %v11435_v24, %v1368_v60  ;;  %v1381_v10 = vshrl.u32 %v11436_v22, %v1369_v26 }
 0x1b7   :  { %v1226_v17 = vand.u32 2147483647, %v1225_v45  ;;  %v1316_v0 = vsub.s32 0, %v8835_v59  ;;  %v1384_v58 = vshrl.u32 %v11437_v40, %v1369_v26  ;;  %v1373_v27 = vor.u32 %v1372_v39, %v1371_v21 }
 0x1b8   :  { %v1376_v33 = vor.u32 %v1375_v12, %v1374_v5  ;;  %v1379_v46 = vor.u32 %v1378_v16, %v1377_v43  ;;  %v1382_v3 = vor.u32 %v1381_v10, %v1380_v2  ;;  %v1383_v4 = vshll.u32 %v11436_v22, %v1368_v60 }
 0x1b9   :  { %v1229_v6 = vmul.f32 %v1228_v31, %v1226_v17  ;;  %v7151_v11 = vmin.u32 %v1316_v0, %v8835_v59  ;;  %v1461_v15 = vand.u32 2139095040, %v8833_v47  ;;  %vm1386_vm12 = vcmp.lt.s32.totalorder %v1367_v42, 1 }
 0x1ba   :  { %vm1387_vm1 = vcmp.lt.s32.totalorder %v1367_v42, 2  ;;  %v1336_v19 = vsub.s32 4, %v8825_v41  ;;  %v1370_v36 = vshrl.u32 %v11432_v14, %v1369_v26  ;;  %v1385_v44 = vor.u32 %v1384_v58, %v1383_v4 }
 0x1bb   :  { %v1230_v48 = vxor.u32 2147483648, %v1229_v6  ;;  %v1318_v29 = vclz %v7151_v11  ;;  %vm1388_vm15 = vcmp.lt.s32.totalorder %v1367_v42, 3  ;;  %vm1389_vm13 = vcmp.lt.s32.totalorder %v1367_v42, 4 }
 0x1bc   :  { %v1394_v51 = vsel %vm1386_vm12, %v1373_v27, %v1376_v33  ;;  %v1390_v61 = vsel %vm1386_vm12, %v1370_v36, %v1373_v27  ;;  %v1391_v32 = vsel %vm1389_vm13, %v1379_v46, 2102212464  ;;  %v1395_v30 = vsel %vm1389_vm13, %v1382_v3, 920167782 }
 0x1bd   :  { %v1231_v7 = vsel %vm1148_vm4, %v1230_v48, %v1229_v6  ;;  %v7152_v28 = vadd.s32 4294967294, %v1318_v29  ;;  %v1396_v26 = vsel %vm1388_vm15, %v1379_v46, %v1395_v30  ;;  %v1398_v45 = vsel %vm1386_vm12, %v1376_v33, %v1379_v46 }
 0x1be   :  { %v1234_v60 = vsel %vm8818_vm11, %v8515_v37, %v1231_v7  ;;  %v1397_v12 = vsel %vm1387_vm1, %v1394_v51, %v1396_v26  ;;  %v1399_v21 = vsel %vm1389_vm13, %v1385_v44, 1326507024  ;;  %v1392_v18 = vsel %vm1388_vm15, %v1376_v33, %v1391_v32 }
 0x1bf   :  { %7542 = vcosq.f32 %v1234_v60  ;;  %vm7153_vm14 = vcmp.lt.s32.totalorder %v7152_v28, 0  ;;  %v1400_v31 = vsel %vm1388_vm15, %v1382_v3, %v1399_v21  ;;  %v1240_v27 = vand.u32 3, %v1239_v20 }
 0x1c0   :  { %7544 = vsinq.f32 %v1234_v60  ;;  %v1321_v39 = vsel %vm7153_vm14, 0, %v7152_v28  ;;  %v1401_v5 = vsel %vm1387_vm1, %v1398_v45, %v1400_v31  ;;  %vm1252_vm4 = vcmp.lt.s32.totalorder %v8595_v49, 0  ;;  %v265_v31 = vpop.permute.xlu0 %264 }
 0x1c1   :  { %v1322_v16 = vsub.s32 32, %v1321_v39  ;;  %v1326_v17 = vsub.s32 4294967266, %v1321_v39  ;;  %v1323_v0 = vshll.u32 %v8835_v59, %v1321_v39  ;;  %v1393_v33 = vsel %vm1387_vm1, %v1390_v61, %v1392_v18 }
 0x1c2   :  { %v8869_v43 = vmul.u32.u64.low %v8830_v1, %v1397_v12  ;;  %v8870_v2 = vmul.u32.u64.high %v8830_v1, %v1397_v12, %v8869_v43  ;;  %v8874_v6 = vmul.u32.u64.low %v8830_v1, %v1401_v5  ;;  %v8875_v11 = vmul.u32.u64.high %v8830_v1, %v1401_v5, %v8874_v6 }
 0x1c3   :  { %v1324_v10 = vshrl.u32 %v1306_v63, %v1322_v16  ;;  %v1327_v58 = vadd.s32 127, %v1326_v17  ;;  %v1462_v46 = vshrl.u32 %v1461_v15, 23  ;;  %vm8881_vm0 = vcmp.le.f32.partialorder %v1250_v35, 0.7853982 }
 0x1c4   :  { %v1458_v63 = vand.u32 2147483647, %v8833_v47  ;;  %vm1238_vm6 = vweird.f32 %v8515_v37  ;;  %vm4561_vm8 = vcmp.lt.s32.totalorder %v8828_v13, 2  ;;  %v1337_v20 = vsel %vm1252_vm4, %v1336_v19, %v8825_v41 }
 0x1c5   :  { %v1325_v3 = vor.u32 %v1324_v10, %v1323_v0  ;;  %v1328_v4 = vshll.u32 %v1327_v58, 23  ;;  %v1412_v42 = vadd.s32 1, %v8870_v2  ;;  %v7158_v15 = vadd.s32 4294967169, %v1462_v46 }
 0x1c6   :  { %vm4562_vm2 = vcmp.eq.s32.totalorder %v8828_v13, 0  ;;  %v1409_v48 = vmul.u32 %v8830_v1, %v1393_v33  ;;  %vm1411_vm5 = vc.u32 %v8875_v11, %v8869_v43  ;;  %vm1241_vm10 = vcmp.lt.s32.totalorder %v1240_v27, 2 }
 0x1c7   :  { %v1329_v35 = vor.u32 4788187, %v1328_v4  ;;  %vm4565_vm9 = vcmp.eq.s32.totalorder %v8828_v13, 2  ;;  %v1413_v29 = vsel %vm1411_vm5, %v1412_v42, %v8870_v2  ;;  %v1468_v36 = vadd.s32 1, %v7158_v15  ;;  %v269_v42 = vpop.permute.xlu1 %268 }
 0x1c8   :  { %v1332_v41 = vcvt.s32.f32 %v1325_v3  ;;  %v1339_v19 = vsel %vm8881_vm0, 0, %v1337_v20  ;;  %v1414_v28 = vadd.s32 %v1413_v29, %v1409_v48  ;;  %vm1242_vm11 = vcmp.eq.s32.totalorder %v1240_v27, 0 }
 0x1c9   :  { %v7543_v44 = vpop.eup %7542  ;;  %v1330_v7 = vand.u32 2147483647, %v1329_v35  ;;  %vm1245_vm12 = vcmp.eq.s32.totalorder %v1240_v27, 2  ;;  %vm1469_vm1 = vcmp.gt.s32.totalorder %v1468_v36, 0  ;;  %v1343_v39 = vadd.s32 3, %v1339_v19 }
 0x1ca   :  { %v7545_v51 = vpop.eup %7544  ;;  %v1246_v1 = vxor.u32 2147483648, %v7543_v44  ;;  %v1415_v32 = vadd.s32 536870912, %v1414_v28  ;;  %v1470_v30 = vsel %vm1469_vm1, %v1468_v36, 0  ;;  %v1465_v2 = vand.u32 8388607, %v1458_v63 }
 0x1cb   :  { %v1243_v60 = vxor.u32 2147483648, %v7545_v51  ;;  %v1333_v61 = vmul.f32 %v1332_v41, %v1330_v7  ;;  %v1472_v12 = vand.u32 31, %v1470_v30  ;;  %vm11469_vm15 = vcmp.eq.s32.totalorder %v7901_v9, 1 }
 0x1cc   :  { %v1247_v26 = vsel %vm1245_vm12, %v1246_v1, %v7545_v51  ;;  %v4567_v45 = vsel %vm4565_vm9, %v1246_v1, %v7545_v51  ;;  %v8904_v18 = vshrl.u32 %v1415_v32, 30  ;;  %v358_v3 = vsel %vm11469_vm15, %v7855_v50, %v265_v31  ;;  %vm11470_vm13 = vmmov %vm11469_vm15 }
 0x1cd   :  { %v1244_v21 = vsel %vm1242_vm11, %v7543_v44, %v1243_v60  ;;  %v4564_v16 = vsel %vm4562_vm2, %v7543_v44, %v1243_v60  ;;  %v1334_v17 = vxor.u32 2147483648, %v1333_v61  ;;  %v1473_v10 = vsub.s32 32, %v1472_v12 }
 0x1ce   :  { %v1248_v0 = vsel %vm1241_vm10, %v1244_v21, %v1247_v26  ;;  %v4568_v5 = vsel %vm4561_vm8, %v4564_v16, %v4567_v45  ;;  %v1417_v46 = vshll.u32 %v8904_v18, 30  ;;  %v8930_v37 = vand.u32 3, %v1343_v39 }
 0x1cf   :  { %v1249_v58 = vsel %vm1238_vm6, nan, %v1248_v0  ;;  %v4569_v6 = vsel %vm1238_vm6, nan, %v4568_v5  ;;  %v1335_v33 = vsel %vm1252_vm4, %v1334_v17, %v1333_v61  ;;  %v8932_v4 = vand.u32 3, %v1339_v19 }
 0x1d0   :  { %v7055_v27 = vsel %vm7047_vm3, %v1249_v58, %v4569_v6  ;;  %v1338_v13 = vsel %vm8881_vm0, %v8595_v49, %v1335_v33  ;;  %v8934_v20 = vsub.s32 %v1414_v28, %v1417_v46  ;;  %v1466_v59 = vor.u32 8388608, %v1465_v2 }
 0x1d1   :  { %7088 = vst.msk [vmem:[%s11401_s4 + $0x38] sm:$0xff] %vm7080_vm7, %v7055_v27  ;;  %7546 = vcosq.f32 %v1338_v13  ;;  %v1476_v15 = vshrl.u32 %v11433_v25, %v1473_v10  ;;  %v1479_v35 = vshrl.u32 %v11434_v34, %v1473_v10  ;;  %v1482_v48 = vshrl.u32 %v11435_v24, %v1473_v10 }
 0x1d2   :  { %7548 = vsinq.f32 %v1338_v13  ;;  %v1420_v50 = vsub.s32 0, %v8934_v20  ;;  %v8941_v29 = vmul.f32 %v8512_v62, %v358_v3  ;;  %v1475_v36 = vshll.u32 %v11432_v14, %v1472_v12 }
 0x1d3   :  { %v1478_v44 = vshll.u32 %v11433_v25, %v1472_v12  ;;  %v1481_v7 = vshll.u32 %v11434_v34, %v1472_v12  ;;  %v8949_v41 = vsel %vm11470_vm13, %v7861_v53, %v269_v42  ;;  %vm1349_vm14 = vcmp.eq.s32.totalorder %v8930_v37, 2 }
 0x1d4   :  { %vm4668_vm4 = vcmp.eq.s32.totalorder %v8932_v4, 2  ;;  %v7155_v19 = vmin.u32 %v1420_v50, %v8934_v20  ;;  %v8954_v28 = vshrl.u32 %v1470_v30, 5  ;;  %v1484_v62 = vshll.u32 %v11435_v24, %v1472_v12 }
 0x1d5   :  { %v1485_v51 = vshrl.u32 %v11436_v22, %v1473_v10  ;;  %vm1346_vm0 = vcmp.eq.s32.totalorder %v8930_v37, 0  ;;  %vm4665_vm6 = vcmp.eq.s32.totalorder %v8932_v4, 0  ;;  %v1477_v1 = vor.u32 %v1476_v15, %v1475_v36 }
 0x1d6   :  { %v1480_v60 = vor.u32 %v1479_v35, %v1478_v44  ;;  %v1483_v53 = vor.u32 %v1482_v48, %v1481_v7  ;;  %v8960_v61 = vshll.u32 %v1466_v59, 8  ;;  %vm1345_vm8 = vcmp.lt.s32.totalorder %v8930_v37, 2 }
 0x1d7   :  { %vm4664_vm2 = vcmp.lt.s32.totalorder %v8932_v4, 2  ;;  %v1422_v32 = vclz %v7155_v19  ;;  %v1486_v30 = vor.u32 %v1485_v51, %v1484_v62  ;;  %v1487_v26 = vshll.u32 %v11436_v22, %v1472_v12 }
 0x1d8   :  { %v1488_v45 = vshrl.u32 %v11437_v40, %v1473_v10  ;;  %vm1342_vm5 = vweird.f32 %v8595_v49  ;;  %v1410_v39 = vadd.s32 %v8869_v43, %v8875_v11  ;;  %v1440_v21 = vsub.s32 4, %v8904_v18 }
 0x1d9   :  { %v1474_v16 = vshrl.u32 %v11432_v14, %v1473_v10  ;;  %v1565_v17 = vand.u32 2139095040, %v8941_v29  ;;  %v7156_v31 = vadd.s32 4294967294, %v1422_v32  ;;  %vm1490_vm10 = vcmp.lt.s32.totalorder %v8954_v28, 1 }
 0x1da   :  { %v1489_v0 = vor.u32 %v1488_v45, %v1487_v26  ;;  %vm1493_vm9 = vcmp.lt.s32.totalorder %v8954_v28, 4  ;;  %vm1356_vm11 = vcmp.lt.s32.totalorder %v8655_v23, 0  ;;  %vm1492_vm12 = vcmp.lt.s32.totalorder %v8954_v28, 3 }
 0x1db   :  { %v1495_v12 = vsel %vm1493_vm9, %v1483_v53, 2102212464  ;;  %v1498_v43 = vsel %vm1490_vm10, %v1477_v1, %v1480_v60  ;;  %v1499_v11 = vsel %vm1493_vm9, %v1486_v30, 920167782  ;;  %v7547_v5 = vpop.eup %7546  ;;  %vm7157_vm1 = vcmp.lt.s32.totalorder %v7156_v31, 0 }
 0x1dc   :  { %vm1491_vm15 = vcmp.lt.s32.totalorder %v8954_v28, 2  ;;  %v1494_v2 = vsel %vm1490_vm10, %v1474_v16, %v1477_v1  ;;  %v1500_v10 = vsel %vm1492_vm12, %v1483_v53, %v1499_v11  ;;  %v7549_v58 = vpop.eup %7548  ;;  %v1350_v6 = vxor.u32 2147483648, %v7547_v5 }
 0x1dd   :  { %v1425_v33 = vsel %vm7157_vm1, 0, %v7156_v31  ;;  %v1496_v46 = vsel %vm1492_vm12, %v1480_v60, %v1495_v12  ;;  %v1502_v27 = vsel %vm1490_vm10, %v1480_v60, %v1483_v53  ;;  %v1347_v13 = vxor.u32 2147483648, %v7549_v58 }
 0x1de   :  { %v1426_v3 = vsub.s32 32, %v1425_v33  ;;  %v1430_v42 = vsub.s32 4294967266, %v1425_v33  ;;  %v1501_v59 = vsel %vm1491_vm15, %v1498_v43, %v1500_v10  ;;  %v1351_v15 = vsel %vm1349_vm14, %v1350_v6, %v7549_v58  ;;  %v9040_v43 = vld [vmem:[%s11400_s1] ss:$0 sm:$0xff] }
 0x1df   :  { %v4670_v35 = vsel %vm4668_vm4, %v1350_v6, %v7549_v58  ;;  %v1427_v50 = vshll.u32 %v8934_v20, %v1425_v33  ;;  %v1503_v48 = vsel %vm1493_vm9, %v1489_v0, 1326507024  ;;  %v1348_v36 = vsel %vm1346_vm0, %v7547_v5, %v1347_v13 }
 0x1e0   :  { %v4667_v44 = vsel %vm4665_vm6, %v7547_v5, %v1347_v13  ;;  %v1428_v7 = vshrl.u32 %v1410_v39, %v1426_v3  ;;  %v1431_v19 = vadd.s32 127, %v1430_v42  ;;  %v1352_v62 = vsel %vm1345_vm8, %v1348_v36, %v1351_v15 }
 0x1e1   :  { %v4671_v51 = vsel %vm4664_vm2, %v4667_v44, %v4670_v35  ;;  %v1504_v20 = vsel %vm1492_vm12, %v1486_v30, %v1503_v48  ;;  %v1566_v1 = vshrl.u32 %v1565_v17, 23  ;;  %v1353_v60 = vsel %vm1342_vm5, nan, %v1352_v62 }
 0x1e2   :  { %v4672_v53 = vsel %vm1342_vm5, nan, %v4671_v51  ;;  %v1429_v32 = vor.u32 %v1428_v7, %v1427_v50  ;;  %v1432_v26 = vshll.u32 %v1431_v19, 23  ;;  %v1505_v37 = vsel %vm1491_vm15, %v1502_v27, %v1504_v20 }
 0x1e3   :  { %v7056_v45 = vsel %vm7047_vm3, %v1353_v60, %v4672_v53  ;;  %v9019_v4 = vmul.u32.u64.low %v8960_v61, %v1501_v59  ;;  %v9020_v39 = vmul.u32.u64.high %v8960_v61, %v1501_v59, %v9019_v4  ;;  %v1441_v30 = vsel %vm1356_vm11, %v1440_v21, %v8904_v18 }
 0x1e4   :  { %7089 = vst.msk [vmem:[%s11401_s4 + $0x40] sm:$0xff] %vm7080_vm7, %v7056_v45  ;;  %v1433_v49 = vor.u32 4788187, %v1432_v26  ;;  %v9031_v16 = vmul.u32.u64.low %v8960_v61, %v1505_v37  ;;  %v9032_v17 = vmul.u32.u64.high %v8960_v61, %v1505_v37, %v9031_v16  ;;  %v1497_v31 = vsel %vm1491_vm15, %v1494_v2, %v1496_v46  ;;  %v273_v46 = vpop.permute.xlu0 %272 }
 0x1e5   :  { %v1562_v0 = vand.u32 2147483647, %v8941_v29  ;;  %v7162_v12 = vadd.s32 4294967169, %v1566_v1  ;;  %v9044_v11 = vmul.f32 %v9040_v43, %v8949_v41  ;;  %vm9048_vm13 = vcmp.le.f32.partialorder %v1354_v8, 0.7853982 }
 0x1e6   :  { %v1434_v28 = vand.u32 2147483647, %v1433_v49  ;;  %v1436_v21 = vcvt.s32.f32 %v1429_v32  ;;  %v1443_v5 = vsel %vm9048_vm13, 0, %v1441_v30  ;;  %v1516_v2 = vadd.s32 1, %v9020_v39 }
 0x1e7   :  { %v1572_v10 = vadd.s32 1, %v7162_v12  ;;  %v1513_v6 = vmul.u32 %v8960_v61, %v1497_v31  ;;  %vm1515_vm14 = vc.u32 %v9032_v17, %v9019_v4  ;;  %v1569_v8 = vand.u32 8388607, %v1562_v0 }
 0x1e8   :  { %v1437_v58 = vmul.f32 %v1436_v21, %v1434_v28  ;;  %v1517_v41 = vsel %vm1515_vm14, %v1516_v2, %v9020_v39  ;;  %v1669_v33 = vand.u32 2139095040, %v9044_v11  ;;  %v1447_v13 = vadd.s32 3, %v1443_v5 }
 0x1e9   :  { %vm1573_vm4 = vcmp.gt.s32.totalorder %v1572_v10, 0  ;;  %v1518_v3 = vadd.s32 %v1517_v41, %v1513_v6  ;;  %vm1460_vm0 = vcmp.lt.s32.totalorder %v8833_v47, 0  ;;  %vm11473_vm6 = vcmp.eq.s32.totalorder %v7901_v9, 1 }
 0x1ea   :  { %v1438_v27 = vxor.u32 2147483648, %v1437_v58  ;;  %v1574_v42 = vsel %vm1573_vm4, %v1572_v10, 0  ;;  %v9068_v35 = vsel %vm11473_vm6, %v7859_v52, %v273_v46  ;;  %v9073_v48 = vand.u32 3, %v1443_v5 }
 0x1eb   :  { %v1576_v59 = vand.u32 31, %v1574_v42  ;;  %v1519_v15 = vadd.s32 536870912, %v1518_v3  ;;  %vm9077_vm8 = vcmp.le.f32.partialorder %v1458_v63, 0.7853982  ;;  %v1670_v7 = vshrl.u32 %v1669_v33, 23 }
 0x1ec   :  { %v1439_v61 = vsel %vm1356_vm11, %v1438_v27, %v1437_v58  ;;  %v9081_v19 = vand.u32 3, %v1447_v13  ;;  %v1570_v52 = vor.u32 8388608, %v1569_v8  ;;  %v1666_v1 = vand.u32 2147483647, %v9044_v11 }
 0x1ed   :  { %v1442_v50 = vsel %vm9048_vm13, %v8655_v23, %v1439_v61  ;;  %v1577_v44 = vsub.s32 32, %v1576_v59  ;;  %v1520_v62 = vshrl.u32 %v1519_v15, 30  ;;  %v1585_v26 = vshll.u32 %v11434_v34, %v1576_v59 }
 0x1ee   :  { %7550 = vcosq.f32 %v1442_v50  ;;  %v1588_v45 = vshll.u32 %v11435_v24, %v1576_v59  ;;  %v7166_v39 = vadd.s32 4294967169, %v1670_v7  ;;  %vm1453_vm2 = vcmp.eq.s32.totalorder %v9081_v19, 2 }
 0x1ef   :  { %7552 = vsinq.f32 %v1442_v50  ;;  %v1580_v51 = vshrl.u32 %v11433_v25, %v1577_v44  ;;  %v1583_v20 = vshrl.u32 %v11434_v34, %v1577_v44  ;;  %v1521_v60 = vshll.u32 %v1520_v62, 30 }
 0x1f0   :  { %v1544_v53 = vsub.s32 4, %v1520_v62  ;;  %v1586_v63 = vshrl.u32 %v11435_v24, %v1577_v44  ;;  %v1589_v32 = vshrl.u32 %v11436_v22, %v1577_v44  ;;  %v1592_v37 = vshrl.u32 %v11437_v40, %v1577_v44 }
 0x1f1   :  { %vm4771_vm5 = vcmp.eq.s32.totalorder %v9073_v48, 2  ;;  %v9093_v49 = vsub.s32 %v1518_v3, %v1521_v60  ;;  %v1575_v30 = vshrl.u32 %v1574_v42, 5  ;;  %v1579_v16 = vshll.u32 %v11432_v14, %v1576_v59 }
 0x1f2   :  { %v1582_v31 = vshll.u32 %v11433_v25, %v1576_v59  ;;  %vm1450_vm10 = vcmp.eq.s32.totalorder %v9081_v19, 0  ;;  %vm4768_vm9 = vcmp.eq.s32.totalorder %v9073_v48, 0  ;;  %v1545_v12 = vsel %vm1460_vm0, %v1544_v53, %v1520_v62 }
 0x1f3   :  { %v1587_v18 = vor.u32 %v1586_v63, %v1585_v26  ;;  %v1590_v28 = vor.u32 %v1589_v32, %v1588_v45  ;;  %v1591_v21 = vshll.u32 %v11436_v22, %v1576_v59  ;;  %vm1449_vm11 = vcmp.lt.s32.totalorder %v9081_v19, 2 }
 0x1f4   :  { %vm4767_vm12 = vcmp.lt.s32.totalorder %v9073_v48, 2  ;;  %v1524_v5 = vsub.s32 0, %v9093_v49  ;;  %v1581_v2 = vor.u32 %v1580_v51, %v1579_v16  ;;  %v1584_v10 = vor.u32 %v1583_v20, %v1582_v31 }
 0x1f5   :  { %v9105_v58 = vshll.u32 %v1570_v52, 8  ;;  %vm1446_vm1 = vweird.f32 %v8655_v23  ;;  %v1514_v6 = vadd.s32 %v9019_v4, %v9032_v17  ;;  %v1593_v41 = vor.u32 %v1592_v37, %v1591_v21 }
 0x1f6   :  { %v9112_v8 = vand.u32 8388607, %v1666_v1  ;;  %v1676_v33 = vadd.s32 1, %v7166_v39  ;;  %v7159_v46 = vmin.u32 %v1524_v5, %v9093_v49  ;;  %v9117_v27 = vsel %vm9077_vm8, 0, %v1545_v12 }
 0x1f7   :  { %v1578_v13 = vshrl.u32 %v11432_v14, %v1577_v44  ;;  %vm1597_vm15 = vcmp.lt.s32.totalorder %v1575_v30, 4  ;;  %vm1594_vm13 = vcmp.lt.s32.totalorder %v1575_v30, 1  ;;  %vm1595_vm14 = vcmp.lt.s32.totalorder %v1575_v30, 2 }
 0x1f8   :  { %v1599_v3 = vsel %vm1597_vm15, %v1587_v18, 2102212464  ;;  %v1603_v42 = vsel %vm1597_vm15, %v1590_v28, 920167782  ;;  %v7551_v4 = vpop.eup %7550  ;;  %v1526_v17 = vclz %v7159_v46  ;;  %vm1596_vm4 = vcmp.lt.s32.totalorder %v1575_v30, 3 }
 0x1f9   :  { %v1598_v59 = vsel %vm1594_vm13, %v1578_v13, %v1581_v2  ;;  %v1602_v61 = vsel %vm1594_vm13, %v1581_v2, %v1584_v10  ;;  %v7553_v15 = vpop.eup %7552  ;;  %v1454_v50 = vxor.u32 2147483648, %v7551_v4  ;;  %v1600_v7 = vsel %vm1596_vm4, %v1584_v10, %v1599_v3 }
 0x1fa   :  { %v1606_v62 = vsel %vm1594_vm13, %v1584_v10, %v1587_v18  ;;  %v1607_v52 = vsel %vm1597_vm15, %v1593_v41, 1326507024  ;;  %v1451_v51 = vxor.u32 2147483648, %v7553_v15  ;;  %v7160_v20 = vadd.s32 4294967294, %v1526_v17 }
 0x1fb   :  { %v1604_v60 = vsel %vm1596_vm4, %v1587_v18, %v1603_v42  ;;  %vm1677_vm6 = vcmp.gt.s32.totalorder %v1676_v33, 0  ;;  %v1455_v44 = vsel %vm1453_vm2, %v1454_v50, %v7553_v15  ;;  %v4773_v53 = vsel %vm4771_vm5, %v1454_v50, %v7553_v15 }
 0x1fc   :  { %v1601_v63 = vsel %vm1595_vm14, %v1598_v59, %v1600_v7  ;;  %v1608_v32 = vsel %vm1596_vm4, %v1590_v28, %v1607_v52  ;;  %v1452_v26 = vsel %vm1450_vm10, %v7551_v4, %v1451_v51  ;;  %v4770_v45 = vsel %vm4768_vm9, %v7551_v4, %v1451_v51 }
 0x1fd   :  { %vm7161_vm15 = vcmp.lt.s32.totalorder %v7160_v20, 0  ;;  %v1609_v37 = vsel %vm1595_vm14, %v1606_v62, %v1608_v32  ;;  %v1456_v39 = vsel %vm1449_vm11, %v1452_v26, %v1455_v44  ;;  %v4774_v16 = vsel %vm4767_vm12, %v4770_v45, %v4773_v53 }
 0x1fe   :  { %v1529_v31 = vsel %vm7161_vm15, 0, %v7160_v20  ;;  %v1605_v12 = vsel %vm1595_vm14, %v1602_v61, %v1604_v60  ;;  %v1457_v18 = vsel %vm1446_vm1, nan, %v1456_v39  ;;  %v4775_v28 = vsel %vm1446_vm1, nan, %v4774_v16 }
 0x1ff   :  { %v1530_v21 = vsub.s32 32, %v1529_v31  ;;  %v1678_v5 = vsel %vm1677_vm6, %v1676_v33, 0  ;;  %v7057_v2 = vsel %vm7047_vm3, %v1457_v18, %v4775_v28  ;;  %v1534_v19 = vsub.s32 4294967266, %v1529_v31 }
 0x200   :  { %v9143_v10 = vmul.u32.u64.low %v9105_v58, %v1609_v37  ;;  %v9144_v48 = vmul.u32.u64.high %v9105_v58, %v1609_v37, %v9143_v10  ;;  %7090 = vst.msk [vmem:[%s11401_s4 + $0x48] sm:$0xff] %vm7080_vm7, %v7057_v2  ;;  %v1531_v30 = vshll.u32 %v9093_v49, %v1529_v31  ;;  %v1680_v13 = vand.u32 31, %v1678_v5 }
 0x201   :  { %v1532_v23 = vshrl.u32 %v1514_v6, %v1530_v21  ;;  %v9152_v41 = vmul.u32.u64.low %v9105_v58, %v1605_v12  ;;  %v9153_v46 = vmul.u32.u64.high %v9105_v58, %v1605_v12, %v9152_v41  ;;  %v1535_v33 = vadd.s32 127, %v1534_v19 }
 0x202   :  { %v9157_v42 = vadd.s32 3, %v9117_v27  ;;  %v1674_v4 = vor.u32 8388608, %v9112_v8  ;;  %v9162_v17 = vmul.f32 %v9040_v43, %v9068_v35  ;;  %v1617_v49 = vmul.u32 %v9105_v58, %v1601_v63 }
 0x203   :  { %v1533_v3 = vor.u32 %v1532_v23, %v1531_v30  ;;  %v1536_v59 = vshll.u32 %v1535_v33, 23  ;;  %vm1619_vm2 = vc.u32 %v9144_v48, %v9152_v41  ;;  %v1681_v6 = vsub.s32 32, %v1680_v13 }
 0x204   :  { %v1620_v15 = vadd.s32 1, %v9153_v46  ;;  %v9168_v50 = vshrl.u32 %v1678_v5, 5  ;;  %v1683_v7 = vshll.u32 %v11432_v14, %v1680_v13  ;;  %v1686_v35 = vshll.u32 %v11433_v25, %v1680_v13 }
 0x205   :  { %v1540_v61 = vcvt.s32.f32 %v1533_v3  ;;  %v1537_v62 = vor.u32 4788187, %v1536_v59  ;;  %v1684_v8 = vshrl.u32 %v11433_v25, %v1681_v6  ;;  %v1687_v52 = vshrl.u32 %v11434_v34, %v1681_v6 }
 0x206   :  { %v1621_v58 = vsel %vm1619_vm2, %v1620_v15, %v9153_v46  ;;  %v1689_v51 = vshll.u32 %v11434_v34, %v1680_v13  ;;  %v1690_v20 = vshrl.u32 %v11435_v24, %v1681_v6  ;;  %v1692_v60 = vshll.u32 %v11435_v24, %v1680_v13 }
 0x207   :  { %v1538_v44 = vand.u32 2147483647, %v1537_v62  ;;  %v1622_v53 = vadd.s32 %v1621_v58, %v1617_v49  ;;  %v1685_v63 = vor.u32 %v1684_v8, %v1683_v7  ;;  %v1688_v32 = vor.u32 %v1687_v52, %v1686_v35 }
 0x208   :  { %v1691_v26 = vor.u32 %v1690_v20, %v1689_v51  ;;  %v1693_v45 = vshrl.u32 %v11436_v22, %v1681_v6  ;;  %v1695_v37 = vshll.u32 %v11436_v22, %v1680_v13  ;;  %v1696_v39 = vshrl.u32 %v11437_v40, %v1681_v6 }
 0x209   :  { %v1541_v16 = vmul.f32 %v1540_v61, %v1538_v44  ;;  %v1623_v31 = vadd.s32 536870912, %v1622_v53  ;;  %v9181_v12 = vshll.u32 %v1674_v4, 8  ;;  %v1773_v18 = vand.u32 2139095040, %v9162_v17 }
 0x20a   :  { %v1694_v28 = vor.u32 %v1693_v45, %v1692_v60  ;;  %v1697_v21 = vor.u32 %v1696_v39, %v1695_v37  ;;  %vm1698_vm5 = vcmp.lt.s32.totalorder %v9168_v50, 1  ;;  %vm1699_vm10 = vcmp.lt.s32.totalorder %v9168_v50, 2 }
 0x20b   :  { %v1542_v5 = vxor.u32 2147483648, %v1541_v16  ;;  %v1624_v2 = vshrl.u32 %v1623_v31, 30  ;;  %vm1700_vm9 = vcmp.lt.s32.totalorder %v9168_v50, 3  ;;  %vm1701_vm11 = vcmp.lt.s32.totalorder %v9168_v50, 4 }
 0x20c   :  { %v1706_v19 = vsel %vm1698_vm5, %v1685_v63, %v1688_v32  ;;  %v1707_v10 = vsel %vm1701_vm11, %v1694_v28, 920167782  ;;  %v1710_v30 = vsel %vm1698_vm5, %v1688_v32, %v1691_v26  ;;  %v1711_v23 = vsel %vm1701_vm11, %v1697_v21, 1326507024 }
 0x20d   :  { %v1543_v46 = vsel %vm1460_vm0, %v1542_v5, %v1541_v16  ;;  %v1625_v33 = vshll.u32 %v1624_v2, 30  ;;  %v1682_v13 = vshrl.u32 %v11432_v14, %v1681_v6  ;;  %v1708_v3 = vsel %vm1700_vm9, %v1691_v26, %v1707_v10 }
 0x20e   :  { %v1546_v4 = vsel %vm9077_vm8, %v8833_v47, %v1543_v46  ;;  %v1703_v59 = vsel %vm1701_vm11, %v1691_v26, 2102212464  ;;  %v1712_v49 = vsel %vm1700_vm9, %v1694_v28, %v1711_v23  ;;  %v1774_v61 = vshrl.u32 %v1773_v18, 23 }
 0x20f   :  { %7554 = vcosq.f32 %v1546_v4  ;;  %v9202_v15 = vsub.s32 %v1622_v53, %v1625_v33  ;;  %v1709_v7 = vsel %vm1699_vm10, %v1706_v19, %v1708_v3  ;;  %v1713_v6 = vsel %vm1699_vm10, %v1710_v30, %v1712_v49 }
 0x210   :  { %7556 = vsinq.f32 %v1546_v4  ;;  %v1648_v62 = vsub.s32 4, %v1624_v2  ;;  %v9209_v8 = vmul.u32.u64.low %v9181_v12, %v1713_v6  ;;  %v9210_v36 = vmul.u32.u64.high %v9181_v12, %v1713_v6, %v9209_v8 }
 0x211   :  { %v4869_v35 = vand.u32 3, %v9117_v27  ;;  %v1628_v52 = vsub.s32 0, %v9202_v15  ;;  %v1702_v58 = vsel %vm1698_vm5, %v1682_v13, %v1685_v63  ;;  %v1704_v51 = vsel %vm1700_vm9, %v1688_v32, %v1703_v59 }
 0x212   :  { %v1552_v20 = vand.u32 3, %v9157_v42  ;;  %v9220_v60 = vmul.u32.u64.low %v9181_v12, %v1709_v7  ;;  %v9221_v44 = vmul.u32.u64.high %v9181_v12, %v1709_v7, %v9220_v60  ;;  %v7170_v53 = vadd.s32 4294967169, %v1774_v61 }
 0x213   :  { %vm1564_vm0 = vcmp.lt.s32.totalorder %v8941_v29, 0  ;;  %v7163_v27 = vmin.u32 %v1628_v52, %v9202_v15  ;;  %v1770_v26 = vand.u32 2147483647, %v9162_v17  ;;  %vm9229_vm8 = vcmp.le.f32.partialorder %v1562_v0, 0.7853982 }
 0x214   :  { %v1649_v42 = vsel %vm1564_vm0, %v1648_v62, %v1624_v2  ;;  %v1705_v32 = vsel %vm1699_vm10, %v1702_v58, %v1704_v51  ;;  %vm4870_vm12 = vcmp.lt.s32.totalorder %v4869_v35, 2  ;;  %vm4871_vm1 = vcmp.eq.s32.totalorder %v4869_v35, 0 }
 0x215   :  { %v1630_v45 = vclz %v7163_v27  ;;  %vm1723_vm13 = vc.u32 %v9210_v36, %v9220_v60  ;;  %vm1550_vm14 = vweird.f32 %v8833_v47  ;;  %vm1553_vm4 = vcmp.lt.s32.totalorder %v1552_v20, 2  ;;  %v277_v27 = vpop.permute.xlu1 %276 }
 0x216   :  { %vm4874_vm6 = vcmp.eq.s32.totalorder %v4869_v35, 2  ;;  %v1724_v0 = vadd.s32 1, %v9221_v44  ;;  %v1780_v37 = vadd.s32 1, %v7170_v53  ;;  %v1651_v16 = vsel %vm9229_vm8, 0, %v1649_v42 }
 0x217   :  { %v7164_v39 = vadd.s32 4294967294, %v1630_v45  ;;  %v1721_v50 = vmul.u32 %v9181_v12, %v1705_v32  ;;  %v1777_v31 = vand.u32 8388607, %v1770_v26  ;;  %vm1554_vm15 = vcmp.eq.s32.totalorder %v1552_v20, 0 }
 0x218   :  { %vm1557_vm2 = vcmp.eq.s32.totalorder %v1552_v20, 2  ;;  %v1725_v18 = vsel %vm1723_vm13, %v1724_v0, %v9221_v44  ;;  %vm1781_vm5 = vcmp.gt.s32.totalorder %v1780_v37, 0  ;;  %v1618_v21 = vadd.s32 %v9152_v41, %v9144_v48 }
 0x219   :  { %v7555_v28 = vpop.eup %7554  ;;  %vm7165_vm10 = vcmp.lt.s32.totalorder %v7164_v39, 0  ;;  %v1726_v5 = vadd.s32 %v1725_v18, %v1721_v50  ;;  %v1782_v2 = vsel %vm1781_vm5, %v1780_v37, 0  ;;  %v1655_v23 = vadd.s32 3, %v1651_v16 }
 0x21a   :  { %v7557_v19 = vpop.eup %7556  ;;  %v1558_v10 = vxor.u32 2147483648, %v7555_v28  ;;  %v1633_v30 = vsel %vm7165_vm10, 0, %v7164_v39  ;;  %v1784_v12 = vand.u32 31, %v1782_v2  ;;  %v1778_v3 = vor.u32 8388608, %v1777_v31 }
 0x21b   :  { %v1555_v46 = vxor.u32 2147483648, %v7557_v19  ;;  %v1634_v33 = vsub.s32 32, %v1633_v30  ;;  %v1638_v13 = vsub.s32 4294967266, %v1633_v30  ;;  %v1635_v49 = vshll.u32 %v9202_v15, %v1633_v30 }
 0x21c   :  { %v1559_v4 = vsel %vm1557_vm2, %v1558_v10, %v7557_v19  ;;  %v4876_v59 = vsel %vm4874_vm6, %v1558_v10, %v7557_v19  ;;  %v1727_v61 = vadd.s32 536870912, %v1726_v5  ;;  %v1785_v58 = vsub.s32 32, %v1784_v12 }
 0x21d   :  { %v1556_v48 = vsel %vm1554_vm15, %v7555_v28, %v1555_v46  ;;  %v4873_v41 = vsel %vm4871_vm1, %v7555_v28, %v1555_v46  ;;  %v1636_v7 = vshrl.u32 %v1618_v21, %v1634_v33  ;;  %v1639_v6 = vadd.s32 127, %v1638_v13 }
 0x21e   :  { %v1560_v62 = vsel %vm1553_vm4, %v1556_v48, %v1559_v4  ;;  %v4877_v8 = vsel %vm4870_vm12, %v4873_v41, %v4876_v59  ;;  %v1728_v52 = vshrl.u32 %v1727_v61, 30  ;;  %v9266_v20 = vand.u32 3, %v1655_v23 }
 0x21f   :  { %v1561_v51 = vsel %vm1550_vm14, nan, %v1560_v62  ;;  %v4878_v44 = vsel %vm1550_vm14, nan, %v4877_v8  ;;  %v1637_v15 = vor.u32 %v1636_v7, %v1635_v49  ;;  %v1640_v53 = vshll.u32 %v1639_v6, 23 }
 0x220   :  { %v7058_v42 = vsel %vm7047_vm3, %v1561_v51, %v4878_v44  ;;  %v1729_v32 = vshll.u32 %v1728_v52, 30  ;;  %v9268_v45 = vand.u32 3, %v1651_v16  ;;  %vm1668_vm9 = vcmp.lt.s32.totalorder %v9044_v11, 0  ;;  %v281_v51 = vpop.permute.xlu0 %280 }
 0x221   :  { %7091 = vst.msk [vmem:[%s11401_s4 + $0x50] sm:$0xff] %vm7080_vm7, %v7058_v42  ;;  %v1641_v35 = vor.u32 4788187, %v1640_v53  ;;  %v1722_v47 = vadd.s32 %v9220_v60, %v9210_v36  ;;  %v9275_v37 = vshll.u32 %v1778_v3, 8  ;;  %vm11478_vm11 = vcmp.eq.s32.totalorder %v7901_v9, 1 }
 0x222   :  { %v9273_v0 = vsub.s32 %v1726_v5, %v1729_v32  ;;  %v361_v39 = vsel %vm11478_vm11, %v7865_v55, %v277_v27  ;;  %v1644_v31 = vcvt.s32.f32 %v1637_v15  ;;  %v1788_v18 = vshrl.u32 %v11433_v25, %v1785_v58 }
 0x223   :  { %v1642_v50 = vand.u32 2147483647, %v1641_v35  ;;  %v1794_v16 = vshrl.u32 %v11435_v24, %v1785_v58  ;;  %v1752_v21 = vsub.s32 4, %v1728_v52  ;;  %v1783_v19 = vshrl.u32 %v1782_v2, 5 }
 0x224   :  { %v1732_v28 = vsub.s32 0, %v9273_v0  ;;  %v1791_v36 = vshrl.u32 %v11434_v34, %v1785_v58  ;;  %v1787_v5 = vshll.u32 %v11432_v14, %v1784_v12  ;;  %v1793_v10 = vshll.u32 %v11434_v34, %v1784_v12 }
 0x225   :  { %v1645_v60 = vmul.f32 %v1644_v31, %v1642_v50  ;;  %v1797_v30 = vshrl.u32 %v11436_v22, %v1785_v58  ;;  %vm9289_vm12 = vcmp.le.f32.partialorder %v1666_v1, 0.7853982  ;;  %v1790_v46 = vshll.u32 %v11433_v25, %v1784_v12 }
 0x226   :  { %v7167_v23 = vmin.u32 %v1732_v28, %v9273_v0  ;;  %v1796_v2 = vshll.u32 %v11435_v24, %v1784_v12  ;;  %v9297_v33 = vmul.f32 %v9040_v43, %v361_v39  ;;  %v1786_v3 = vshrl.u32 %v11432_v14, %v1785_v58 }
 0x227   :  { %v1646_v13 = vxor.u32 2147483648, %v1645_v60  ;;  %v1789_v4 = vor.u32 %v1788_v18, %v1787_v5  ;;  %v1795_v59 = vor.u32 %v1794_v16, %v1793_v10  ;;  %v1753_v1 = vsel %vm1668_vm9, %v1752_v21, %v1728_v52 }
 0x228   :  { %v1734_v49 = vclz %v7167_v23  ;;  %v1792_v61 = vor.u32 %v1791_v36, %v1790_v46  ;;  %v1798_v48 = vor.u32 %v1797_v30, %v1796_v2  ;;  %v1799_v7 = vshll.u32 %v11436_v22, %v1784_v12 }
 0x229   :  { %v1647_v41 = vsel %vm1564_vm0, %v1646_v13, %v1645_v60  ;;  %v1800_v6 = vshrl.u32 %v11437_v40, %v1785_v58  ;;  %vm1802_vm1 = vcmp.lt.s32.totalorder %v1783_v19, 1  ;;  %vm1804_vm13 = vcmp.lt.s32.totalorder %v1783_v19, 3 }
 0x22a   :  { %v1650_v62 = vsel %vm9229_vm8, %v8941_v29, %v1647_v41  ;;  %v7168_v8 = vadd.s32 4294967294, %v1734_v49  ;;  %vm1805_vm14 = vcmp.lt.s32.totalorder %v1783_v19, 4  ;;  %v1806_v44 = vsel %vm1802_vm1, %v1786_v3, %v1789_v4  ;;  %vm11481_vm8 = vmmov %vm11478_vm11 }
 0x22b   :  { %7558 = vcosq.f32 %v1650_v62  ;;  %v1801_v52 = vor.u32 %v1800_v6, %v1799_v7  ;;  %v1807_v15 = vsel %vm1805_vm14, %v1795_v59, 2102212464  ;;  %v1810_v58 = vsel %vm1802_vm1, %v1789_v4, %v1792_v61 }
 0x22c   :  { %7560 = vsinq.f32 %v1650_v62  ;;  %vm7169_vm0 = vcmp.lt.s32.totalorder %v7168_v8, 0  ;;  %v1808_v12 = vsel %vm1804_vm13, %v1792_v61, %v1807_v15  ;;  %vm1803_vm4 = vcmp.lt.s32.totalorder %v1783_v19, 2 }
 0x22d   :  { %v1737_v53 = vsel %vm7169_vm0, 0, %v7168_v8  ;;  %v1811_v63 = vsel %vm1805_vm14, %v1798_v48, 920167782  ;;  %v362_v27 = vsel %vm11481_vm8, %v7863_v54, %v281_v51  ;;  %v1814_v39 = vsel %vm1802_vm1, %v1792_v61, %v1795_v59 }
 0x22e   :  { %v1738_v42 = vsub.s32 32, %v1737_v53  ;;  %v1742_v32 = vsub.s32 4294967266, %v1737_v53  ;;  %v1812_v35 = vsel %vm1804_vm13, %v1795_v59, %v1811_v63  ;;  %v9321_v50 = vsel %vm9289_vm12, 0, %v1753_v1 }
 0x22f   :  { %v1809_v31 = vsel %vm1803_vm4, %v1806_v44, %v1808_v12  ;;  %v1813_v18 = vsel %vm1803_vm4, %v1810_v58, %v1812_v35  ;;  %v1815_v16 = vsel %vm1805_vm14, %v1801_v52, 1326507024  ;;  %vm4974_vm6 = vcmp.eq.s32.totalorder %v9268_v45, 0 }
 0x230   :  { %v1739_v54 = vshll.u32 %v9273_v0, %v1737_v53  ;;  %v1740_v28 = vshrl.u32 %v1722_v47, %v1738_v42  ;;  %v1743_v21 = vadd.s32 127, %v1742_v32  ;;  %v1816_v36 = vsel %vm1804_vm13, %v1798_v48, %v1815_v16 }
 0x231   :  { %vm4973_vm15 = vcmp.lt.s32.totalorder %v9268_v45, 2  ;;  %v1817_v60 = vsel %vm1803_vm4, %v1814_v39, %v1816_v36  ;;  %v9332_v5 = vmul.u32.u64.low %v9275_v37, %v1813_v18  ;;  %v9333_v10 = vmul.u32.u64.high %v9275_v37, %v1813_v18, %v9332_v5 }
 0x232   :  { %v1877_v30 = vand.u32 2139095040, %v9297_v33  ;;  %vm1654_vm2 = vweird.f32 %v8941_v29  ;;  %v1741_v23 = vor.u32 %v1740_v28, %v1739_v54  ;;  %v1744_v46 = vshll.u32 %v1743_v21, 23  ;;  %v285_v21 = vpop.permute.xlu1 %284 }
 0x233   :  { %v9339_v47 = vmul.u32.u64.low %v9275_v37, %v1817_v60  ;;  %v9340_v0 = vmul.u32.u64.high %v9275_v37, %v1817_v60, %v9339_v47  ;;  %vm1657_vm5 = vcmp.lt.s32.totalorder %v9266_v20, 2  ;;  %vm4977_vm10 = vcmp.eq.s32.totalorder %v9268_v45, 2 }
 0x234   :  { %v1874_v19 = vand.u32 2147483647, %v9297_v33  ;;  %v1878_v2 = vshrl.u32 %v1877_v30, 23  ;;  %vm1658_vm11 = vcmp.eq.s32.totalorder %v9266_v20, 0  ;;  %vm1661_vm1 = vcmp.eq.s32.totalorder %v9266_v20, 2 }
 0x235   :  { %v1745_v13 = vor.u32 4788187, %v1744_v46  ;;  %v9348_v3 = vmul.f32 %v9040_v43, %v362_v27  ;;  %v7559_v4 = vpop.eup %7558  ;;  %v1759_v59 = vadd.s32 3, %v9321_v50  ;;  %v1825_v49 = vmul.u32 %v9275_v37, %v1809_v31 }
 0x236   :  { %v1828_v1 = vadd.s32 1, %v9333_v10  ;;  %v7174_v61 = vadd.s32 4294967169, %v1878_v2  ;;  %v7561_v48 = vpop.eup %7560  ;;  %v1662_v41 = vxor.u32 2147483648, %v7559_v4  ;;  %v1748_v6 = vcvt.s32.f32 %v1741_v23 }
 0x237   :  { %v1746_v7 = vand.u32 2147483647, %v1745_v13  ;;  %vm1827_vm13 = vc.u32 %v9340_v0, %v9332_v5  ;;  %v1659_v62 = vxor.u32 2147483648, %v7561_v48  ;;  %v1881_v51 = vand.u32 8388607, %v1874_v19 }
 0x238   :  { %v1829_v8 = vsel %vm1827_vm13, %v1828_v1, %v9333_v10  ;;  %v1884_v52 = vadd.s32 1, %v7174_v61  ;;  %v1663_v37 = vsel %vm1661_vm1, %v1662_v41, %v7561_v48  ;;  %v4979_v44 = vsel %vm4977_vm10, %v1662_v41, %v7561_v48 }
 0x239   :  { %v1749_v15 = vmul.f32 %v1748_v6, %v1746_v7  ;;  %v1830_v12 = vadd.s32 %v1829_v8, %v1825_v49  ;;  %v1660_v58 = vsel %vm1658_vm11, %v7559_v4, %v1659_v62  ;;  %v4976_v53 = vsel %vm4974_vm6, %v7559_v4, %v1659_v62 }
 0x23a   :  { %vm1885_vm14 = vcmp.gt.s32.totalorder %v1884_v52, 0  ;;  %v1981_v63 = vand.u32 2139095040, %v9348_v3  ;;  %v1664_v27 = vsel %vm1657_vm5, %v1660_v58, %v1663_v37  ;;  %v4980_v42 = vsel %vm4973_vm15, %v4976_v53, %v4979_v44 }
 0x23b   :  { %v1750_v32 = vxor.u32 2147483648, %v1749_v15  ;;  %v1831_v35 = vadd.s32 536870912, %v1830_v12  ;;  %v1665_v39 = vsel %vm1654_vm2, nan, %v1664_v27  ;;  %v4981_v31 = vsel %vm1654_vm2, nan, %v4980_v42 }
 0x23c   :  { %v1886_v18 = vsel %vm1885_vm14, %v1884_v52, 0  ;;  %v7059_v16 = vsel %vm7047_vm3, %v1665_v39, %v4981_v31  ;;  %v1882_v28 = vor.u32 8388608, %v1881_v51  ;;  %vm9388_vm0 = vcmp.le.f32.partialorder %v1770_v26, 0.7853982 }
 0x23d   :  { %v1751_v54 = vsel %vm1668_vm9, %v1750_v32, %v1749_v15  ;;  %v1832_v20 = vshrl.u32 %v1831_v35, 30  ;;  %7092 = vst.msk [vmem:[%s11401_s4 + $0x58] sm:$0xff] %vm7080_vm7, %v7059_v16  ;;  %vm1772_vm9 = vcmp.lt.s32.totalorder %v9162_v17, 0  ;;  %v1888_v36 = vand.u32 31, %v1886_v18 }
 0x23e   :  { %v1754_v29 = vsel %vm9289_vm12, %v9044_v11, %v1751_v54  ;;  %v1982_v60 = vshrl.u32 %v1981_v63, 23  ;;  %v9393_v10 = vand.u32 3, %v1759_v59  ;;  %v9396_v30 = vand.u32 3, %v9321_v50  ;;  %vm11484_vm12 = vmmov %vm11481_vm8 }
 0x23f   :  { %7562 = vcosq.f32 %v1754_v29  ;;  %v1833_v23 = vshll.u32 %v1832_v20, 30  ;;  %v1856_v55 = vsub.s32 4, %v1832_v20  ;;  %v1889_v46 = vsub.s32 32, %v1888_v36 }
 0x240   :  { %7564 = vsinq.f32 %v1754_v29  ;;  %v9401_v26 = vsel %vm11484_vm12, %v7869_v57, %v285_v21  ;;  %v9405_v47 = vadd.s32 %v9332_v5, %v9340_v0  ;;  %v9409_v13 = vshll.u32 %v1882_v28, 8 }
 0x241   :  { %v9407_v2 = vsub.s32 %v1830_v12, %v1833_v23  ;;  %v1978_v50 = vand.u32 2147483647, %v9348_v3  ;;  %v9412_v4 = vshrl.u32 %v1886_v18, 5  ;;  %v1892_v59 = vshrl.u32 %v11433_v25, %v1889_v46 }
 0x242   :  { %v1895_v49 = vshrl.u32 %v11434_v34, %v1889_v46  ;;  %v7178_v1 = vadd.s32 4294967169, %v1982_v60  ;;  %vm1765_vm4 = vcmp.eq.s32.totalorder %v9393_v10, 2  ;;  %vm5080_vm8 = vcmp.eq.s32.totalorder %v9396_v30, 2 }
 0x243   :  { %v1836_v57 = vsub.s32 0, %v9407_v2  ;;  %v1891_v5 = vshll.u32 %v11432_v14, %v1888_v36  ;;  %v1894_v0 = vshll.u32 %v11433_v25, %v1888_v36  ;;  %v1898_v61 = vshrl.u32 %v11435_v24, %v1889_v46 }
 0x244   :  { %vm1762_vm6 = vcmp.eq.s32.totalorder %v9393_v10, 0  ;;  %vm5077_vm15 = vcmp.eq.s32.totalorder %v9396_v30, 0  ;;  %v1857_v48 = vsel %vm1772_vm9, %v1856_v55, %v1832_v20  ;;  %v1897_v41 = vshll.u32 %v11434_v34, %v1888_v36 }
 0x245   :  { %v1900_v7 = vshll.u32 %v11435_v24, %v1888_v36  ;;  %v1901_v6 = vshrl.u32 %v11436_v22, %v1889_v46  ;;  %vm1761_vm2 = vcmp.lt.s32.totalorder %v9393_v10, 2  ;;  %vm5076_vm5 = vcmp.lt.s32.totalorder %v9396_v30, 2 }
 0x246   :  { %v7171_v62 = vmin.u32 %v1836_v57, %v9407_v2  ;;  %v1893_v8 = vor.u32 %v1892_v59, %v1891_v5  ;;  %v1896_v51 = vor.u32 %v1895_v49, %v1894_v0  ;;  %v9434_v52 = vand.u32 8388607, %v1978_v50 }
 0x247   :  { %vm1758_vm10 = vweird.f32 %v9044_v11  ;;  %v1899_v37 = vor.u32 %v1898_v61, %v1897_v41  ;;  %v1902_v44 = vor.u32 %v1901_v6, %v1900_v7  ;;  %v1903_v15 = vshll.u32 %v11436_v22, %v1888_v36 }
 0x248   :  { %v1904_v12 = vshrl.u32 %v11437_v40, %v1889_v46  ;;  %v1838_v58 = vclz %v7171_v62  ;;  %v1859_v53 = vsel %vm9388_vm0, 0, %v1857_v48  ;;  %vm1906_vm11 = vcmp.lt.s32.totalorder %v9412_v4, 1 }
 0x249   :  { %v1988_v63 = vadd.s32 1, %v7178_v1  ;;  %v1890_v27 = vshrl.u32 %v11432_v14, %v1889_v46  ;;  %vm1907_vm1 = vcmp.lt.s32.totalorder %v9412_v4, 2  ;;  %vm1909_vm13 = vcmp.lt.s32.totalorder %v9412_v4, 4  ;;  %v7563_v32 = vpop.eup %7562 }
 0x24a   :  { %v1905_v42 = vor.u32 %v1904_v12, %v1903_v15  ;;  %v7172_v35 = vadd.s32 4294967294, %v1838_v58  ;;  %vm1908_vm14 = vcmp.lt.s32.totalorder %v9412_v4, 3  ;;  %v1911_v39 = vsel %vm1909_vm13, %v1899_v37, 2102212464  ;;  %v7565_v18 = vpop.eup %7564 }
 0x24b   :  { %v1914_v31 = vsel %vm1906_vm11, %v1893_v8, %v1896_v51  ;;  %v1766_v16 = vxor.u32 2147483648, %v7563_v32  ;;  %v1910_v54 = vsel %vm1906_vm11, %v1890_v27, %v1893_v8  ;;  %v1912_v20 = vsel %vm1908_vm14, %v1896_v51, %v1911_v39 }
 0x24c   :  { %v1915_v28 = vsel %vm1909_vm13, %v1902_v44, 920167782  ;;  %v1763_v21 = vxor.u32 2147483648, %v7565_v18  ;;  %vm7173_vm12 = vcmp.lt.s32.totalorder %v7172_v35, 0  ;;  %v1918_v36 = vsel %vm1906_vm11, %v1896_v51, %v1899_v37 }
 0x24d   :  { %v1916_v29 = vsel %vm1908_vm14, %v1899_v37, %v1915_v28  ;;  %v1767_v60 = vsel %vm1765_vm4, %v1766_v16, %v7565_v18  ;;  %v5082_v23 = vsel %vm5080_vm8, %v1766_v16, %v7565_v18  ;;  %v1841_v55 = vsel %vm7173_vm12, 0, %v7172_v35 }
 0x24e   :  { %v1917_v46 = vsel %vm1907_vm1, %v1914_v31, %v1916_v29  ;;  %v1764_v59 = vsel %vm1762_vm6, %v7563_v32, %v1763_v21  ;;  %v5079_v49 = vsel %vm5077_vm15, %v7563_v32, %v1763_v21  ;;  %v1842_v1 = vsub.s32 32, %v1841_v55 }
 0x24f   :  { %v1843_v57 = vshll.u32 %v9407_v2, %v1841_v55  ;;  %v1768_v5 = vsel %vm1761_vm2, %v1764_v59, %v1767_v60  ;;  %v5083_v0 = vsel %vm5076_vm5, %v5079_v49, %v5082_v23  ;;  %v1846_v61 = vsub.s32 4294967266, %v1841_v55 }
 0x250   :  { %v1919_v48 = vsel %vm1909_vm13, %v1905_v42, 1326507024  ;;  %v1769_v41 = vsel %vm1758_vm10, nan, %v1768_v5  ;;  %v5084_v7 = vsel %vm1758_vm10, nan, %v5083_v0  ;;  %v1844_v6 = vshrl.u32 %v9405_v47, %v1842_v1 }
 0x251   :  { %v1920_v2 = vsel %vm1908_vm14, %v1902_v44, %v1919_v48  ;;  %v7060_v10 = vsel %vm7047_vm3, %v1769_v41, %v5084_v7  ;;  %v1847_v30 = vadd.s32 127, %v1846_v61  ;;  %v1863_v62 = vadd.s32 3, %v1859_v53 }
 0x252   :  { %v1921_v8 = vsel %vm1907_vm1, %v1918_v36, %v1920_v2  ;;  %7093 = vst.msk [vmem:[%s11401_s4 + $0x60] sm:$0xff] %vm7080_vm7, %v7060_v10  ;;  %v1845_v11 = vor.u32 %v1844_v6, %v1843_v57  ;;  %v1913_v47 = vsel %vm1907_vm1, %v1910_v54, %v1912_v20  ;;  %vm1989_vm4 = vcmp.gt.s32.totalorder %v1988_v63, 0 }
 0x253   :  { %v9495_v51 = vmul.u32.u64.low %v9409_v13, %v1921_v8  ;;  %v9496_v37 = vmul.u32.u64.high %v9409_v13, %v1921_v8, %v9495_v51  ;;  %v1848_v44 = vshll.u32 %v1847_v30, 23  ;;  %v1990_v58 = vsel %vm1989_vm4, %v1988_v63, 0 }
 0x254   :  { %v9499_v15 = vmul.u32.u64.low %v9409_v13, %v1917_v46  ;;  %v9500_v12 = vmul.u32.u64.high %v9409_v13, %v1917_v46, %v9499_v15  ;;  %v9503_v42 = vand.u32 3, %v1859_v53  ;;  %v1992_v32 = vand.u32 31, %v1990_v58 }
 0x255   :  { %v1849_v27 = vor.u32 4788187, %v1848_v44  ;;  %v9507_v4 = vmul.f32 %v9040_v43, %v9401_v26  ;;  %v9509_v35 = vand.u32 3, %v1863_v62  ;;  %v1929_v39 = vmul.u32 %v9409_v13, %v1913_v47 }
 0x256   :  { %vm1931_vm8 = vc.u32 %v9496_v37, %v9499_v15  ;;  %v1986_v31 = vor.u32 8388608, %v9434_v52  ;;  %v1852_v16 = vcvt.s32.f32 %v1845_v11  ;;  %v1932_v63 = vadd.s32 1, %v9500_v12 }
 0x257   :  { %v1850_v18 = vand.u32 2147483647, %v1849_v27  ;;  %v1993_v53 = vsub.s32 32, %v1992_v32  ;;  %v1991_v54 = vshrl.u32 %v1990_v58, 5  ;;  %v1995_v20 = vshll.u32 %v11432_v14, %v1992_v32 }
 0x258   :  { %v1998_v43 = vshll.u32 %v11433_v25, %v1992_v32  ;;  %v2001_v26 = vshll.u32 %v11434_v34, %v1992_v32  ;;  %v1933_v13 = vsel %vm1931_vm8, %v1932_v63, %v9500_v12  ;;  %v2004_v29 = vshll.u32 %v11435_v24, %v1992_v32 }
 0x259   :  { %v1853_v28 = vmul.f32 %v1852_v16, %v1850_v18  ;;  %v1996_v21 = vshrl.u32 %v11433_v25, %v1993_v53  ;;  %v1934_v52 = vadd.s32 %v1933_v13, %v1929_v39  ;;  %v1999_v36 = vshrl.u32 %v11434_v34, %v1993_v53 }
 0x25a   :  { %v2002_v60 = vshrl.u32 %v11435_v24, %v1993_v53  ;;  %v2005_v23 = vshrl.u32 %v11436_v22, %v1993_v53  ;;  %v2007_v59 = vshll.u32 %v11436_v22, %v1992_v32  ;;  %v2008_v49 = vshrl.u32 %v11437_v40, %v1993_v53 }
 0x25b   :  { %v1854_v55 = vxor.u32 2147483648, %v1853_v28  ;;  %v1997_v46 = vor.u32 %v1996_v21, %v1995_v20  ;;  %v1935_v1 = vadd.s32 536870912, %v1934_v52  ;;  %v2000_v57 = vor.u32 %v1999_v36, %v1998_v43 }
 0x25c   :  { %v2003_v5 = vor.u32 %v2002_v60, %v2001_v26  ;;  %v2006_v0 = vor.u32 %v2005_v23, %v2004_v29  ;;  %v2009_v48 = vor.u32 %v2008_v49, %v2007_v59  ;;  %v2026_v41 = vshll.u32 %v1986_v31, 8 }
 0x25d   :  { %v1855_v61 = vsel %vm1772_vm9, %v1854_v55, %v1853_v28  ;;  %v2085_v7 = vand.u32 2139095040, %v9507_v4  ;;  %v1936_v2 = vshrl.u32 %v1935_v1, 30  ;;  %vm2010_vm6 = vcmp.lt.s32.totalorder %v1991_v54, 1 }
 0x25e   :  { %v1858_v6 = vsel %vm9388_vm0, %v9162_v17, %v1855_v61  ;;  %vm2013_vm15 = vcmp.lt.s32.totalorder %v1991_v54, 4  ;;  %v1994_v10 = vshrl.u32 %v11432_v14, %v1993_v53  ;;  %v2018_v30 = vsel %vm2010_vm6, %v1997_v46, %v2000_v57 }
 0x25f   :  { %7566 = vcosq.f32 %v1858_v6  ;;  %v2019_v62 = vsel %vm2013_vm15, %v2006_v0, 920167782  ;;  %v1937_v8 = vshll.u32 %v1936_v2, 30  ;;  %vm2012_vm2 = vcmp.lt.s32.totalorder %v1991_v54, 3 }
 0x260   :  { %7568 = vsinq.f32 %v1858_v6  ;;  %v2015_v11 = vsel %vm2013_vm15, %v2003_v5, 2102212464  ;;  %vm2011_vm9 = vcmp.lt.s32.totalorder %v1991_v54, 2  ;;  %v2020_v47 = vsel %vm2012_vm2, %v2003_v5, %v2019_v62 }
 0x261   :  { %v2022_v51 = vsel %vm2010_vm6, %v2000_v57, %v2003_v5  ;;  %v2023_v44 = vsel %vm2013_vm15, %v2009_v48, 1326507024  ;;  %v9534_v12 = vsub.s32 %v1934_v52, %v1937_v8  ;;  %v2014_v45 = vsel %vm2010_vm6, %v1994_v10, %v1997_v46 }
 0x262   :  { %v2021_v58 = vsel %vm2011_vm9, %v2018_v30, %v2020_v47  ;;  %v2024_v27 = vsel %vm2012_vm2, %v2006_v0, %v2023_v44  ;;  %v2016_v32 = vsel %vm2012_vm2, %v2000_v57, %v2015_v11  ;;  %vm9544_vm0 = vcmp.le.f32.partialorder %v1874_v19, 0.7853982 }
 0x263   :  { %v2025_v39 = vsel %vm2011_vm9, %v2022_v51, %v2024_v27  ;;  %v9538_v31 = vmul.u32.u64.low %v2026_v41, %v2021_v58  ;;  %v9539_v18 = vmul.u32.u64.high %v2026_v41, %v2021_v58, %v9538_v31  ;;  %v1940_v63 = vsub.s32 0, %v9534_v12 }
 0x264   :  { %v1960_v53 = vsub.s32 4, %v1936_v2  ;;  %vm1876_vm5 = vcmp.lt.s32.totalorder %v9297_v33, 0  ;;  %v9550_v20 = vmul.u32.u64.low %v2026_v41, %v2025_v39  ;;  %v9551_v43 = vmul.u32.u64.high %v2026_v41, %v2025_v39, %v9550_v20 }
 0x265   :  { %v2086_v26 = vshrl.u32 %v2085_v7, 23  ;;  %vm1862_vm10 = vweird.f32 %v9162_v17  ;;  %vm5179_vm11 = vcmp.lt.s32.totalorder %v9503_v42, 2  ;;  %vm5180_vm1 = vcmp.eq.s32.totalorder %v9503_v42, 0 }
 0x266   :  { %v7175_v19 = vmin.u32 %v1940_v63, %v9534_v12  ;;  %v2017_v28 = vsel %vm2011_vm9, %v2014_v45, %v2016_v32  ;;  %vm1865_vm13 = vcmp.lt.s32.totalorder %v9509_v35, 2  ;;  %vm5183_vm14 = vcmp.eq.s32.totalorder %v9503_v42, 2 }
 0x267   :  { %v2036_v13 = vadd.s32 1, %v9539_v18  ;;  %v7182_v21 = vadd.s32 4294967169, %v2086_v26  ;;  %vm1866_vm12 = vcmp.eq.s32.totalorder %v9509_v35, 0  ;;  %vm1869_vm4 = vcmp.eq.s32.totalorder %v9509_v35, 2 }
 0x268   :  { %v1942_v29 = vclz %v7175_v19  ;;  %v1961_v52 = vsel %vm1876_vm5, %v1960_v53, %v1936_v2  ;;  %v2033_v60 = vmul.u32 %v2026_v41, %v2017_v28  ;;  %vm2035_vm8 = vc.u32 %v9551_v43, %v9538_v31 }
 0x269   :  { %v7567_v36 = vpop.eup %7566  ;;  %v2082_v54 = vand.u32 2147483647, %v9507_v4  ;;  %v2092_v23 = vadd.s32 1, %v7182_v21  ;;  %v1930_v59 = vadd.s32 %v9499_v15, %v9496_v37  ;;  %v2037_v1 = vsel %vm2035_vm8, %v2036_v13, %v9539_v18 }
 0x26a   :  { %v7569_v55 = vpop.eup %7568  ;;  %v1870_v46 = vxor.u32 2147483648, %v7567_v36  ;;  %v7176_v49 = vadd.s32 4294967294, %v1942_v29  ;;  %v1963_v5 = vsel %vm9544_vm0, 0, %v1961_v52  ;;  %v2038_v0 = vadd.s32 %v2037_v1, %v2033_v60  ;;  %v289_v52 = vpop.permute.xlu0 %288 }
 0x26b   :  { %v1867_v57 = vxor.u32 2147483648, %v7569_v55  ;;  %vm2093_vm6 = vcmp.gt.s32.totalorder %v2092_v23, 0  ;;  %v2089_v62 = vand.u32 8388607, %v2082_v54  ;;  %v1967_v45 = vadd.s32 3, %v1963_v5 }
 0x26c   :  { %v1871_v61 = vsel %vm1869_vm4, %v1870_v46, %v7569_v55  ;;  %v5185_v48 = vsel %vm5183_vm14, %v1870_v46, %v7569_v55  ;;  %vm7177_vm15 = vcmp.lt.s32.totalorder %v7176_v49, 0  ;;  %v2094_v41 = vsel %vm2093_vm6, %v2092_v23, 0 }
 0x26d   :  { %v1868_v37 = vsel %vm1866_vm12, %v7567_v36, %v1867_v57  ;;  %v5182_v15 = vsel %vm5180_vm1, %v7567_v36, %v1867_v57  ;;  %v1945_v7 = vsel %vm7177_vm15, 0, %v7176_v49  ;;  %v2039_v6 = vadd.s32 536870912, %v2038_v0 }
 0x26e   :  { %v1872_v2 = vsel %vm1865_vm13, %v1868_v37, %v1871_v61  ;;  %v5186_v10 = vsel %vm5179_vm11, %v5182_v15, %v5185_v48  ;;  %v1946_v30 = vsub.s32 32, %v1945_v7  ;;  %v1950_v47 = vsub.s32 4294967266, %v1945_v7 }
 0x26f   :  { %v1873_v8 = vsel %vm1862_vm10, nan, %v1872_v2  ;;  %v5187_v11 = vsel %vm1862_vm10, nan, %v5186_v10  ;;  %v2040_v51 = vshrl.u32 %v2039_v6, 30  ;;  %v2096_v58 = vand.u32 31, %v2094_v41 }
 0x270   :  { %v7061_v44 = vsel %vm7047_vm3, %v1873_v8, %v5187_v11  ;;  %v1948_v35 = vshrl.u32 %v1930_v59, %v1946_v30  ;;  %v1947_v42 = vshll.u32 %v9534_v12, %v1945_v7  ;;  %v1951_v27 = vadd.s32 127, %v1950_v47 }
 0x271   :  { %7094 = vst.msk [vmem:[%s11401_s4 + $0x68] sm:$0xff] %vm7080_vm7, %v7061_v44  ;;  %v2041_v32 = vshll.u32 %v2040_v51, 30  ;;  %v2064_v39 = vsub.s32 4, %v2040_v51  ;;  %v2090_v17 = vor.u32 8388608, %v2089_v62  ;;  %v2097_v18 = vsub.s32 32, %v2096_v58 }
 0x272   :  { %v1949_v63 = vor.u32 %v1948_v35, %v1947_v42  ;;  %v1952_v53 = vshll.u32 %v1951_v27, 23  ;;  %v9600_v26 = vand.u32 3, %v1967_v45  ;;  %v9602_v19 = vand.u32 3, %v1963_v5 }
 0x273   :  { %v9598_v20 = vsub.s32 %v2038_v0, %v2041_v32  ;;  %vm9606_vm2 = vcmp.le.f32.partialorder %v1978_v50, 0.7853982  ;;  %vm1980_vm9 = vcmp.lt.s32.totalorder %v9348_v3, 0  ;;  %v2034_v13 = vadd.s32 %v9538_v31, %v9551_v43 }
 0x274   :  { %v1953_v12 = vor.u32 4788187, %v1952_v53  ;;  %v2100_v29 = vshrl.u32 %v11433_v25, %v2097_v18  ;;  %v2065_v36 = vsel %vm1980_vm9, %v2064_v39, %v2040_v51  ;;  %v2099_v60 = vshll.u32 %v11432_v14, %v2096_v58 }
 0x275   :  { %v2044_v21 = vsub.s32 0, %v9598_v20  ;;  %v2106_v50 = vshrl.u32 %v11435_v24, %v2097_v18  ;;  %v9619_v23 = vshll.u32 %v2090_v17, 8  ;;  %v1956_v46 = vcvt.s32.f32 %v1949_v63 }
 0x276   :  { %v1954_v55 = vand.u32 2147483647, %v1953_v12  ;;  %v2103_v31 = vshrl.u32 %v11434_v34, %v2097_v18  ;;  %v2095_v43 = vshrl.u32 %v2094_v41, 5  ;;  %v2102_v49 = vshll.u32 %v11433_v25, %v2096_v58 }
 0x277   :  { %v7179_v59 = vmin.u32 %v2044_v21, %v9598_v20  ;;  %v2105_v1 = vshll.u32 %v11434_v34, %v2096_v58  ;;  %vm11489_vm10 = vcmp.eq.s32.totalorder %v7901_v9, 1  ;;  %v9630_v61 = vsel %vm9606_vm2, 0, %v2065_v36 }
 0x278   :  { %v364_v57 = vsel %vm11489_vm10, %v7867_v56, %v289_v52  ;;  %v1957_v5 = vmul.f32 %v1956_v46, %v1954_v55  ;;  %v2101_v48 = vor.u32 %v2100_v29, %v2099_v60  ;;  %v2108_v15 = vshll.u32 %v11435_v24, %v2096_v58 }
 0x279   :  { %v2046_v0 = vclz %v7179_v59  ;;  %v2107_v37 = vor.u32 %v2106_v50, %v2105_v1  ;;  %v2109_v41 = vshrl.u32 %v11436_v22, %v2097_v18  ;;  %v2112_v7 = vshrl.u32 %v11437_v40, %v2097_v18  ;;  %v293_v59 = vpop.permute.xlu1 %292 }
 0x27a   :  { %v1958_v6 = vxor.u32 2147483648, %v1957_v5  ;;  %v2104_v10 = vor.u32 %v2103_v31, %v2102_v49  ;;  %v2111_v30 = vshll.u32 %v11436_v22, %v2096_v58  ;;  %v2098_v56 = vshrl.u32 %v11432_v14, %v2097_v18 }
 0x27b   :  { %v7180_v2 = vadd.s32 4294967294, %v2046_v0  ;;  %v2110_v62 = vor.u32 %v2109_v41, %v2108_v15  ;;  %vm2114_vm11 = vcmp.lt.s32.totalorder %v2095_v43, 1  ;;  %vm2115_vm1 = vcmp.lt.s32.totalorder %v2095_v43, 2 }
 0x27c   :  { %v1959_v8 = vsel %vm1876_vm5, %v1958_v6, %v1957_v5  ;;  %v2113_v11 = vor.u32 %v2112_v7, %v2111_v30  ;;  %vm2117_vm14 = vcmp.lt.s32.totalorder %v2095_v43, 4  ;;  %vm2116_vm12 = vcmp.lt.s32.totalorder %v2095_v43, 3 }
 0x27d   :  { %vm7181_vm13 = vcmp.lt.s32.totalorder %v7180_v2, 0  ;;  %v1962_v47 = vsel %vm9544_vm0, %v9297_v33, %v1959_v8  ;;  %v2119_v44 = vsel %vm2117_vm14, %v2107_v37, 2102212464  ;;  %v2122_v58 = vsel %vm2114_vm11, %v2101_v48, %v2104_v10 }
 0x27e   :  { %v2049_v51 = vsel %vm7181_vm13, 0, %v7180_v2  ;;  %7570 = vcosq.f32 %v1962_v47  ;;  %v2123_v27 = vsel %vm2117_vm14, %v2110_v62, 920167782  ;;  %v2126_v32 = vsel %vm2114_vm11, %v2104_v10, %v2107_v37 }
 0x27f   :  { %v2050_v35 = vsub.s32 32, %v2049_v51  ;;  %v2054_v45 = vsub.s32 4294967266, %v2049_v51  ;;  %7572 = vsinq.f32 %v1962_v47  ;;  %v2051_v42 = vshll.u32 %v9598_v20, %v2049_v51  ;;  %v9655_v20 = vld [vmem:[%s11400_s1] ss:$0 sm:$0xff] }
 0x280   :  { %v2124_v16 = vsel %vm2116_vm12, %v2107_v37, %v2123_v27  ;;  %v2127_v18 = vsel %vm2117_vm14, %v2113_v11, 1326507024  ;;  %v2118_v63 = vsel %vm2114_vm11, %v2098_v56, %v2101_v48  ;;  %v9658_v21 = vmul.f32 %v9655_v20, %v364_v57  ;;  %v11490_v48 = vld [vmem:[#allocation3_spill] sm:$0xff] }
 0x281   :  { %v2052_v39 = vshrl.u32 %v2034_v13, %v2050_v35  ;;  %v2055_v17 = vadd.s32 127, %v2054_v45  ;;  %v2125_v53 = vsel %vm2115_vm1, %v2122_v58, %v2124_v16  ;;  %v2128_v12 = vsel %vm2116_vm12, %v2110_v62, %v2127_v18 }
 0x282   :  { %v2120_v52 = vsel %vm2116_vm12, %v2104_v10, %v2119_v44  ;;  %v2129_v36 = vsel %vm2115_vm1, %v2126_v32, %v2128_v12  ;;  %v9667_v55 = vmul.u32.u64.low %v9619_v23, %v2125_v53  ;;  %v9668_v46 = vmul.u32.u64.high %v9619_v23, %v2125_v53, %v9667_v55 }
 0x283   :  { %v2053_v13 = vor.u32 %v2052_v39, %v2051_v42  ;;  %v2056_v29 = vshll.u32 %v2055_v17, 23  ;;  %v9663_v60 = vmul.u32.u64.low %v9619_v23, %v2129_v36  ;;  %v9664_v50 = vmul.u32.u64.high %v9619_v23, %v2129_v36, %v9663_v60 }
 0x284   :  { %vm5282_vm0 = vcmp.lt.s32.totalorder %v9602_v19, 2  ;;  %vm5283_vm5 = vcmp.eq.s32.totalorder %v9602_v19, 0  ;;  %vm5286_vm4 = vcmp.eq.s32.totalorder %v9602_v19, 2  ;;  %vm1966_vm8 = vweird.f32 %v9297_v33  ;;  %v297_v33 = vpop.permute.xlu0 %296 }
 0x285   :  { %v2057_v31 = vor.u32 4788187, %v2056_v29  ;;  %vm1969_vm6 = vcmp.lt.s32.totalorder %v9600_v26, 2  ;;  %v2071_v49 = vadd.s32 3, %v9630_v61  ;;  %v2121_v1 = vsel %vm2115_vm1, %v2118_v63, %v2120_v52 }
 0x286   :  { %v2189_v57 = vand.u32 2139095040, %v9658_v21  ;;  %vm1970_vm15 = vcmp.eq.s32.totalorder %v9600_v26, 0  ;;  %v2060_v0 = vcvt.s32.f32 %v2053_v13  ;;  %v365_v37 = vsel %vm11489_vm10, %v11490_v48, %v293_v59 }
 0x287   :  { %v2058_v5 = vand.u32 2147483647, %v2057_v31  ;;  %vm2139_vm11 = vc.u32 %v9664_v50, %v9667_v55  ;;  %v2140_v15 = vadd.s32 1, %v9668_v46  ;;  %v2186_v41 = vand.u32 2147483647, %v9658_v21 }
 0x288   :  { %v2190_v7 = vshrl.u32 %v2189_v57, 23  ;;  %v7571_v43 = vpop.eup %7570  ;;  %vm1973_vm1 = vcmp.eq.s32.totalorder %v9600_v26, 2  ;;  %v9689_v2 = vand.u32 3, %v9630_v61  ;;  %v2137_v10 = vmul.u32 %v9619_v23, %v2121_v1  ;;  %v11493_v57 = vld [vmem:[#allocation2_spill] sm:$0xff] }
 0x289   :  { %v2061_v6 = vmul.f32 %v2060_v0, %v2058_v5  ;;  %v7573_v30 = vpop.eup %7572  ;;  %v1974_v56 = vxor.u32 2147483648, %v7571_v43  ;;  %v9692_v62 = vand.u32 3, %v2071_v49  ;;  %v2141_v8 = vsel %vm2139_vm11, %v2140_v15, %v9668_v46 }
 0x28a   :  { %v7186_v11 = vadd.s32 4294967169, %v2190_v7  ;;  %v1971_v47 = vxor.u32 2147483648, %v7573_v30  ;;  %v2142_v44 = vadd.s32 %v2141_v8, %v2137_v10  ;;  %v9696_v35 = vmul.f32 %v9655_v20, %v365_v37 }
 0x28b   :  { %v2062_v51 = vxor.u32 2147483648, %v2061_v6  ;;  %v1975_v45 = vsel %vm1973_vm1, %v1974_v56, %v7573_v30  ;;  %v5288_v61 = vsel %vm5286_vm4, %v1974_v56, %v7573_v30  ;;  %v2193_v23 = vand.u32 8388607, %v2186_v41 }
 0x28c   :  { %v2196_v58 = vadd.s32 1, %v7186_v11  ;;  %v1972_v42 = vsel %vm1970_vm15, %v7571_v43, %v1971_v47  ;;  %v5285_v27 = vsel %vm5283_vm5, %v7571_v43, %v1971_v47  ;;  %v2143_v39 = vadd.s32 536870912, %v2142_v44 }
 0x28d   :  { %v2063_v32 = vsel %vm1980_vm9, %v2062_v51, %v2061_v6  ;;  %v1976_v17 = vsel %vm1969_vm6, %v1972_v42, %v1975_v45  ;;  %v5289_v16 = vsel %vm5282_vm0, %v5285_v27, %v5288_v61  ;;  %v2293_v19 = vand.u32 2139095040, %v9696_v35  ;;  %vm11494_vm6 = vmmov %vm11489_vm10 }
 0x28e   :  { %v2066_v18 = vsel %vm9606_vm2, %v9348_v3, %v2063_v32  ;;  %vm2197_vm13 = vcmp.gt.s32.totalorder %v2196_v58, 0  ;;  %v1977_v63 = vsel %vm1966_vm8, nan, %v1976_v17  ;;  %v5290_v53 = vsel %vm1966_vm8, nan, %v5289_v16 }
 0x28f   :  { %7574 = vcosq.f32 %v2066_v18  ;;  %v2144_v12 = vshrl.u32 %v2143_v39, 30  ;;  %v7062_v26 = vsel %vm7047_vm3, %v1977_v63, %v5290_v53  ;;  %v2198_v13 = vsel %vm2197_vm13, %v2196_v58, 0 }
 0x290   :  { %7576 = vsinq.f32 %v2066_v18  ;;  %7095 = vst.msk [vmem:[%s11401_s4 + $0x70] sm:$0xff] %vm7080_vm7, %v7062_v26  ;;  %v2200_v52 = vand.u32 31, %v2198_v13  ;;  %v2194_v36 = vor.u32 8388608, %v2193_v23  ;;  %vm9728_vm2 = vcmp.le.f32.partialorder %v2082_v54, 0.7853982 }
 0x291   :  { %v2145_v28 = vshll.u32 %v2144_v12, 30  ;;  %v2168_v29 = vsub.s32 4, %v2144_v12  ;;  %vm2084_vm9 = vcmp.lt.s32.totalorder %v9507_v4, 0  ;;  %vm2074_vm14 = vcmp.eq.s32.totalorder %v9692_v62, 0 }
 0x292   :  { %v2201_v59 = vsub.s32 32, %v2200_v52  ;;  %vm2077_vm12 = vcmp.eq.s32.totalorder %v9692_v62, 2  ;;  %vm5386_vm0 = vcmp.eq.s32.totalorder %v9689_v2, 0  ;;  %vm5389_vm5 = vcmp.eq.s32.totalorder %v9689_v2, 2 }
 0x293   :  { %v9733_v46 = vsub.s32 %v2142_v44, %v2145_v28  ;;  %v2294_v31 = vshrl.u32 %v2293_v19, 23  ;;  %vm2073_vm4 = vcmp.lt.s32.totalorder %v9692_v62, 2  ;;  %vm5385_vm8 = vcmp.lt.s32.totalorder %v9689_v2, 2 }
 0x294   :  { %v2138_v54 = vadd.s32 %v9667_v55, %v9664_v50  ;;  %v2169_v1 = vsel %vm2084_vm9, %v2168_v29, %v2144_v12  ;;  %v9749_v5 = vsel %vm11494_vm6, %v11493_v57, %v297_v33  ;;  %vm2070_vm15 = vweird.f32 %v9348_v3 }
 0x295   :  { %v2148_v49 = vsub.s32 0, %v9733_v46  ;;  %v2204_v0 = vshrl.u32 %v11433_v25, %v2201_v59  ;;  %v2207_v48 = vshrl.u32 %v11434_v34, %v2201_v59  ;;  %v2210_v37 = vshrl.u32 %v11435_v24, %v2201_v59 }
 0x296   :  { %v9755_v15 = vshll.u32 %v2194_v36, 8  ;;  %v2199_v55 = vshrl.u32 %v2198_v13, 5  ;;  %v2203_v7 = vshll.u32 %v11432_v14, %v2200_v52  ;;  %v2213_v43 = vshrl.u32 %v11436_v22, %v2201_v59 }
 0x297   :  { %v7183_v50 = vmin.u32 %v2148_v49, %v9733_v46  ;;  %v9762_v6 = vsel %vm9728_vm2, 0, %v2169_v1  ;;  %v2206_v10 = vshll.u32 %v11433_v25, %v2200_v52  ;;  %v2209_v30 = vshll.u32 %v11434_v34, %v2200_v52 }
 0x298   :  { %v7190_v56 = vadd.s32 4294967169, %v2294_v31  ;;  %v2202_v47 = vshrl.u32 %v11432_v14, %v2201_v59  ;;  %v2205_v51 = vor.u32 %v2204_v0, %v2203_v7  ;;  %v2212_v44 = vshll.u32 %v11435_v24, %v2200_v52 }
 0x299   :  { %v7575_v8 = vpop.eup %7574  ;;  %v2150_v11 = vclz %v7183_v50  ;;  %v2208_v23 = vor.u32 %v2207_v48, %v2206_v10  ;;  %v2211_v58 = vor.u32 %v2210_v37, %v2209_v30  ;;  %v2216_v42 = vshrl.u32 %v11437_v40, %v2201_v59 }
 0x29a   :  { %v7577_v45 = vpop.eup %7576  ;;  %v2078_v61 = vxor.u32 2147483648, %v7575_v8  ;;  %v2214_v39 = vor.u32 %v2213_v43, %v2212_v44  ;;  %v2215_v17 = vshll.u32 %v11436_v22, %v2200_v52  ;;  %vm2218_vm10 = vcmp.lt.s32.totalorder %v2199_v55, 1 }
 0x29b   :  { %v2075_v27 = vxor.u32 2147483648, %v7577_v45  ;;  %v7184_v32 = vadd.s32 4294967294, %v2150_v11  ;;  %vm2219_vm11 = vcmp.lt.s32.totalorder %v2199_v55, 2  ;;  %vm2220_vm13 = vcmp.lt.s32.totalorder %v2199_v55, 3 }
 0x29c   :  { %v2079_v16 = vsel %vm2077_vm12, %v2078_v61, %v7577_v45  ;;  %v5391_v18 = vsel %vm5389_vm5, %v2078_v61, %v7577_v45  ;;  %v2217_v12 = vor.u32 %v2216_v42, %v2215_v17  ;;  %v2226_v62 = vsel %vm2218_vm10, %v2205_v51, %v2208_v23 }
 0x29d   :  { %v2076_v63 = vsel %vm2074_vm14, %v7575_v8, %v2075_v27  ;;  %v5388_v53 = vsel %vm5386_vm0, %v7575_v8, %v2075_v27  ;;  %vm7185_vm1 = vcmp.lt.s32.totalorder %v7184_v32, 0  ;;  %vm2221_vm14 = vcmp.lt.s32.totalorder %v2199_v55, 4 }
 0x29e   :  { %v2080_v26 = vsel %vm2073_vm4, %v2076_v63, %v2079_v16  ;;  %v5392_v13 = vsel %vm5385_vm8, %v5388_v53, %v5391_v18  ;;  %v2153_v19 = vsel %vm7185_vm1, 0, %v7184_v32  ;;  %v2223_v59 = vsel %vm2221_vm14, %v2211_v58, 2102212464 }
 0x29f   :  { %v2081_v28 = vsel %vm2070_vm15, nan, %v2080_v26  ;;  %v5393_v29 = vsel %vm2070_vm15, nan, %v5392_v13  ;;  %v2154_v52 = vsub.s32 32, %v2153_v19  ;;  %v2158_v33 = vsub.s32 4294967266, %v2153_v19 }
 0x2a0   :  { %v7063_v36 = vsel %vm7047_vm3, %v2081_v28, %v5393_v29  ;;  %v2155_v2 = vshll.u32 %v9733_v46, %v2153_v19  ;;  %v2227_v49 = vsel %vm2221_vm14, %v2214_v39, 920167782  ;;  %v2230_v3 = vsel %vm2218_vm10, %v2208_v23, %v2211_v58 }
 0x2a1   :  { %7096 = vst.msk [vmem:[%s11401_s4 + $0x78] sm:$0xff] %vm7080_vm7, %v7063_v36  ;;  %v2156_v31 = vshrl.u32 %v2138_v54, %v2154_v52  ;;  %v2159_v1 = vadd.s32 127, %v2158_v33  ;;  %v2222_v57 = vsel %vm2218_vm10, %v2202_v47, %v2205_v51  ;;  %v2228_v0 = vsel %vm2220_vm13, %v2211_v58, %v2227_v49 }
 0x2a2   :  { %v2231_v48 = vsel %vm2221_vm14, %v2217_v12, 1326507024  ;;  %v2224_v50 = vsel %vm2220_vm13, %v2208_v23, %v2223_v59  ;;  %v2229_v7 = vsel %vm2219_vm11, %v2226_v62, %v2228_v0  ;;  %v9812_v47 = vmul.f32 %v9655_v20, %v9749_v5 }
 0x2a3   :  { %v2157_v37 = vor.u32 %v2156_v31, %v2155_v2  ;;  %v2232_v43 = vsel %vm2220_vm13, %v2214_v39, %v2231_v48  ;;  %v2160_v10 = vshll.u32 %v2159_v1, 23  ;;  %v2225_v44 = vsel %vm2219_vm11, %v2222_v57, %v2224_v50 }
 0x2a4   :  { %v2233_v46 = vsel %vm2219_vm11, %v2230_v3, %v2232_v43  ;;  %v9802_v54 = vmul.u32.u64.low %v9755_v15, %v2229_v7  ;;  %v9803_v30 = vmul.u32.u64.high %v9755_v15, %v2229_v7, %v9802_v54  ;;  %v2300_v45 = vadd.s32 1, %v7190_v56 }
 0x2a5   :  { %v9807_v8 = vmul.u32.u64.low %v9755_v15, %v2233_v46  ;;  %v9808_v11 = vmul.u32.u64.high %v9755_v15, %v2233_v46, %v9807_v8  ;;  %v2161_v51 = vor.u32 4788187, %v2160_v10  ;;  %v2175_v61 = vadd.s32 3, %v9762_v6 }
 0x2a6   :  { %v2290_v23 = vand.u32 2147483647, %v9696_v35  ;;  %v2164_v42 = vcvt.s32.f32 %v2157_v37  ;;  %v2244_v27 = vadd.s32 1, %v9803_v30  ;;  %vm2301_vm12 = vcmp.gt.s32.totalorder %v2300_v45, 0 }
 0x2a7   :  { %v2162_v58 = vand.u32 2147483647, %v2161_v51  ;;  %v2241_v32 = vmul.u32 %v9755_v15, %v2225_v44  ;;  %vm2243_vm0 = vc.u32 %v9808_v11, %v9802_v54  ;;  %v2302_v5 = vsel %vm2301_vm12, %v2300_v45, 0 }
 0x2a8   :  { %v2397_v39 = vand.u32 2139095040, %v9812_v47  ;;  %v2245_v56 = vsel %vm2243_vm0, %v2244_v27, %v9803_v30  ;;  %v2304_v17 = vand.u32 31, %v2302_v5  ;;  %v9824_v63 = vand.u32 3, %v9762_v6 }
 0x2a9   :  { %v2165_v55 = vmul.f32 %v2164_v42, %v2162_v58  ;;  %v2246_v16 = vadd.s32 %v2245_v56, %v2241_v32  ;;  %v2297_v53 = vand.u32 8388607, %v2290_v23  ;;  %v9828_v15 = vand.u32 3, %v2175_v61 }
 0x2aa   :  { %v2305_v12 = vsub.s32 32, %v2304_v17  ;;  %v9830_v13 = vshrl.u32 %v2302_v5, 5  ;;  %v2398_v19 = vshrl.u32 %v2397_v39, 23  ;;  %v2307_v29 = vshll.u32 %v11432_v14, %v2304_v17 }
 0x2ab   :  { %v2166_v18 = vxor.u32 2147483648, %v2165_v55  ;;  %v2247_v26 = vadd.s32 536870912, %v2246_v16  ;;  %v2316_v2 = vshll.u32 %v11435_v24, %v2304_v17  ;;  %v2319_v31 = vshll.u32 %v11436_v22, %v2304_v17 }
 0x2ac   :  { %v2308_v52 = vshrl.u32 %v11433_v25, %v2305_v12  ;;  %v2311_v6 = vshrl.u32 %v11434_v34, %v2305_v12  ;;  %v2314_v59 = vshrl.u32 %v11435_v24, %v2305_v12  ;;  %v2317_v62 = vshrl.u32 %v11436_v22, %v2305_v12 }
 0x2ad   :  { %v2167_v28 = vsel %vm2084_vm9, %v2166_v18, %v2165_v55  ;;  %v9840_v33 = vshrl.u32 %v2247_v26, 30  ;;  %v2320_v49 = vshrl.u32 %v11437_v40, %v2305_v12  ;;  %v2310_v1 = vshll.u32 %v11433_v25, %v2304_v17 }
 0x2ae   :  { %v2170_v36 = vsel %vm9728_vm2, %v9507_v4, %v2167_v28  ;;  %v2313_v60 = vshll.u32 %v11434_v34, %v2304_v17  ;;  %v2318_v57 = vor.u32 %v2317_v62, %v2316_v2  ;;  %v2309_v37 = vor.u32 %v2308_v52, %v2307_v29 }
 0x2af   :  { %7578 = vcosq.f32 %v2170_v36  ;;  %v2249_v3 = vshll.u32 %v9840_v33, 30  ;;  %v2321_v0 = vor.u32 %v2320_v49, %v2319_v31  ;;  %v2312_v50 = vor.u32 %v2311_v6, %v2310_v1 }
 0x2b0   :  { %7580 = vsinq.f32 %v2170_v36  ;;  %v2315_v7 = vor.u32 %v2314_v59, %v2313_v60  ;;  %vm5492_vm2 = vcmp.eq.s32.totalorder %v9824_v63, 2  ;;  %v2298_v43 = vor.u32 8388608, %v2297_v53 }
 0x2b1   :  { %v9850_v48 = vsub.s32 %v2246_v16, %v2249_v3  ;;  %v2394_v10 = vand.u32 2147483647, %v9812_v47  ;;  %vm2178_vm9 = vcmp.eq.s32.totalorder %v9828_v15, 0  ;;  %vm5489_vm5 = vcmp.eq.s32.totalorder %v9824_v63, 0 }
 0x2b2   :  { %v2306_v30 = vshrl.u32 %v11432_v14, %v2305_v12  ;;  %vm2325_vm4 = vcmp.lt.s32.totalorder %v9830_v13, 4  ;;  %v7194_v8 = vadd.s32 4294967169, %v2398_v19  ;;  %vm2177_vm8 = vcmp.lt.s32.totalorder %v9828_v15, 2 }
 0x2b3   :  { %v2252_v46 = vsub.s32 0, %v9850_v48  ;;  %vm5488_vm6 = vcmp.lt.s32.totalorder %v9824_v63, 2  ;;  %vm2322_vm15 = vcmp.lt.s32.totalorder %v9830_v13, 1  ;;  %vm2324_vm10 = vcmp.lt.s32.totalorder %v9830_v13, 3 }
 0x2b4   :  { %v2331_v51 = vsel %vm2325_vm4, %v2318_v57, 920167782  ;;  %v2335_v44 = vsel %vm2325_vm4, %v2321_v0, 1326507024  ;;  %vm2174_vm11 = vweird.f32 %v9507_v4  ;;  %v2327_v61 = vsel %vm2325_vm4, %v2315_v7, 2102212464 }
 0x2b5   :  { %v7187_v45 = vmin.u32 %v2252_v46, %v9850_v48  ;;  %v2330_v58 = vsel %vm2322_vm15, %v2309_v37, %v2312_v50  ;;  %v2334_v42 = vsel %vm2322_vm15, %v2312_v50, %v2315_v7  ;;  %vm2181_vm1 = vcmp.eq.s32.totalorder %v9828_v15, 2  ;;  %v301_v46 = vpop.permute.xlu1 %300 }
 0x2b6   :  { %v2332_v27 = vsel %vm2324_vm10, %v2315_v7, %v2331_v51  ;;  %v2336_v32 = vsel %vm2324_vm10, %v2318_v57, %v2335_v44  ;;  %v2338_v5 = vshll.u32 %v2298_v43, 8  ;;  %v2242_v39 = vadd.s32 %v9802_v54, %v9808_v11 }
 0x2b7   :  { %v2254_v55 = vclz %v7187_v45  ;;  %vm2323_vm13 = vcmp.lt.s32.totalorder %v9830_v13, 2  ;;  %v2326_v56 = vsel %vm2322_vm15, %v2306_v30, %v2309_v37  ;;  %v2328_v16 = vsel %vm2324_vm10, %v2312_v50, %v2327_v61  ;;  %v11497_v61 = vld [vmem:[#allocation5_spill] sm:$0xff] }
 0x2b8   :  { %v2333_v18 = vsel %vm2323_vm13, %v2330_v58, %v2332_v27  ;;  %v2337_v53 = vsel %vm2323_vm13, %v2334_v42, %v2336_v32  ;;  %v2404_v12 = vadd.s32 1, %v7194_v8  ;;  %vm2188_vm14 = vcmp.lt.s32.totalorder %v9658_v21, 0 }
 0x2b9   :  { %v7579_v17 = vpop.eup %7578  ;;  %v7188_v54 = vadd.s32 4294967294, %v2254_v55  ;;  %v9886_v11 = vmul.u32.u64.low %v2338_v5, %v2337_v53  ;;  %v9887_v28 = vmul.u32.u64.high %v2338_v5, %v2337_v53, %v9886_v11  ;;  %v2272_v62 = vsub.s32 4, %v9840_v33 }
 0x2ba   :  { %v7581_v26 = vpop.eup %7580  ;;  %v2182_v19 = vxor.u32 2147483648, %v7579_v17  ;;  %v9889_v52 = vmul.u32.u64.low %v2338_v5, %v2333_v18  ;;  %v9890_v6 = vmul.u32.u64.high %v2338_v5, %v2333_v18, %v9889_v52  ;;  %vm2405_vm12 = vcmp.gt.s32.totalorder %v2404_v12, 0 }
 0x2bb   :  { %v2179_v29 = vxor.u32 2147483648, %v7581_v26  ;;  %vm7189_vm0 = vcmp.lt.s32.totalorder %v7188_v54, 0  ;;  %v2329_v3 = vsel %vm2323_vm13, %v2326_v56, %v2328_v16  ;;  %v2406_v0 = vsel %vm2405_vm12, %v2404_v12, 0 }
 0x2bc   :  { %v2183_v36 = vsel %vm2181_vm1, %v2182_v19, %v7581_v26  ;;  %v5494_v59 = vsel %vm5492_vm2, %v2182_v19, %v7581_v26  ;;  %v2257_v49 = vsel %vm7189_vm0, 0, %v7188_v54  ;;  %vm2347_vm2 = vc.u32 %v9887_v28, %v9889_v52 }
 0x2bd   :  { %v2180_v2 = vsel %vm2178_vm9, %v7579_v17, %v2179_v29  ;;  %v5491_v31 = vsel %vm5489_vm5, %v7579_v17, %v2179_v29  ;;  %v2258_v57 = vsub.s32 32, %v2257_v49  ;;  %v2259_v7 = vshll.u32 %v9850_v48, %v2257_v49 }
 0x2be   :  { %v2184_v1 = vsel %vm2177_vm8, %v2180_v2, %v2183_v36  ;;  %v5495_v60 = vsel %vm5488_vm6, %v5491_v31, %v5494_v59  ;;  %v2262_v43 = vsub.s32 4294967266, %v2257_v49  ;;  %v2348_v63 = vadd.s32 1, %v9890_v6 }
 0x2bf   :  { %v2185_v37 = vsel %vm2174_vm11, nan, %v2184_v1  ;;  %v5496_v50 = vsel %vm2174_vm11, nan, %v5495_v60  ;;  %v2260_v15 = vshrl.u32 %v2242_v39, %v2258_v57  ;;  %vm9924_vm9 = vcmp.le.f32.partialorder %v2186_v41, 0.7853982 }
 0x2c0   :  { %v7064_v13 = vsel %vm7047_vm3, %v2185_v37, %v5496_v50  ;;  %v2263_v48 = vadd.s32 127, %v2262_v43  ;;  %v2345_v30 = vmul.u32 %v2338_v5, %v2329_v3  ;;  %v2408_v8 = vand.u32 31, %v2406_v0 }
 0x2c1   :  { %7097 = vst.msk [vmem:[%s11401_s4 + $0x80] sm:$0xff] %vm7080_vm7, %v7064_v13  ;;  %v2261_v51 = vor.u32 %v2260_v15, %v2259_v7  ;;  %v2349_v44 = vsel %vm2347_vm2, %v2348_v63, %v9890_v6  ;;  %v2401_v45 = vand.u32 8388607, %v2394_v10  ;;  %vm11498_vm5 = vcmp.eq.s32.totalorder %v7901_v9, 1 }
 0x2c2   :  { %v367_v58 = vsel %vm11498_vm5, %v11497_v61, %v301_v46  ;;  %v2264_v42 = vshll.u32 %v2263_v48, 23  ;;  %v2273_v41 = vsel %vm2188_vm14, %v2272_v62, %v9840_v33  ;;  %v2350_v27 = vadd.s32 %v2349_v44, %v2345_v30 }
 0x2c3   :  { %v2409_v32 = vsub.s32 32, %v2408_v8  ;;  %v2268_v39 = vcvt.s32.f32 %v2261_v51  ;;  %v9937_v5 = vshrl.u32 %v2406_v0, 5  ;;  %v2411_v55 = vshll.u32 %v11432_v14, %v2408_v8 }
 0x2c4   :  { %v2414_v56 = vshll.u32 %v11433_v25, %v2408_v8  ;;  %v2265_v17 = vor.u32 4788187, %v2264_v42  ;;  %v2351_v16 = vadd.s32 536870912, %v2350_v27  ;;  %v2417_v53 = vshll.u32 %v11434_v34, %v2408_v8 }
 0x2c5   :  { %v2412_v18 = vshrl.u32 %v11433_v25, %v2409_v32  ;;  %v2415_v12 = vshrl.u32 %v11434_v34, %v2409_v32  ;;  %v2418_v26 = vshrl.u32 %v11435_v24, %v2409_v32  ;;  %v2420_v33 = vshll.u32 %v11435_v24, %v2408_v8 }
 0x2c6   :  { %v2421_v19 = vshrl.u32 %v11436_v22, %v2409_v32  ;;  %v2266_v54 = vand.u32 2147483647, %v2265_v17  ;;  %v2352_v11 = vshrl.u32 %v2351_v16, 30  ;;  %v2423_v29 = vshll.u32 %v11436_v22, %v2408_v8 }
 0x2c7   :  { %v2424_v6 = vshrl.u32 %v11437_v40, %v2409_v32  ;;  %v2413_v36 = vor.u32 %v2412_v18, %v2411_v55  ;;  %v2416_v59 = vor.u32 %v2415_v12, %v2414_v56  ;;  %v2419_v62 = vor.u32 %v2418_v26, %v2417_v53 }
 0x2c8   :  { %v2422_v2 = vor.u32 %v2421_v19, %v2420_v33  ;;  %v2269_v31 = vmul.f32 %v2268_v39, %v2266_v54  ;;  %v2275_v49 = vsel %vm9924_vm9, 0, %v2273_v41  ;;  %v2353_v3 = vshll.u32 %v2352_v11, 30 }
 0x2c9   :  { %vm2429_vm4 = vcmp.lt.s32.totalorder %v9937_v5, 4  ;;  %vm2292_vm8 = vcmp.lt.s32.totalorder %v9696_v35, 0  ;;  %v2402_v1 = vor.u32 8388608, %v2401_v45  ;;  %v2425_v60 = vor.u32 %v2424_v6, %v2423_v29 }
 0x2ca   :  { %v2435_v57 = vsel %vm2429_vm4, %v2422_v2, 920167782  ;;  %v2270_v0 = vxor.u32 2147483648, %v2269_v31  ;;  %v9955_v37 = vsub.s32 %v2350_v27, %v2353_v3  ;;  %vm2426_vm6 = vcmp.lt.s32.totalorder %v9937_v5, 1 }
 0x2cb   :  { %vm2428_vm15 = vcmp.lt.s32.totalorder %v9937_v5, 3  ;;  %v2279_v50 = vadd.s32 3, %v2275_v49  ;;  %v2434_v7 = vsel %vm2426_vm6, %v2413_v36, %v2416_v59  ;;  %v9964_v46 = vmul.f32 %v9655_v20, %v367_v58 }
 0x2cc   :  { %v2436_v43 = vsel %vm2428_vm15, %v2419_v62, %v2435_v57  ;;  %v2271_v13 = vsel %vm2188_vm14, %v2270_v0, %v2269_v31  ;;  %v2356_v15 = vsub.s32 0, %v9955_v37  ;;  %v2376_v63 = vsub.s32 4, %v2352_v11 }
 0x2cd   :  { %vm2427_vm10 = vcmp.lt.s32.totalorder %v9937_v5, 2  ;;  %v2274_v48 = vsel %vm9924_vm9, %v9658_v21, %v2271_v13  ;;  %v2410_v30 = vshrl.u32 %v11432_v14, %v2409_v32  ;;  %v2431_v8 = vsel %vm2429_vm4, %v2419_v62, 2102212464 }
 0x2ce   :  { %v2439_v51 = vsel %vm2429_vm4, %v2425_v60, 1326507024  ;;  %7582 = vcosq.f32 %v2274_v48  ;;  %v7191_v44 = vmin.u32 %v2356_v15, %v9955_v37  ;;  %v2437_v45 = vsel %vm2427_vm10, %v2434_v7, %v2436_v43  ;;  %v11501_v43 = vld [vmem:[#allocation4_spill] sm:$0xff] }
 0x2cf   :  { %v2438_v61 = vsel %vm2426_vm6, %v2416_v59, %v2419_v62  ;;  %7584 = vsinq.f32 %v2274_v48  ;;  %v9983_v4 = vand.u32 3, %v2275_v49  ;;  %v2440_v58 = vsel %vm2428_vm15, %v2422_v2, %v2439_v51  ;;  %v305_v2 = vpop.permute.xlu0 %304 }
 0x2d0   :  { %v2442_v42 = vshll.u32 %v2402_v1, 8  ;;  %v2280_v41 = vand.u32 3, %v2279_v50  ;;  %v2358_v27 = vclz %v7191_v44  ;;  %v2377_v32 = vsel %vm2292_vm8, %v2376_v63, %v2352_v11 }
 0x2d1   :  { %v2430_v39 = vsel %vm2426_vm6, %v2410_v30, %v2413_v36  ;;  %v2432_v55 = vsel %vm2428_vm15, %v2416_v59, %v2431_v8  ;;  %v2441_v56 = vsel %vm2427_vm10, %v2438_v61, %v2440_v58  ;;  %vm5592_vm11 = vcmp.eq.s32.totalorder %v9983_v4, 0 }
 0x2d2   :  { %v9995_v17 = vmul.u32.u64.low %v2442_v42, %v2437_v45  ;;  %v9996_v16 = vmul.u32.u64.high %v2442_v42, %v2437_v45, %v9995_v17  ;;  %v7192_v18 = vadd.s32 4294967294, %v2358_v27  ;;  %vm5595_vm1 = vcmp.eq.s32.totalorder %v9983_v4, 2 }
 0x2d3   :  { %v9999_v53 = vmul.u32.u64.low %v2442_v42, %v2441_v56  ;;  %v10000_v12 = vmul.u32.u64.high %v2442_v42, %v2441_v56, %v9999_v53  ;;  %vm10006_vm13 = vcmp.le.f32.partialorder %v2290_v23, 0.7853982  ;;  %v2501_v33 = vand.u32 2139095040, %v9964_v46 }
 0x2d4   :  { %vm2281_vm14 = vcmp.lt.s32.totalorder %v2280_v41, 2  ;;  %vm2282_vm12 = vcmp.eq.s32.totalorder %v2280_v41, 0  ;;  %vm5591_vm0 = vcmp.lt.s32.totalorder %v9983_v4, 2  ;;  %vm7193_vm2 = vcmp.lt.s32.totalorder %v7192_v18, 0 }
 0x2d5   :  { %v2379_v19 = vsel %vm10006_vm13, 0, %v2377_v32  ;;  %v2433_v54 = vsel %vm2427_vm10, %v2430_v39, %v2432_v55  ;;  %vm2278_vm9 = vweird.f32 %v9658_v21  ;;  %vm2285_vm5 = vcmp.eq.s32.totalorder %v2280_v41, 2 }
 0x2d6   :  { %v2361_v23 = vsel %vm7193_vm2, 0, %v7192_v18  ;;  %v2452_v11 = vadd.s32 1, %v9996_v16  ;;  %v2502_v29 = vshrl.u32 %v2501_v33, 23  ;;  %v2346_v6 = vadd.s32 %v9889_v52, %v9887_v28 }
 0x2d7   :  { %v2362_v36 = vsub.s32 32, %v2361_v23  ;;  %v2366_v59 = vsub.s32 4294967266, %v2361_v23  ;;  %v2498_v62 = vand.u32 2147483647, %v9964_v46  ;;  %v2383_v31 = vadd.s32 3, %v2379_v19 }
 0x2d8   :  { %v2449_v49 = vmul.u32 %v2442_v42, %v2433_v54  ;;  %vm2451_vm4 = vc.u32 %v10000_v12, %v9995_v17  ;;  %v7198_v5 = vadd.s32 4294967169, %v2502_v29  ;;  %v7583_v3 = vpop.eup %7582  ;;  %v2363_v1 = vshll.u32 %v9955_v37, %v2361_v23 }
 0x2d9   :  { %v2364_v60 = vshrl.u32 %v2346_v6, %v2362_v36  ;;  %v2367_v57 = vadd.s32 127, %v2366_v59  ;;  %v2453_v0 = vsel %vm2451_vm4, %v2452_v11, %v9996_v16  ;;  %v7585_v50 = vpop.eup %7584  ;;  %v2286_v28 = vxor.u32 2147483648, %v7583_v3 }
 0x2da   :  { %v2454_v52 = vadd.s32 %v2453_v0, %v2449_v49  ;;  %v2508_v7 = vadd.s32 1, %v7198_v5  ;;  %vm11502_vm6 = vcmp.eq.s32.totalorder %v7901_v9, 1  ;;  %v2283_v15 = vxor.u32 2147483648, %v7585_v50 }
 0x2db   :  { %v368_v13 = vsel %vm11502_vm6, %v11501_v43, %v305_v2  ;;  %v2365_v63 = vor.u32 %v2364_v60, %v2363_v1  ;;  %v2368_v48 = vshll.u32 %v2367_v57, 23  ;;  %v2505_v30 = vand.u32 8388607, %v2498_v62 }
 0x2dc   :  { %v2287_v37 = vsel %vm2285_vm5, %v2286_v28, %v7585_v50  ;;  %v5597_v8 = vsel %vm5595_vm1, %v2286_v28, %v7585_v50  ;;  %v2455_v51 = vadd.s32 536870912, %v2454_v52  ;;  %vm2509_vm15 = vcmp.gt.s32.totalorder %v2508_v7, 0 }
 0x2dd   :  { %v2284_v44 = vsel %vm2282_vm12, %v7583_v3, %v2283_v15  ;;  %v5594_v45 = vsel %vm5592_vm11, %v7583_v3, %v2283_v15  ;;  %v2369_v61 = vor.u32 4788187, %v2368_v48  ;;  %v10037_v58 = vmul.f32 %v9655_v20, %v368_v13 }
 0x2de   :  { %v2288_v42 = vsel %vm2281_vm14, %v2284_v44, %v2287_v37  ;;  %v5598_v27 = vsel %vm5591_vm0, %v5594_v45, %v5597_v8  ;;  %v2456_v32 = vshrl.u32 %v2455_v51, 30  ;;  %v2510_v39 = vsel %vm2509_vm15, %v2508_v7, 0 }
 0x2df   :  { %v2289_v55 = vsel %vm2278_vm9, nan, %v2288_v42  ;;  %v5599_v56 = vsel %vm2278_vm9, nan, %v5598_v27  ;;  %v2370_v16 = vand.u32 2147483647, %v2369_v61  ;;  %v2372_v18 = vcvt.s32.f32 %v2365_v63 }
 0x2e0   :  { %v7065_v53 = vsel %vm7047_vm3, %v2289_v55, %v5599_v56  ;;  %v2457_v20 = vshll.u32 %v2456_v32, 30  ;;  %v2506_v33 = vor.u32 8388608, %v2505_v30  ;;  %v2512_v41 = vand.u32 31, %v2510_v39 }
 0x2e1   :  { %7098 = vst.msk [vmem:[%s11401_s4 + $0x88] sm:$0xff] %vm7080_vm7, %v7065_v53  ;;  %v2373_v4 = vmul.f32 %v2372_v18, %v2370_v16  ;;  %vm10054_vm10 = vcmp.le.f32.partialorder %v2394_v10, 0.7853982  ;;  %vm2396_vm11 = vcmp.lt.s32.totalorder %v9812_v47, 0  ;;  %v10061_v23 = vshrl.u32 %v2510_v39, 5 }
 0x2e2   :  { %v10059_v21 = vsub.s32 %v2454_v52, %v2457_v20  ;;  %v2513_v11 = vsub.s32 32, %v2512_v41  ;;  %v10063_v6 = vand.u32 3, %v2383_v31  ;;  %v10065_v36 = vand.u32 3, %v2379_v19 }
 0x2e3   :  { %v2374_v29 = vxor.u32 2147483648, %v2373_v4  ;;  %v2450_v59 = vadd.s32 %v9995_v17, %v10000_v12  ;;  %v2480_v2 = vsub.s32 4, %v2456_v32  ;;  %v10070_v49 = vshll.u32 %v2506_v33, 8 }
 0x2e4   :  { %v2460_v10 = vsub.s32 0, %v10059_v21  ;;  %v2602_v5 = vand.u32 2147483647, %v10037_v58  ;;  %v2516_v1 = vshrl.u32 %v11433_v25, %v2513_v11  ;;  %v2519_v31 = vshrl.u32 %v11434_v34, %v2513_v11 }
 0x2e5   :  { %v2375_v3 = vsel %vm2292_vm8, %v2374_v29, %v2373_v4  ;;  %v2522_v19 = vshrl.u32 %v11435_v24, %v2513_v11  ;;  %vm2530_vm1 = vcmp.lt.s32.totalorder %v10061_v23, 1  ;;  %v2605_v60 = vand.u32 2139095040, %v10037_v58 }
 0x2e6   :  { %v2378_v17 = vsel %vm10006_vm13, %v9696_v35, %v2375_v3  ;;  %v7195_v12 = vmin.u32 %v2460_v10, %v10059_v21  ;;  %v2515_v57 = vshll.u32 %v11432_v14, %v2512_v41  ;;  %v2518_v0 = vshll.u32 %v11433_v25, %v2512_v41 }
 0x2e7   :  { %7586 = vcosq.f32 %v2378_v17  ;;  %v2521_v50 = vshll.u32 %v11434_v34, %v2512_v41  ;;  %v2481_v52 = vsel %vm2396_vm11, %v2480_v2, %v2456_v32  ;;  %vm2531_vm8 = vcmp.lt.s32.totalorder %v10061_v23, 2 }
 0x2e8   :  { %7588 = vsinq.f32 %v2378_v17  ;;  %v2462_v28 = vclz %v7195_v12  ;;  %v2517_v26 = vor.u32 %v2516_v1, %v2515_v57  ;;  %v2520_v7 = vor.u32 %v2519_v31, %v2518_v0 }
 0x2e9   :  { %v2523_v43 = vor.u32 %v2522_v19, %v2521_v50  ;;  %v2524_v13 = vshll.u32 %v11435_v24, %v2512_v41  ;;  %v2525_v63 = vshrl.u32 %v11436_v22, %v2513_v11  ;;  %v2527_v48 = vshll.u32 %v11436_v22, %v2512_v41 }
 0x2ea   :  { %v7196_v15 = vadd.s32 4294967294, %v2462_v28  ;;  %v2528_v30 = vshrl.u32 %v11437_v40, %v2513_v11  ;;  %vm2389_vm13 = vcmp.eq.s32.totalorder %v10063_v6, 2  ;;  %vm5698_vm14 = vcmp.eq.s32.totalorder %v10065_v36, 2 }
 0x2eb   :  { %v10098_v37 = vsel %vm10054_vm10, 0, %v2481_v52  ;;  %v2514_v8 = vshrl.u32 %v11432_v14, %v2513_v11  ;;  %vm2532_vm12 = vcmp.lt.s32.totalorder %v10061_v23, 3  ;;  %vm2533_vm0 = vcmp.lt.s32.totalorder %v10061_v23, 4 }
 0x2ec   :  { %vm2386_vm2 = vcmp.eq.s32.totalorder %v10063_v6, 0  ;;  %vm5695_vm9 = vcmp.eq.s32.totalorder %v10065_v36, 0  ;;  %vm7197_vm5 = vcmp.lt.s32.totalorder %v7196_v15, 0  ;;  %v2526_v51 = vor.u32 %v2525_v63, %v2524_v13 }
 0x2ed   :  { %v2529_v44 = vor.u32 %v2528_v30, %v2527_v48  ;;  %v2535_v45 = vsel %vm2533_vm0, %v2523_v43, 2102212464  ;;  %vm2385_vm4 = vcmp.lt.s32.totalorder %v10063_v6, 2  ;;  %vm5694_vm6 = vcmp.lt.s32.totalorder %v10065_v36, 2 }
 0x2ee   :  { %v2465_v61 = vsel %vm7197_vm5, 0, %v7196_v15  ;;  %v2534_v42 = vsel %vm2530_vm1, %v2514_v8, %v2517_v26  ;;  %v2538_v27 = vsel %vm2530_vm1, %v2517_v26, %v2520_v7  ;;  %v2606_v32 = vshrl.u32 %v2605_v60, 23 }
 0x2ef   :  { %vm2382_vm15 = vweird.f32 %v9696_v35  ;;  %v2466_v39 = vsub.s32 32, %v2465_v61  ;;  %v2470_v55 = vsub.s32 4294967266, %v2465_v61  ;;  %v2536_v56 = vsel %vm2532_vm12, %v2520_v7, %v2535_v45 }
 0x2f0   :  { %v2542_v16 = vsel %vm2530_vm1, %v2520_v7, %v2523_v43  ;;  %v2467_v18 = vshll.u32 %v10059_v21, %v2465_v61  ;;  %v2539_v53 = vsel %vm2533_vm0, %v2526_v51, 920167782  ;;  %v2543_v20 = vsel %vm2533_vm0, %v2529_v44, 1326507024 }
 0x2f1   :  { %v7202_v33 = vadd.s32 4294967169, %v2606_v32  ;;  %v2468_v41 = vshrl.u32 %v2450_v59, %v2466_v39  ;;  %v2471_v4 = vadd.s32 127, %v2470_v55  ;;  %v2540_v11 = vsel %vm2532_vm12, %v2523_v43, %v2539_v53  ;;  %v7587_v10 = vpop.eup %7586 }
 0x2f2   :  { %v2544_v29 = vsel %vm2532_vm12, %v2526_v51, %v2543_v20  ;;  %v2537_v2 = vsel %vm2531_vm8, %v2534_v42, %v2536_v56  ;;  %v10133_v3 = vand.u32 8388607, %v2602_v5  ;;  %v7589_v59 = vpop.eup %7588  ;;  %v2390_v31 = vxor.u32 2147483648, %v7587_v10 }
 0x2f3   :  { %v2545_v21 = vsel %vm2531_vm8, %v2542_v16, %v2544_v29  ;;  %v2612_v1 = vadd.s32 1, %v7202_v33  ;;  %v2469_v19 = vor.u32 %v2468_v41, %v2467_v18  ;;  %v2472_v17 = vshll.u32 %v2471_v4, 23 }
 0x2f4   :  { %v2541_v12 = vsel %vm2531_vm8, %v2538_v27, %v2540_v11  ;;  %v2387_v60 = vxor.u32 2147483648, %v7589_v59  ;;  %v10138_v57 = vmul.u32.u64.low %v10070_v49, %v2545_v21  ;;  %v10139_v0 = vmul.u32.u64.high %v10070_v49, %v2545_v21, %v10138_v57 }
 0x2f5   :  { %vm2613_vm1 = vcmp.gt.s32.totalorder %v2612_v1, 0  ;;  %v2391_v50 = vsel %vm2389_vm13, %v2390_v31, %v7589_v59  ;;  %v5700_v28 = vsel %vm5698_vm14, %v2390_v31, %v7589_v59  ;;  %v2473_v52 = vor.u32 4788187, %v2472_v17 }
 0x2f6   :  { %v2476_v26 = vcvt.s32.f32 %v2469_v19  ;;  %v2388_v7 = vsel %vm2386_vm2, %v7587_v10, %v2387_v60  ;;  %v5697_v23 = vsel %vm5695_vm9, %v7587_v10, %v2387_v60  ;;  %v2614_v30 = vsel %vm2613_vm1, %v2612_v1, 0 }
 0x2f7   :  { %v10150_v43 = vmul.u32.u64.low %v10070_v49, %v2541_v12  ;;  %v10151_v13 = vmul.u32.u64.high %v10070_v49, %v2541_v12, %v10150_v43  ;;  %v2392_v15 = vsel %vm2385_vm4, %v2388_v7, %v2391_v50  ;;  %v5701_v63 = vsel %vm5694_vm6, %v5697_v23, %v5700_v28  ;;  %v309_v23 = vpop.permute.xlu1 %308 }
 0x2f8   :  { %v2474_v48 = vand.u32 2147483647, %v2473_v52  ;;  %v2393_v8 = vsel %vm2382_vm15, nan, %v2392_v15  ;;  %v5702_v51 = vsel %vm2382_vm15, nan, %v5701_v63  ;;  %v2616_v6 = vand.u32 31, %v2614_v30 }
 0x2f9   :  { %v7066_v44 = vsel %vm7047_vm3, %v2393_v8, %v5702_v51  ;;  %vm2555_vm8 = vc.u32 %v10139_v0, %v10150_v43  ;;  %v2487_v36 = vadd.s32 3, %v10098_v37  ;;  %v2553_v61 = vmul.u32 %v10070_v49, %v2537_v2 }
 0x2fa   :  { %v2477_v45 = vmul.f32 %v2476_v26, %v2474_v48  ;;  %7099 = vst.msk [vmem:[%s11401_s4 + $0x90] sm:$0xff] %vm7080_vm7, %v7066_v44  ;;  %v2556_v35 = vadd.s32 1, %v10151_v13  ;;  %v2610_v42 = vor.u32 8388608, %v10133_v3  ;;  %v10174_v32 = vshrl.u32 %v2614_v30, 5 }
 0x2fb   :  { %v2617_v39 = vsub.s32 32, %v2616_v6  ;;  %v2619_v55 = vshll.u32 %v11432_v14, %v2616_v6  ;;  %v2622_v16 = vshll.u32 %v11433_v25, %v2616_v6  ;;  %v2625_v18 = vshll.u32 %v11434_v34, %v2616_v6 }
 0x2fc   :  { %v2478_v27 = vxor.u32 2147483648, %v2477_v45  ;;  %v2557_v56 = vsel %vm2555_vm8, %v2556_v35, %v10151_v13  ;;  %v2628_v53 = vshll.u32 %v11435_v24, %v2616_v6  ;;  %v2631_v41 = vshll.u32 %v11436_v22, %v2616_v6  ;;  %v313_v13 = vpop.permute.xlu0 %312 }
 0x2fd   :  { %v2558_v20 = vadd.s32 %v2557_v56, %v2553_v61  ;;  %v2620_v33 = vshrl.u32 %v11433_v25, %v2617_v39  ;;  %v2623_v11 = vshrl.u32 %v11434_v34, %v2617_v39  ;;  %v2626_v29 = vshrl.u32 %v11435_v24, %v2617_v39  ;;  %v11505_v61 = vld [vmem:[#allocation7_spill] sm:$0xff] }
 0x2fe   :  { %v2479_v49 = vsel %vm2396_vm11, %v2478_v27, %v2477_v45  ;;  %v2629_v10 = vshrl.u32 %v11436_v22, %v2617_v39  ;;  %v2632_v3 = vshrl.u32 %v11437_v40, %v2617_v39  ;;  %v5796_v19 = vand.u32 3, %v10098_v37 }
 0x2ff   :  { %v2482_v4 = vsel %vm10054_vm10, %v9812_v47, %v2479_v49  ;;  %v2559_v2 = vadd.s32 536870912, %v2558_v20  ;;  %v2621_v21 = vor.u32 %v2620_v33, %v2619_v55  ;;  %v2624_v1 = vor.u32 %v2623_v11, %v2622_v16  ;;  %v10238_v11 = vld [vmem:[%s11400_s1] ss:$0 sm:$0xff] }
 0x300   :  { %7590 = vcosq.f32 %v2482_v4  ;;  %v2627_v59 = vor.u32 %v2626_v29, %v2625_v18  ;;  %v2630_v31 = vor.u32 %v2629_v10, %v2628_v53  ;;  %v2633_v54 = vor.u32 %v2632_v3, %v2631_v41 }
 0x301   :  { %7592 = vsinq.f32 %v2482_v4  ;;  %v10193_v17 = vshrl.u32 %v2559_v2, 30  ;;  %vm2634_vm10 = vcmp.lt.s32.totalorder %v10174_v32, 1  ;;  %v2618_v12 = vshrl.u32 %v11432_v14, %v2617_v39 }
 0x302   :  { %vm2637_vm11 = vcmp.lt.s32.totalorder %v10174_v32, 4  ;;  %v2642_v60 = vsel %vm2634_vm10, %v2621_v21, %v2624_v1  ;;  %v2650_v57 = vshll.u32 %v2610_v42, 8  ;;  %vm2636_vm13 = vcmp.lt.s32.totalorder %v10174_v32, 3  ;;  %v11507_v42 = vld [vmem:[#allocation6_spill] sm:$0xff] }
 0x303   :  { %v2561_v50 = vshll.u32 %v10193_v17, 30  ;;  %v2639_v28 = vsel %vm2637_vm11, %v2627_v59, 2102212464  ;;  %v2643_v52 = vsel %vm2637_vm11, %v2630_v31, 920167782  ;;  %vm2635_vm14 = vcmp.lt.s32.totalorder %v10174_v32, 2 }
 0x304   :  { %v2644_v37 = vsel %vm2636_vm13, %v2627_v59, %v2643_v52  ;;  %v2646_v26 = vsel %vm2634_vm10, %v2624_v1, %v2627_v59  ;;  %v2647_v7 = vsel %vm2637_vm11, %v2633_v54, 1326507024  ;;  %v2488_v15 = vand.u32 3, %v2487_v36 }
 0x305   :  { %v10205_v63 = vsub.s32 %v2558_v20, %v2561_v50  ;;  %v2638_v48 = vsel %vm2634_vm10, %v2618_v12, %v2621_v21  ;;  %v2645_v30 = vsel %vm2635_vm14, %v2642_v60, %v2644_v37  ;;  %vm2486_vm12 = vweird.f32 %v9812_v47 }
 0x306   :  { %v2640_v8 = vsel %vm2636_vm13, %v2624_v1, %v2639_v28  ;;  %v2648_v51 = vsel %vm2636_vm13, %v2630_v31, %v2647_v7  ;;  %v10212_v44 = vmul.u32.u64.low %v2650_v57, %v2645_v30  ;;  %v10213_v45 = vmul.u32.u64.high %v2650_v57, %v2645_v30, %v10212_v44 }
 0x307   :  { %v2564_v6 = vsub.s32 0, %v10205_v63  ;;  %v2649_v36 = vsel %vm2635_vm14, %v2646_v26, %v2648_v51  ;;  %vm11506_vm0 = vcmp.eq.s32.totalorder %v7901_v9, 1  ;;  %vm5797_vm9 = vcmp.lt.s32.totalorder %v5796_v19, 2 }
 0x308   :  { %v369_v35 = vsel %vm11506_vm0, %v11505_v61, %v309_v23  ;;  %vm11508_vm2 = vmmov %vm11506_vm0  ;;  %vm5798_vm5 = vcmp.eq.s32.totalorder %v5796_v19, 0  ;;  %vm2500_vm4 = vcmp.lt.s32.totalorder %v9964_v46, 0  ;;  %vm2489_vm6 = vcmp.lt.s32.totalorder %v2488_v15, 2 }
 0x309   :  { %v370_v27 = vsel %vm11508_vm2, %v11507_v42, %v313_v13  ;;  %v10226_v39 = vmul.u32.u64.low %v2650_v57, %v2649_v36  ;;  %v10227_v55 = vmul.u32.u64.high %v2650_v57, %v2649_v36, %v10226_v39  ;;  %vm5801_vm15 = vcmp.eq.s32.totalorder %v5796_v19, 2 }
 0x30a   :  { %v7591_v56 = vpop.eup %7590  ;;  %v7199_v16 = vmin.u32 %v2564_v6, %v10205_v63  ;;  %v2641_v18 = vsel %vm2635_vm14, %v2638_v48, %v2640_v8  ;;  %vm2490_vm1 = vcmp.eq.s32.totalorder %v2488_v15, 0  ;;  %vm2493_vm8 = vcmp.eq.s32.totalorder %v2488_v15, 2 }
 0x30b   :  { %v7593_v53 = vpop.eup %7592  ;;  %v2494_v49 = vxor.u32 2147483648, %v7591_v56  ;;  %v2660_v20 = vadd.s32 1, %v10213_v45  ;;  %v2554_v41 = vadd.s32 %v10150_v43, %v10139_v0  ;;  %v10241_v29 = vmul.f32 %v10238_v11, %v369_v35 }
 0x30c   :  { %v2491_v33 = vxor.u32 2147483648, %v7593_v53  ;;  %v2566_v4 = vclz %v7199_v16  ;;  %v2584_v2 = vsub.s32 4, %v10193_v17  ;;  %v2657_v21 = vmul.u32 %v2650_v57, %v2641_v18 }
 0x30d   :  { %v2495_v32 = vsel %vm2493_vm8, %v2494_v49, %v7593_v53  ;;  %v5803_v10 = vsel %vm5801_vm15, %v2494_v49, %v7593_v53  ;;  %vm2659_vm10 = vc.u32 %v10227_v55, %v10212_v44  ;;  %v10251_v54 = vmul.f32 %v10238_v11, %v370_v27 }
 0x30e   :  { %v2492_v3 = vsel %vm2490_vm1, %v7591_v56, %v2491_v33  ;;  %v5800_v1 = vsel %vm5798_vm5, %v7591_v56, %v2491_v33  ;;  %v7200_v59 = vadd.s32 4294967294, %v2566_v4  ;;  %v2661_v31 = vsel %vm2659_vm10, %v2660_v20, %v10213_v45 }
 0x30f   :  { %v2496_v0 = vsel %vm2489_vm6, %v2492_v3, %v2495_v32  ;;  %v5804_v43 = vsel %vm5797_vm9, %v5800_v1, %v5803_v10  ;;  %v2662_v57 = vadd.s32 %v2661_v31, %v2657_v21  ;;  %v2706_v19 = vand.u32 2147483647, %v10241_v29 }
 0x310   :  { %v2497_v12 = vsel %vm2486_vm12, nan, %v2496_v0  ;;  %v5805_v60 = vsel %vm2486_vm12, nan, %v5804_v43  ;;  %vm7201_vm11 = vcmp.lt.s32.totalorder %v7200_v59, 0  ;;  %v2709_v52 = vand.u32 2139095040, %v10241_v29 }
 0x311   :  { %v7067_v50 = vsel %vm7047_vm3, %v2497_v12, %v5805_v60  ;;  %v2569_v28 = vsel %vm7201_vm11, 0, %v7200_v59  ;;  %v2585_v47 = vsel %vm2500_vm4, %v2584_v2, %v10193_v17  ;;  %v2663_v7 = vadd.s32 536870912, %v2662_v57 }
 0x312   :  { %7100 = vst.msk [vmem:[%s11401_s4 + $0x98] sm:$0xff] %vm7080_vm7, %v7067_v50  ;;  %v2570_v37 = vsub.s32 32, %v2569_v28  ;;  %v2574_v26 = vsub.s32 4294967266, %v2569_v28  ;;  %vm10270_vm13 = vcmp.le.f32.partialorder %v2498_v62, 0.7853982  ;;  %v2710_v13 = vshrl.u32 %v2709_v52, 23 }
 0x313   :  { %v2571_v15 = vshll.u32 %v10205_v63, %v2569_v28  ;;  %v10275_v8 = vshrl.u32 %v2663_v7, 30  ;;  %v2587_v51 = vsel %vm10270_vm13, 0, %v2585_v47  ;;  %v2713_v17 = vand.u32 8388607, %v2706_v19 }
 0x314   :  { %v2572_v48 = vshrl.u32 %v2554_v41, %v2570_v37  ;;  %v2575_v30 = vadd.s32 127, %v2574_v26  ;;  %v7206_v45 = vadd.s32 4294967169, %v2710_v13  ;;  %v2813_v6 = vand.u32 2139095040, %v10251_v54 }
 0x315   :  { %v2665_v61 = vshll.u32 %v10275_v8, 30  ;;  %v2591_v27 = vadd.s32 3, %v2587_v51  ;;  %v2714_v56 = vor.u32 8388608, %v2713_v17  ;;  %v10288_v4 = vand.u32 3, %v2587_v51 }
 0x316   :  { %v2573_v62 = vor.u32 %v2572_v48, %v2571_v15  ;;  %v2576_v36 = vshll.u32 %v2575_v30, 23  ;;  %v2716_v35 = vadd.s32 1, %v7206_v45  ;;  %v2814_v42 = vshrl.u32 %v2813_v6, 23 }
 0x317   :  { %v10283_v39 = vsub.s32 %v2662_v57, %v2665_v61  ;;  %v10286_v41 = vand.u32 3, %v2591_v27  ;;  %v2658_v10 = vadd.s32 %v10212_v44, %v10227_v55  ;;  %v10293_v21 = vshll.u32 %v2714_v56, 8 }
 0x318   :  { %v2577_v63 = vor.u32 4788187, %v2576_v36  ;;  %vm2717_vm14 = vcmp.gt.s32.totalorder %v2716_v35, 0  ;;  %v2580_v18 = vcvt.s32.f32 %v2573_v62  ;;  %v7210_v49 = vadd.s32 4294967169, %v2814_v42 }
 0x319   :  { %v2668_v53 = vsub.s32 0, %v10283_v39  ;;  %v2718_v20 = vsel %vm2717_vm14, %v2716_v35, 0  ;;  %v2810_v3 = vand.u32 2147483647, %v10251_v54  ;;  %v2688_v0 = vsub.s32 4, %v10275_v8 }
 0x31a   :  { %v2578_v16 = vand.u32 2147483647, %v2577_v63  ;;  %v2720_v2 = vand.u32 31, %v2718_v20  ;;  %v10297_v43 = vadd.s32 1, %v7210_v49  ;;  %v10299_v31 = vshrl.u32 %v2718_v20, 5 }
 0x31b   :  { %v7203_v32 = vmin.u32 %v2668_v53, %v10283_v39  ;;  %vm2604_vm12 = vcmp.lt.s32.totalorder %v10037_v58, 0  ;;  %vm10319_vm2 = vcmp.le.f32.partialorder %v2602_v5, 0.7853982  ;;  %vm2597_vm5 = vcmp.eq.s32.totalorder %v10286_v41, 2 }
 0x31c   :  { %v2581_v33 = vmul.f32 %v2580_v18, %v2578_v16  ;;  %v2721_v12 = vsub.s32 32, %v2720_v2  ;;  %v2723_v60 = vshll.u32 %v11432_v14, %v2720_v2  ;;  %v2726_v57 = vshll.u32 %v11433_v25, %v2720_v2 }
 0x31d   :  { %v2670_v59 = vclz %v7203_v32  ;;  %v2729_v50 = vshll.u32 %v11434_v34, %v2720_v2  ;;  %v2732_v28 = vshll.u32 %v11435_v24, %v2720_v2  ;;  %v2735_v36 = vshll.u32 %v11436_v22, %v2720_v2 }
 0x31e   :  { %v2582_v1 = vxor.u32 2147483648, %v2581_v33  ;;  %v2722_v37 = vshrl.u32 %v11432_v14, %v2721_v12  ;;  %v2724_v26 = vshrl.u32 %v11433_v25, %v2721_v12  ;;  %v2727_v47 = vshrl.u32 %v11434_v34, %v2721_v12 }
 0x31f   :  { %v7204_v55 = vadd.s32 4294967294, %v2670_v59  ;;  %v2730_v7 = vshrl.u32 %v11435_v24, %v2721_v12  ;;  %v2733_v13 = vshrl.u32 %v11436_v22, %v2721_v12  ;;  %v2736_v61 = vshrl.u32 %v11437_v40, %v2721_v12 }
 0x320   :  { %v2583_v44 = vsel %vm2500_vm4, %v2582_v1, %v2581_v33  ;;  %v2725_v48 = vor.u32 %v2724_v26, %v2723_v60  ;;  %v2728_v30 = vor.u32 %v2727_v47, %v2726_v57  ;;  %vm2738_vm9 = vcmp.lt.s32.totalorder %v10299_v31, 1 }
 0x321   :  { %v2586_v52 = vsel %vm10270_vm13, %v9964_v46, %v2583_v44  ;;  %vm7205_vm0 = vcmp.lt.s32.totalorder %v7204_v55, 0  ;;  %v2731_v17 = vor.u32 %v2730_v7, %v2729_v50  ;;  %v2734_v62 = vor.u32 %v2733_v13, %v2732_v28 }
 0x322   :  { %7594 = vcosq.f32 %v2586_v52  ;;  %v2673_v15 = vsel %vm7205_vm0, 0, %v7204_v55  ;;  %vm5904_vm4 = vcmp.eq.s32.totalorder %v10288_v4, 2  ;;  %vm2739_vm6 = vcmp.lt.s32.totalorder %v10299_v31, 2 }
 0x323   :  { %7596 = vsinq.f32 %v2586_v52  ;;  %v2674_v23 = vsub.s32 32, %v2673_v15  ;;  %v2675_v51 = vshll.u32 %v10283_v39, %v2673_v15  ;;  %v2678_v45 = vsub.s32 4294967266, %v2673_v15 }
 0x324   :  { %vm2740_vm15 = vcmp.lt.s32.totalorder %v10299_v31, 3  ;;  %vm2594_vm1 = vcmp.eq.s32.totalorder %v10286_v41, 0  ;;  %vm5901_vm8 = vcmp.eq.s32.totalorder %v10288_v4, 0  ;;  %v2737_v5 = vor.u32 %v2736_v61, %v2735_v36 }
 0x325   :  { %v2676_v35 = vshrl.u32 %v2658_v10, %v2674_v23  ;;  %v2679_v42 = vadd.s32 127, %v2678_v45  ;;  %vm2741_vm10 = vcmp.lt.s32.totalorder %v10299_v31, 4  ;;  %v2742_v63 = vsel %vm2738_vm9, %v2722_v37, %v2725_v48 }
 0x326   :  { %v2746_v27 = vsel %vm2738_vm9, %v2725_v48, %v2728_v30  ;;  %vm2593_vm11 = vcmp.lt.s32.totalorder %v10286_v41, 2  ;;  %vm5900_vm13 = vcmp.lt.s32.totalorder %v10288_v4, 2  ;;  %v2743_v16 = vsel %vm2741_vm10, %v2731_v17, 2102212464 }
 0x327   :  { %v2677_v39 = vor.u32 %v2676_v35, %v2675_v51  ;;  %v2680_v56 = vshll.u32 %v2679_v42, 23  ;;  %v2747_v18 = vsel %vm2741_vm10, %v2734_v62, 920167782  ;;  %vm2590_vm14 = vweird.f32 %v9964_v46 }
 0x328   :  { %v2744_v53 = vsel %vm2740_vm15, %v2728_v30, %v2743_v16  ;;  %v2748_v49 = vsel %vm2740_vm15, %v2731_v17, %v2747_v18  ;;  %v2750_v20 = vsel %vm2738_vm9, %v2728_v30, %v2731_v17  ;;  %v2751_v33 = vsel %vm2741_vm10, %v2737_v5, 1326507024 }
 0x329   :  { %v2681_v32 = vor.u32 4788187, %v2680_v56  ;;  %v2689_v10 = vsel %vm2604_vm12, %v2688_v0, %v10275_v8  ;;  %v2749_v2 = vsel %vm2739_vm6, %v2746_v27, %v2748_v49  ;;  %v2817_v1 = vand.u32 8388607, %v2810_v3 }
 0x32a   :  { %v2684_v59 = vcvt.s32.f32 %v2677_v39  ;;  %v2752_v12 = vsel %vm2740_vm15, %v2734_v62, %v2751_v33  ;;  %v10356_v60 = vmul.u32.u64.low %v10293_v21, %v2749_v2  ;;  %v10357_v57 = vmul.u32.u64.high %v10293_v21, %v2749_v2, %v10356_v60 }
 0x32b   :  { %v2682_v55 = vand.u32 2147483647, %v2681_v32  ;;  %v2745_v8 = vsel %vm2739_vm6, %v2742_v63, %v2744_v53  ;;  %v2753_v0 = vsel %vm2739_vm6, %v2750_v20, %v2752_v12  ;;  %vm2821_vm0 = vcmp.gt.s32.totalorder %v10297_v43, 0  ;;  %v317_v20 = vpop.permute.xlu1 %316 }
 0x32c   :  { %v7595_v44 = vpop.eup %7594  ;;  %v10366_v52 = vmul.u32.u64.low %v10293_v21, %v2753_v0  ;;  %v10367_v37 = vmul.u32.u64.high %v10293_v21, %v2753_v0, %v10366_v52  ;;  %v2822_v26 = vsel %vm2821_vm0, %v10297_v43, 0  ;;  %v2691_v13 = vsel %vm10319_vm2, 0, %v2689_v10  ;;  %v11513_v0 = vld [vmem:[#allocation9_spill] sm:$0xff] }
 0x32d   :  { %v7597_v50 = vpop.eup %7596  ;;  %v2598_v28 = vxor.u32 2147483648, %v7595_v44  ;;  %v2685_v7 = vmul.f32 %v2684_v59, %v2682_v55  ;;  %v2824_v15 = vand.u32 31, %v2822_v26  ;;  %v2764_v30 = vadd.s32 1, %v10357_v57 }
 0x32e   :  { %v2595_v47 = vxor.u32 2147483648, %v7597_v50  ;;  %v2818_v23 = vor.u32 8388608, %v2817_v1  ;;  %v2761_v17 = vmul.u32 %v10293_v21, %v2745_v8  ;;  %vm2763_vm9 = vc.u32 %v10367_v37, %v10356_v60 }
 0x32f   :  { %v2599_v31 = vsel %vm2597_vm5, %v2598_v28, %v7597_v50  ;;  %v5906_v48 = vsel %vm5904_vm4, %v2598_v28, %v7597_v50  ;;  %v2686_v45 = vxor.u32 2147483648, %v2685_v7  ;;  %v2825_v61 = vsub.s32 32, %v2824_v15 }
 0x330   :  { %v2596_v51 = vsel %vm2594_vm1, %v7595_v44, %v2595_v47  ;;  %v5903_v43 = vsel %vm5901_vm8, %v7595_v44, %v2595_v47  ;;  %v2765_v21 = vsel %vm2763_vm9, %v2764_v30, %v10357_v57  ;;  %v2695_v46 = vadd.s32 3, %v2691_v13 }
 0x331   :  { %v2600_v62 = vsel %vm2593_vm11, %v2596_v51, %v2599_v31  ;;  %v5907_v36 = vsel %vm5900_vm13, %v5903_v43, %v5906_v48  ;;  %v2687_v5 = vsel %vm2604_vm12, %v2686_v45, %v2685_v7  ;;  %v2766_v63 = vadd.s32 %v2765_v21, %v2761_v17 }
 0x332   :  { %v2601_v35 = vsel %vm2590_vm14, nan, %v2600_v62  ;;  %v5908_v42 = vsel %vm2590_vm14, nan, %v5907_v36  ;;  %v2690_v4 = vsel %vm10319_vm2, %v10037_v58, %v2687_v5  ;;  %v10404_v27 = vand.u32 3, %v2691_v13 }
 0x333   :  { %v7068_v41 = vsel %vm7047_vm3, %v2601_v35, %v5908_v42  ;;  %7598 = vcosq.f32 %v2690_v4  ;;  %v2767_v39 = vadd.s32 536870912, %v2766_v63  ;;  %v10406_v56 = vshrl.u32 %v2822_v26, 5 }
 0x334   :  { %7101 = vst.msk [vmem:[%s11401_s4 + $0xa0] sm:$0xff] %vm7080_vm7, %v7068_v41  ;;  %7600 = vsinq.f32 %v2690_v4  ;;  %v10408_v16 = vshll.u32 %v2818_v23, 8  ;;  %v2831_v18 = vshrl.u32 %v11434_v34, %v2825_v61  ;;  %v2834_v6 = vshrl.u32 %v11435_v24, %v2825_v61 }
 0x335   :  { %v2836_v53 = vshll.u32 %v11435_v24, %v2824_v15  ;;  %v2837_v49 = vshrl.u32 %v11436_v22, %v2825_v61  ;;  %v10414_v33 = vshrl.u32 %v2767_v39, 30  ;;  %v2828_v32 = vshrl.u32 %v11433_v25, %v2825_v61 }
 0x336   :  { %v2839_v10 = vshll.u32 %v11436_v22, %v2824_v15  ;;  %v2840_v2 = vshrl.u32 %v11437_v40, %v2825_v61  ;;  %v2696_v1 = vand.u32 3, %v2695_v46  ;;  %v2830_v59 = vshll.u32 %v11433_v25, %v2824_v15 }
 0x337   :  { %v2833_v12 = vshll.u32 %v11434_v34, %v2824_v15  ;;  %v2838_v57 = vor.u32 %v2837_v49, %v2836_v53  ;;  %v2769_v44 = vshll.u32 %v10414_v33, 30  ;;  %v2827_v55 = vshll.u32 %v11432_v14, %v2824_v15 }
 0x338   :  { %v2841_v8 = vor.u32 %v2840_v2, %v2839_v10  ;;  %vm11514_vm12 = vcmp.eq.s32.totalorder %v7901_v9, 1  ;;  %vm6003_vm2 = vcmp.lt.s32.totalorder %v10404_v27, 2  ;;  %vm6004_vm5 = vcmp.eq.s32.totalorder %v10404_v27, 0 }
 0x339   :  { %v371_v50 = vsel %vm11514_vm12, %v11513_v0, %v317_v20  ;;  %v2832_v28 = vor.u32 %v2831_v18, %v2830_v59  ;;  %v2835_v52 = vor.u32 %v2834_v6, %v2833_v12  ;;  %vm2694_vm4 = vweird.f32 %v10037_v58 }
 0x33a   :  { %vm6007_vm6 = vcmp.eq.s32.totalorder %v10404_v27, 2  ;;  %v10430_v26 = vsub.s32 %v2766_v63, %v2769_v44  ;;  %v2829_v47 = vor.u32 %v2828_v32, %v2827_v55  ;;  %vm2845_vm15 = vcmp.lt.s32.totalorder %v10406_v56, 4 }
 0x33b   :  { %vm2697_vm1 = vcmp.lt.s32.totalorder %v2696_v1, 2  ;;  %vm2698_vm8 = vcmp.eq.s32.totalorder %v2696_v1, 0  ;;  %v2851_v7 = vsel %vm2845_vm15, %v2838_v57, 920167782  ;;  %v2855_v13 = vsel %vm2845_vm15, %v2841_v8, 1326507024 }
 0x33c   :  { %vm2701_vm10 = vcmp.eq.s32.totalorder %v2696_v1, 2  ;;  %v2772_v15 = vsub.s32 0, %v10430_v26  ;;  %vm2842_vm11 = vcmp.lt.s32.totalorder %v10406_v56, 1  ;;  %vm2844_vm13 = vcmp.lt.s32.totalorder %v10406_v56, 3 }
 0x33d   :  { %v7599_v31 = vpop.eup %7598  ;;  %v2826_v48 = vshrl.u32 %v11432_v14, %v2825_v61  ;;  %v2854_v30 = vsel %vm2842_vm11, %v2832_v28, %v2835_v52  ;;  %v2856_v23 = vsel %vm2844_vm13, %v2838_v57, %v2855_v13  ;;  %v10446_v51 = vmul.f32 %v10238_v11, %v371_v50 }
 0x33e   :  { %v7601_v43 = vpop.eup %7600  ;;  %v2702_v45 = vxor.u32 2147483648, %v7599_v31  ;;  %v7207_v17 = vmin.u32 %v2772_v15, %v10430_v26  ;;  %v2850_v62 = vsel %vm2842_vm11, %v2829_v47, %v2832_v28  ;;  %v2852_v36 = vsel %vm2844_vm13, %v2835_v52, %v2851_v7 }
 0x33f   :  { %v2699_v61 = vxor.u32 2147483648, %v7601_v43  ;;  %v2792_v35 = vsub.s32 4, %v10414_v33  ;;  %vm2843_vm14 = vcmp.lt.s32.totalorder %v10406_v56, 2  ;;  %v2847_v42 = vsel %vm2845_vm15, %v2835_v52, 2102212464 }
 0x340   :  { %v2703_v5 = vsel %vm2701_vm10, %v2702_v45, %v7601_v43  ;;  %v6009_v21 = vsel %vm6007_vm6, %v2702_v45, %v7601_v43  ;;  %v2774_v41 = vclz %v7207_v17  ;;  %v2857_v4 = vsel %vm2843_vm14, %v2854_v30, %v2856_v23  ;;  %v11517_v23 = vld [vmem:[#allocation8_spill] sm:$0xff] }
 0x341   :  { %v2700_v63 = vsel %vm2698_vm8, %v7599_v31, %v2699_v61  ;;  %v6006_v46 = vsel %vm6004_vm5, %v7599_v31, %v2699_v61  ;;  %v2846_v39 = vsel %vm2842_vm11, %v2826_v48, %v2829_v47  ;;  %v2853_v18 = vsel %vm2843_vm14, %v2850_v62, %v2852_v36  ;;  %v321_v47 = vpop.permute.xlu0 %320 }
 0x342   :  { %v2704_v6 = vsel %vm2697_vm1, %v2700_v63, %v2703_v5  ;;  %v6010_v53 = vsel %vm6003_vm2, %v6006_v46, %v6009_v21  ;;  %v7208_v49 = vadd.s32 4294967294, %v2774_v41  ;;  %v2848_v20 = vsel %vm2844_vm13, %v2832_v28, %v2847_v42  ;;  %v325_v46 = vpop.permute.xlu1 %324 }
 0x343   :  { %v2705_v32 = vsel %vm2694_vm4, nan, %v2704_v6  ;;  %v6011_v10 = vsel %vm2694_vm4, nan, %v6010_v53  ;;  %v10479_v2 = vmul.u32.u64.low %v10408_v16, %v2857_v4  ;;  %v10480_v59 = vmul.u32.u64.high %v10408_v16, %v2857_v4, %v10479_v2 }
 0x344   :  { %v7069_v1 = vsel %vm7047_vm3, %v2705_v32, %v6011_v10  ;;  %vm7209_vm0 = vcmp.lt.s32.totalorder %v7208_v49, 0  ;;  %v10485_v27 = vmul.u32.u64.low %v10408_v16, %v2853_v18  ;;  %v10486_v12 = vmul.u32.u64.high %v10408_v16, %v2853_v18, %v10485_v27 }
 0x345   :  { %7102 = vst.msk [vmem:[%s11401_s4 + $0xa8] sm:$0xff] %vm7080_vm7, %v7069_v1  ;;  %vm2708_vm9 = vcmp.lt.s32.totalorder %v10241_v29, 0  ;;  %v2777_v58 = vsel %vm7209_vm0, 0, %v7208_v49  ;;  %v2917_v57 = vand.u32 2139095040, %v10446_v51  ;;  %v2762_v44 = vadd.s32 %v10356_v60, %v10367_v37 }
 0x346   :  { %v2778_v55 = vsub.s32 32, %v2777_v58  ;;  %v2782_v8 = vsub.s32 4294967266, %v2777_v58  ;;  %v2849_v0 = vsel %vm2843_vm14, %v2846_v39, %v2848_v20  ;;  %v2793_v50 = vsel %vm2708_vm9, %v2792_v35, %v10414_v33 }
 0x347   :  { %vm2867_vm12 = vc.u32 %v10480_v59, %v10485_v27  ;;  %v2914_v28 = vand.u32 2147483647, %v10446_v51  ;;  %v2918_v52 = vshrl.u32 %v2917_v57, 23  ;;  %v2779_v7 = vshll.u32 %v10430_v26, %v2777_v58 }
 0x348   :  { %v2780_v13 = vshrl.u32 %v2762_v44, %v2778_v55  ;;  %v2783_v15 = vadd.s32 127, %v2782_v8  ;;  %v2868_v60 = vadd.s32 1, %v10486_v12  ;;  %vm10507_vm2 = vcmp.le.f32.partialorder %v2706_v19, 0.7853982 }
 0x349   :  { %v2865_v56 = vmul.u32 %v10408_v16, %v2849_v0  ;;  %v7214_v33 = vadd.s32 4294967169, %v2918_v52  ;;  %vm11518_vm5 = vcmp.eq.s32.totalorder %v7901_v9, 1  ;;  %v2795_v43 = vsel %vm10507_vm2, 0, %v2793_v50 }
 0x34a   :  { %v2781_v31 = vor.u32 %v2780_v13, %v2779_v7  ;;  %v2784_v48 = vshll.u32 %v2783_v15, 23  ;;  %v2869_v30 = vsel %vm2867_vm12, %v2868_v60, %v10486_v12  ;;  %v372_v26 = vsel %vm11518_vm5, %v11517_v23, %v321_v47  ;;  %v11519_v12 = vld [vmem:[#allocation11_spill] sm:$0xff]  ;;  %vm11520_vm15 = vmmov %vm11518_vm5 }
 0x34b   :  { %v2870_v45 = vadd.s32 %v2869_v30, %v2865_v56  ;;  %v2921_v19 = vand.u32 8388607, %v2914_v28  ;;  %v2924_v17 = vadd.s32 1, %v7214_v33  ;;  %v10521_v16 = vmul.f32 %v10238_v11, %v372_v26 }
 0x34c   :  { %v2785_v62 = vor.u32 4788187, %v2784_v48  ;;  %v2788_v35 = vcvt.s32.f32 %v2781_v31  ;;  %v2799_v42 = vadd.s32 3, %v2795_v43  ;;  %vm2812_vm6 = vcmp.lt.s32.totalorder %v10251_v54, 0 }
 0x34d   :  { %v2871_v36 = vadd.s32 536870912, %v2870_v45  ;;  %vm2925_vm4 = vcmp.gt.s32.totalorder %v2924_v17, 0  ;;  %v2922_v41 = vor.u32 8388608, %v2921_v19  ;;  %v3021_v6 = vand.u32 2139095040, %v10521_v16 }
 0x34e   :  { %v2786_v61 = vand.u32 2147483647, %v2785_v62  ;;  %v2926_v5 = vsel %vm2925_vm4, %v2924_v17, 0  ;;  %v10525_v49 = vand.u32 3, %v2799_v42  ;;  %v10527_v20 = vand.u32 3, %v2795_v43 }
 0x34f   :  { %v2872_v21 = vshrl.u32 %v2871_v36, 30  ;;  %v2928_v4 = vand.u32 31, %v2926_v5  ;;  %v10530_v32 = vadd.s32 %v10485_v27, %v10480_v59  ;;  %v10534_v2 = vshll.u32 %v2922_v41, 8 }
 0x350   :  { %v2789_v63 = vmul.f32 %v2788_v35, %v2786_v61  ;;  %v3018_v1 = vand.u32 2147483647, %v10521_v16  ;;  %v10540_v58 = vsel %vm11520_vm15, %v11519_v12, %v325_v46  ;;  %v3022_v50 = vshrl.u32 %v3021_v6, 23 }
 0x351   :  { %v2873_v39 = vshll.u32 %v2872_v21, 30  ;;  %v2929_v18 = vsub.s32 32, %v2928_v4  ;;  %v2896_v0 = vsub.s32 4, %v2872_v21  ;;  %v2931_v52 = vshll.u32 %v11432_v14, %v2928_v4 }
 0x352   :  { %v2790_v53 = vxor.u32 2147483648, %v2789_v63  ;;  %v2934_v47 = vshll.u32 %v11433_v25, %v2928_v4  ;;  %v2937_v7 = vshll.u32 %v11434_v34, %v2928_v4  ;;  %v2927_v15 = vshrl.u32 %v2926_v5, 5 }
 0x353   :  { %v10532_v10 = vsub.s32 %v2870_v45, %v2873_v39  ;;  %v2932_v44 = vshrl.u32 %v11433_v25, %v2929_v18  ;;  %v2935_v55 = vshrl.u32 %v11434_v34, %v2929_v18  ;;  %v2938_v59 = vshrl.u32 %v11435_v24, %v2929_v18 }
 0x354   :  { %v2791_v57 = vsel %vm2708_vm9, %v2790_v53, %v2789_v63  ;;  %v2940_v60 = vshll.u32 %v11435_v24, %v2928_v4  ;;  %v2941_v31 = vshrl.u32 %v11436_v22, %v2929_v18  ;;  %v10559_v30 = vsel %vm2812_vm6, %v2896_v0, %v2872_v21 }
 0x355   :  { %v2794_v27 = vsel %vm10507_vm2, %v10241_v29, %v2791_v57  ;;  %v2876_v8 = vsub.s32 0, %v10532_v10  ;;  %v2933_v56 = vor.u32 %v2932_v44, %v2931_v52  ;;  %v2936_v37 = vor.u32 %v2935_v55, %v2934_v47 }
 0x356   :  { %7602 = vcosq.f32 %v2794_v27  ;;  %v2939_v33 = vor.u32 %v2938_v59, %v2937_v7  ;;  %v7218_v23 = vadd.s32 4294967169, %v3022_v50  ;;  %v10563_v26 = vand.u32 8388607, %v3018_v1 }
 0x357   :  { %7604 = vsinq.f32 %v2794_v27  ;;  %v7211_v13 = vmin.u32 %v2876_v8, %v10532_v10  ;;  %vm2805_vm1 = vcmp.eq.s32.totalorder %v10525_v49, 2  ;;  %vm6110_vm8 = vcmp.eq.s32.totalorder %v10527_v20, 2 }
 0x358   :  { %v2930_v43 = vshrl.u32 %v11432_v14, %v2929_v18  ;;  %v2942_v45 = vor.u32 %v2941_v31, %v2940_v60  ;;  %v2943_v19 = vshll.u32 %v11436_v22, %v2928_v4  ;;  %v2944_v17 = vshrl.u32 %v11437_v40, %v2929_v18 }
 0x359   :  { %v2878_v48 = vclz %v7211_v13  ;;  %vm2802_vm10 = vcmp.eq.s32.totalorder %v10525_v49, 0  ;;  %vm6107_vm11 = vcmp.eq.s32.totalorder %v10527_v20, 0  ;;  %vm2946_vm13 = vcmp.lt.s32.totalorder %v2927_v15, 1 }
 0x35a   :  { %vm2948_vm14 = vcmp.lt.s32.totalorder %v2927_v15, 3  ;;  %vm2949_vm0 = vcmp.lt.s32.totalorder %v2927_v15, 4  ;;  %vm2801_vm9 = vcmp.lt.s32.totalorder %v10525_v49, 2  ;;  %vm6106_vm12 = vcmp.lt.s32.totalorder %v10527_v20, 2 }
 0x35b   :  { %v7212_v62 = vadd.s32 4294967294, %v2878_v48  ;;  %v2945_v36 = vor.u32 %v2944_v17, %v2943_v19  ;;  %v2951_v61 = vsel %vm2949_vm0, %v2939_v33, 2102212464  ;;  %v2954_v35 = vsel %vm2946_vm13, %v2933_v56, %v2936_v37 }
 0x35c   :  { %v2955_v42 = vsel %vm2949_vm0, %v2942_v45, 920167782  ;;  %vm2798_vm2 = vweird.f32 %v10241_v29  ;;  %vm2947_vm4 = vcmp.lt.s32.totalorder %v2927_v15, 2  ;;  %v2958_v21 = vsel %vm2946_vm13, %v2936_v37, %v2939_v33 }
 0x35d   :  { %vm7213_vm5 = vcmp.lt.s32.totalorder %v7212_v62, 0  ;;  %v2956_v5 = vsel %vm2948_vm14, %v2939_v33, %v2955_v42  ;;  %v2950_v4 = vsel %vm2946_vm13, %v2930_v43, %v2933_v56  ;;  %v2959_v46 = vsel %vm2949_vm0, %v2945_v36, 1326507024 }
 0x35e   :  { %v2881_v41 = vsel %vm7213_vm5, 0, %v7212_v62  ;;  %v2957_v63 = vsel %vm2947_vm4, %v2954_v35, %v2956_v5  ;;  %vm10579_vm15 = vcmp.le.f32.partialorder %v2810_v3, 0.7853982  ;;  %v2952_v53 = vsel %vm2948_vm14, %v2936_v37, %v2951_v61 }
 0x35f   :  { %v2882_v18 = vsub.s32 32, %v2881_v41  ;;  %v2886_v6 = vsub.s32 4294967266, %v2881_v41  ;;  %v2960_v12 = vsel %vm2948_vm14, %v2942_v45, %v2959_v46  ;;  %v2883_v44 = vshll.u32 %v10532_v10, %v2881_v41 }
 0x360   :  { %v7603_v57 = vpop.eup %7602  ;;  %v2961_v55 = vsel %vm2947_vm4, %v2958_v21, %v2960_v12  ;;  %v10588_v59 = vmul.u32.u64.low %v10534_v2, %v2957_v63  ;;  %v10589_v27 = vmul.u32.u64.high %v10534_v2, %v2957_v63, %v10588_v59  ;;  %v3028_v52 = vadd.s32 1, %v7218_v23 }
 0x361   :  { %v7605_v3 = vpop.eup %7604  ;;  %v2806_v8 = vxor.u32 2147483648, %v7603_v57  ;;  %v2884_v0 = vshrl.u32 %v10530_v32, %v2882_v18  ;;  %v2887_v50 = vadd.s32 127, %v2886_v6  ;;  %v2953_v7 = vsel %vm2947_vm4, %v2950_v4, %v2952_v53 }
 0x362   :  { %v2803_v47 = vxor.u32 2147483648, %v7605_v3  ;;  %v10595_v13 = vmul.u32.u64.low %v10534_v2, %v2961_v55  ;;  %v10596_v60 = vmul.u32.u64.high %v10534_v2, %v2961_v55, %v10595_v13  ;;  %v2972_v15 = vadd.s32 1, %v10589_v27 }
 0x363   :  { %v2807_v10 = vsel %vm2805_vm1, %v2806_v8, %v7605_v3  ;;  %v6112_v56 = vsel %vm6110_vm8, %v2806_v8, %v7605_v3  ;;  %v2885_v37 = vor.u32 %v2884_v0, %v2883_v44  ;;  %v2888_v33 = vshll.u32 %v2887_v50, 23 }
 0x364   :  { %v2804_v32 = vsel %vm2802_vm10, %v7603_v57, %v2803_v47  ;;  %v6109_v31 = vsel %vm6107_vm11, %v7603_v57, %v2803_v47  ;;  %vm3029_vm13 = vcmp.gt.s32.totalorder %v3028_v52, 0  ;;  %v2969_v45 = vmul.u32 %v10534_v2, %v2953_v7 }
 0x365   :  { %v2808_v48 = vsel %vm2801_vm9, %v2804_v32, %v2807_v10  ;;  %v6113_v23 = vsel %vm6106_vm12, %v6109_v31, %v6112_v56  ;;  %v2889_v43 = vor.u32 4788187, %v2888_v33  ;;  %v2892_v62 = vcvt.s32.f32 %v2885_v37 }
 0x366   :  { %v2809_v19 = vsel %vm2798_vm2, nan, %v2808_v48  ;;  %v6114_v17 = vsel %vm2798_vm2, nan, %v6113_v23  ;;  %vm2971_vm1 = vc.u32 %v10596_v60, %v10588_v59  ;;  %v3030_v61 = vsel %vm3029_vm13, %v3028_v52, 0 }
 0x367   :  { %v7070_v49 = vsel %vm7047_vm3, %v2809_v19, %v6114_v17  ;;  %v2890_v36 = vand.u32 2147483647, %v2889_v43  ;;  %v2973_v20 = vsel %vm2971_vm1, %v2972_v15, %v10589_v27  ;;  %v2899_v29 = vsel %vm10579_vm15, 0, %v10559_v30 }
 0x368   :  { %7103 = vst.msk [vmem:[%s11401_s4 + $0xb0] sm:$0xff] %vm7080_vm7, %v7070_v49  ;;  %v2974_v2 = vadd.s32 %v2973_v20, %v2969_v45  ;;  %v3032_v35 = vand.u32 31, %v3030_v61  ;;  %v3026_v21 = vor.u32 8388608, %v10563_v26  ;;  %v10631_v4 = vmul.f32 %v10238_v11, %v10540_v58 }
 0x369   :  { %v2893_v42 = vmul.f32 %v2892_v62, %v2890_v36  ;;  %v2903_v46 = vadd.s32 3, %v2899_v29  ;;  %v10633_v18 = vand.u32 3, %v2899_v29  ;;  %v10635_v6 = vshrl.u32 %v3030_v61, 5 }
 0x36a   :  { %v2975_v5 = vadd.s32 536870912, %v2974_v2  ;;  %v3033_v41 = vsub.s32 32, %v3032_v35  ;;  %v3041_v57 = vshll.u32 %v11434_v34, %v3032_v35  ;;  %v3044_v44 = vshll.u32 %v11435_v24, %v3032_v35 }
 0x36b   :  { %v2894_v63 = vxor.u32 2147483648, %v2893_v42  ;;  %v3035_v8 = vshll.u32 %v11432_v14, %v3032_v35  ;;  %v3038_v0 = vshll.u32 %v11433_v25, %v3032_v35  ;;  %v10656_v56 = vand.u32 3, %v2903_v46 }
 0x36c   :  { %v10637_v53 = vshrl.u32 %v2975_v5, 30  ;;  %v3036_v30 = vshrl.u32 %v11433_v25, %v3033_v41  ;;  %v3039_v12 = vshrl.u32 %v11434_v34, %v3033_v41  ;;  %v3042_v58 = vshrl.u32 %v11435_v24, %v3033_v41 }
 0x36d   :  { %v2895_v26 = vsel %vm2812_vm6, %v2894_v63, %v2893_v42  ;;  %v3045_v55 = vshrl.u32 %v11436_v22, %v3033_v41  ;;  %v3048_v47 = vshrl.u32 %v11437_v40, %v3033_v41  ;;  %v3047_v39 = vshll.u32 %v11436_v22, %v3032_v35 }
 0x36e   :  { %v2898_v27 = vsel %vm10579_vm15, %v10251_v54, %v2895_v26  ;;  %v2977_v3 = vshll.u32 %v10637_v53, 30  ;;  %v3043_v50 = vor.u32 %v3042_v58, %v3041_v57  ;;  %v3037_v13 = vor.u32 %v3036_v30, %v3035_v8 }
 0x36f   :  { %7606 = vcosq.f32 %v2898_v27  ;;  %v3046_v52 = vor.u32 %v3045_v55, %v3044_v44  ;;  %v3040_v10 = vor.u32 %v3039_v12, %v3038_v0  ;;  %v10659_v37 = vshll.u32 %v3026_v21, 8 }
 0x370   :  { %7608 = vsinq.f32 %v2898_v27  ;;  %v10654_v7 = vsub.s32 %v2974_v2, %v2977_v3  ;;  %v3122_v33 = vand.u32 2147483647, %v10631_v4  ;;  %vm2916_vm6 = vcmp.lt.s32.totalorder %v10446_v51, 0 }
 0x371   :  { %v3034_v31 = vshrl.u32 %v11432_v14, %v3033_v41  ;;  %vm3053_vm8 = vcmp.lt.s32.totalorder %v10635_v6, 4  ;;  %v3125_v15 = vand.u32 2139095040, %v10631_v4  ;;  %vm6213_vm10 = vcmp.eq.s32.totalorder %v10633_v18, 2 }
 0x372   :  { %v2980_v32 = vsub.s32 0, %v10654_v7  ;;  %v3049_v48 = vor.u32 %v3048_v47, %v3047_v39  ;;  %vm3050_vm11 = vcmp.lt.s32.totalorder %v10635_v6, 1  ;;  %v3055_v23 = vsel %vm3053_vm8, %v3043_v50, 2102212464 }
 0x373   :  { %v3059_v43 = vsel %vm3053_vm8, %v3046_v52, 920167782  ;;  %vm6210_vm14 = vcmp.eq.s32.totalorder %v10633_v18, 0  ;;  %vm3052_vm0 = vcmp.lt.s32.totalorder %v10635_v6, 3  ;;  %v3054_v19 = vsel %vm3050_vm11, %v3034_v31, %v3037_v13 }
 0x374   :  { %v7215_v45 = vmin.u32 %v2980_v32, %v10654_v7  ;;  %v3058_v17 = vsel %vm3050_vm11, %v3037_v13, %v3040_v10  ;;  %vm2905_vm9 = vcmp.lt.s32.totalorder %v10656_v56, 2  ;;  %vm2906_vm12 = vcmp.eq.s32.totalorder %v10656_v56, 0 }
 0x375   :  { %vm2909_vm2 = vcmp.eq.s32.totalorder %v10656_v56, 2  ;;  %vm6209_vm5 = vcmp.lt.s32.totalorder %v10633_v18, 2  ;;  %v3056_v62 = vsel %vm3052_vm0, %v3040_v10, %v3055_v23  ;;  %v3060_v49 = vsel %vm3052_vm0, %v3043_v50, %v3059_v43 }
 0x376   :  { %vm2902_vm4 = vweird.f32 %v10251_v54  ;;  %v2982_v36 = vclz %v7215_v45  ;;  %v3000_v20 = vsub.s32 4, %v10637_v53  ;;  %vm3051_vm15 = vcmp.lt.s32.totalorder %v10635_v6, 2 }
 0x377   :  { %v3062_v61 = vsel %vm3050_vm11, %v3040_v10, %v3043_v50  ;;  %vm10695_vm13 = vcmp.le.f32.partialorder %v2914_v28, 0.7853982  ;;  %v3057_v2 = vsel %vm3051_vm15, %v3054_v19, %v3056_v62  ;;  %v3061_v35 = vsel %vm3051_vm15, %v3058_v17, %v3060_v49 }
 0x378   :  { %v3063_v42 = vsel %vm3053_vm8, %v3049_v48, 1326507024  ;;  %v3126_v5 = vshrl.u32 %v3125_v15, 23  ;;  %v7216_v21 = vadd.s32 4294967294, %v2982_v36  ;;  %v2970_v28 = vadd.s32 %v10588_v59, %v10596_v60 }
 0x379   :  { %v3064_v41 = vsel %vm3052_vm0, %v3046_v52, %v3063_v42  ;;  %v10704_v63 = vmul.u32.u64.low %v10659_v37, %v3061_v35  ;;  %v10705_v46 = vmul.u32.u64.high %v10659_v37, %v3061_v35, %v10704_v63  ;;  %v7607_v30 = vpop.eup %7606  ;;  %v3129_v26 = vand.u32 8388607, %v3122_v33 }
 0x37a   :  { %v3065_v12 = vsel %vm3051_vm15, %v3062_v61, %v3064_v41  ;;  %v7222_v57 = vadd.s32 4294967169, %v3126_v5  ;;  %v7609_v58 = vpop.eup %7608  ;;  %v2910_v44 = vxor.u32 2147483648, %v7607_v30  ;;  %vm7217_vm1 = vcmp.lt.s32.totalorder %v7216_v21, 0  ;;  %v11525_v61 = vld [vmem:[#allocation10_spill] sm:$0xff] }
 0x37b   :  { %v10713_v6 = vmul.u32.u64.low %v10659_v37, %v3065_v12  ;;  %v10714_v55 = vmul.u32.u64.high %v10659_v37, %v3065_v12, %v10713_v6  ;;  %v2907_v27 = vxor.u32 2147483648, %v7609_v58  ;;  %v2985_v3 = vsel %vm7217_vm1, 0, %v7216_v21 }
 0x37c   :  { %v3001_v8 = vsel %vm2916_vm6, %v3000_v20, %v10637_v53  ;;  %v3073_v59 = vmul.u32 %v10659_v37, %v3057_v2  ;;  %v2911_v60 = vsel %vm2909_vm2, %v2910_v44, %v7609_v58  ;;  %v6215_v0 = vsel %vm6213_vm10, %v2910_v44, %v7609_v58 }
 0x37d   :  { %v2986_v50 = vsub.s32 32, %v2985_v3  ;;  %v3132_v52 = vadd.s32 1, %v7222_v57  ;;  %v2908_v47 = vsel %vm2906_vm12, %v7607_v30, %v2907_v27  ;;  %v6212_v13 = vsel %vm6210_vm14, %v7607_v30, %v2907_v27 }
 0x37e   :  { %v2990_v10 = vsub.s32 4294967266, %v2985_v3  ;;  %v3076_v39 = vadd.s32 1, %v10705_v46  ;;  %v2912_v53 = vsel %vm2905_vm9, %v2908_v47, %v2911_v60  ;;  %v6216_v37 = vsel %vm6209_vm5, %v6212_v13, %v6215_v0 }
 0x37f   :  { %v2987_v32 = vshll.u32 %v10654_v7, %v2985_v3  ;;  %v2988_v31 = vshrl.u32 %v2970_v28, %v2986_v50  ;;  %v2913_v15 = vsel %vm2902_vm4, nan, %v2912_v53  ;;  %v6217_v48 = vsel %vm2902_vm4, nan, %v6216_v37  ;;  %v329_v7 = vpop.permute.xlu0 %328 }
 0x380   :  { %v2991_v23 = vadd.s32 127, %v2990_v10  ;;  %vm3075_vm8 = vc.u32 %v10714_v55, %v10704_v63  ;;  %v7071_v56 = vsel %vm7047_vm3, %v2913_v15, %v6217_v48  ;;  %v3003_v18 = vsel %vm10695_vm13, 0, %v3001_v8 }
 0x381   :  { %v3077_v43 = vsel %vm3075_vm8, %v3076_v39, %v10705_v46  ;;  %vm3133_vm10 = vcmp.gt.s32.totalorder %v3132_v52, 0  ;;  %7104 = vst.msk [vmem:[%s11401_s4 + $0xb8] sm:$0xff] %vm7080_vm7, %v7071_v56  ;;  %v2989_v54 = vor.u32 %v2988_v31, %v2987_v32  ;;  %v3007_v36 = vadd.s32 3, %v3003_v18 }
 0x382   :  { %v2992_v45 = vshll.u32 %v2991_v23, 23  ;;  %v3078_v19 = vadd.s32 %v3077_v43, %v3073_v59  ;;  %v3134_v17 = vsel %vm3133_vm10, %v3132_v52, 0  ;;  %vm11526_vm11 = vcmp.eq.s32.totalorder %v7901_v9, 1 }
 0x383   :  { %v3136_v62 = vand.u32 31, %v3134_v17  ;;  %v374_v2 = vsel %vm11526_vm11, %v11525_v61, %v329_v7  ;;  %v3130_v35 = vor.u32 8388608, %v3129_v26  ;;  %v2996_v21 = vcvt.s32.f32 %v2989_v54 }
 0x384   :  { %v2993_v49 = vor.u32 4788187, %v2992_v45  ;;  %v3079_v20 = vadd.s32 536870912, %v3078_v19  ;;  %v10754_v46 = vand.u32 3, %v3003_v18  ;;  %v10757_v30 = vmul.f32 %v10238_v11, %v374_v2 }
 0x385   :  { %v3137_v42 = vsub.s32 32, %v3136_v62  ;;  %v10759_v12 = vand.u32 3, %v3007_v36  ;;  %v10766_v27 = vshll.u32 %v3130_v35, 8  ;;  %v3145_v11 = vshll.u32 %v11434_v34, %v3136_v62 }
 0x386   :  { %v2994_v5 = vand.u32 2147483647, %v2993_v49  ;;  %v10752_v41 = vshrl.u32 %v3079_v20, 30  ;;  %v3135_v60 = vshrl.u32 %v3134_v17, 5  ;;  %v3139_v0 = vshll.u32 %v11432_v14, %v3136_v62 }
 0x387   :  { %v3146_v58 = vshrl.u32 %v11435_v24, %v3137_v42  ;;  %v3140_v44 = vshrl.u32 %v11433_v25, %v3137_v42  ;;  %v3143_v26 = vshrl.u32 %v11434_v34, %v3137_v42  ;;  %v3149_v6 = vshrl.u32 %v11436_v22, %v3137_v42 }
 0x388   :  { %v2997_v28 = vmul.f32 %v2996_v21, %v2994_v5  ;;  %v3081_v57 = vshll.u32 %v10752_v41, 30  ;;  %v3152_v59 = vshrl.u32 %v11437_v40, %v3137_v42  ;;  %v3142_v50 = vshll.u32 %v11433_v25, %v3136_v62 }
 0x389   :  { %v3148_v52 = vshll.u32 %v11435_v24, %v3136_v62  ;;  %v3147_v10 = vor.u32 %v3146_v58, %v3145_v11  ;;  %v3151_v39 = vshll.u32 %v11436_v22, %v3136_v62  ;;  %v3141_v37 = vor.u32 %v3140_v44, %v3139_v0 }
 0x38a   :  { %v2998_v3 = vxor.u32 2147483648, %v2997_v28  ;;  %v10768_v8 = vsub.s32 %v3078_v19, %v3081_v57  ;;  %v3144_v32 = vor.u32 %v3143_v26, %v3142_v50  ;;  %vm3020_vm14 = vcmp.lt.s32.totalorder %v10521_v16, 0 }
 0x38b   :  { %v3150_v31 = vor.u32 %v3149_v6, %v3148_v52  ;;  %v3153_v48 = vor.u32 %v3152_v59, %v3151_v39  ;;  %v3229_v23 = vand.u32 2139095040, %v10757_v30  ;;  %v3104_v56 = vsub.s32 4, %v10752_v41 }
 0x38c   :  { %v2999_v47 = vsel %vm2916_vm6, %v2998_v3, %v2997_v28  ;;  %v3084_v13 = vsub.s32 0, %v10768_v8  ;;  %v3138_v18 = vshrl.u32 %v11432_v14, %v3137_v42  ;;  %vm3157_vm6 = vcmp.lt.s32.totalorder %v3135_v60, 4 }
 0x38d   :  { %v3002_v53 = vsel %vm10695_vm13, %v10446_v51, %v2999_v47  ;;  %vm3154_vm0 = vcmp.lt.s32.totalorder %v3135_v60, 1  ;;  %vm3155_vm9 = vcmp.lt.s32.totalorder %v3135_v60, 2  ;;  %v3159_v29 = vsel %vm3157_vm6, %v3147_v10, 2102212464 }
 0x38e   :  { %7610 = vcosq.f32 %v3002_v53  ;;  %v7219_v15 = vmin.u32 %v3084_v13, %v10768_v8  ;;  %vm3156_vm12 = vcmp.lt.s32.totalorder %v3135_v60, 3  ;;  %v3162_v7 = vsel %vm3154_vm0, %v3141_v37, %v3144_v32 }
 0x38f   :  { %7612 = vsinq.f32 %v3002_v53  ;;  %v3163_v54 = vsel %vm3157_vm6, %v3150_v31, 920167782  ;;  %v3166_v45 = vsel %vm3154_vm0, %v3144_v32, %v3147_v10  ;;  %vm6316_vm2 = vcmp.eq.s32.totalorder %v10754_v46, 2 }
 0x390   :  { %v3086_v43 = vclz %v7219_v15  ;;  %v3158_v17 = vsel %vm3154_vm0, %v3138_v18, %v3141_v37  ;;  %v3164_v62 = vsel %vm3156_vm12, %v3147_v10, %v3163_v54  ;;  %v3167_v49 = vsel %vm3157_vm6, %v3153_v48, 1326507024 }
 0x391   :  { %vm6313_vm5 = vcmp.eq.s32.totalorder %v10754_v46, 0  ;;  %vm10791_vm4 = vcmp.le.f32.partialorder %v3018_v1, 0.7853982  ;;  %v3160_v20 = vsel %vm3156_vm12, %v3144_v32, %v3159_v29  ;;  %v3165_v61 = vsel %vm3155_vm9, %v3162_v7, %v3164_v62 }
 0x392   :  { %v7220_v19 = vadd.s32 4294967294, %v3086_v43  ;;  %v3168_v2 = vsel %vm3156_vm12, %v3150_v31, %v3167_v49  ;;  %v3230_v35 = vshrl.u32 %v3229_v23, 23  ;;  %vm3009_vm15 = vcmp.lt.s32.totalorder %v10759_v12, 2 }
 0x393   :  { %vm6312_vm13 = vcmp.lt.s32.totalorder %v10754_v46, 2  ;;  %v3169_v42 = vsel %vm3155_vm9, %v3166_v45, %v3168_v2  ;;  %v10800_v5 = vmul.u32.u64.low %v10766_v27, %v3165_v61  ;;  %v10801_v21 = vmul.u32.u64.high %v10766_v27, %v3165_v61, %v10800_v5 }
 0x394   :  { %vm7221_vm1 = vcmp.lt.s32.totalorder %v7220_v19, 0  ;;  %vm3006_vm8 = vweird.f32 %v10446_v51  ;;  %v10806_v28 = vmul.u32.u64.low %v10766_v27, %v3169_v42  ;;  %v10807_v57 = vmul.u32.u64.high %v10766_v27, %v3169_v42, %v10806_v28 }
 0x395   :  { %v3089_v1 = vsel %vm7221_vm1, 0, %v7220_v19  ;;  %v7226_v58 = vadd.s32 4294967169, %v3230_v35  ;;  %v3074_v44 = vadd.s32 %v10704_v63, %v10714_v55  ;;  %v3161_v3 = vsel %vm3155_vm9, %v3158_v17, %v3160_v20 }
 0x396   :  { %v3090_v26 = vsub.s32 32, %v3089_v1  ;;  %v3094_v6 = vsub.s32 4294967266, %v3089_v1  ;;  %vm3010_vm10 = vcmp.eq.s32.totalorder %v10759_v12, 0  ;;  %vm3013_vm11 = vcmp.eq.s32.totalorder %v10759_v12, 2 }
 0x397   :  { %v3105_v11 = vsel %vm3020_vm14, %v3104_v56, %v10752_v41  ;;  %v3236_v59 = vadd.s32 1, %v7226_v58  ;;  %v3091_v50 = vshll.u32 %v10768_v8, %v3089_v1  ;;  %v3180_v63 = vadd.s32 1, %v10801_v21 }
 0x398   :  { %v7611_v0 = vpop.eup %7610  ;;  %v3092_v52 = vshrl.u32 %v3074_v44, %v3090_v26  ;;  %v3095_v47 = vadd.s32 127, %v3094_v6  ;;  %v3177_v60 = vmul.u32 %v10766_v27, %v3161_v3  ;;  %vm3179_vm6 = vc.u32 %v10807_v57, %v10800_v5 }
 0x399   :  { %v7613_v55 = vpop.eup %7612  ;;  %v3014_v13 = vxor.u32 2147483648, %v7611_v0  ;;  %vm3237_vm0 = vcmp.gt.s32.totalorder %v3236_v59, 0  ;;  %v3181_v41 = vsel %vm3179_vm6, %v3180_v63, %v10801_v21  ;;  %v3107_v23 = vsel %vm10791_vm4, 0, %v3105_v11 }
 0x39a   :  { %v3011_v10 = vxor.u32 2147483648, %v7613_v55  ;;  %v3093_v39 = vor.u32 %v3092_v52, %v3091_v50  ;;  %v3096_v53 = vshll.u32 %v3095_v47, 23  ;;  %v3182_v32 = vadd.s32 %v3181_v41, %v3177_v60 }
 0x39b   :  { %v3015_v8 = vsel %vm3013_vm11, %v3014_v13, %v7613_v55  ;;  %v6318_v37 = vsel %vm6316_vm2, %v3014_v13, %v7613_v55  ;;  %v3238_v31 = vsel %vm3237_vm0, %v3236_v59, 0  ;;  %v3226_v12 = vand.u32 2147483647, %v10757_v30 }
 0x39c   :  { %v3012_v27 = vsel %vm3010_vm10, %v7611_v0, %v3011_v10  ;;  %v6315_v15 = vsel %vm6313_vm5, %v7611_v0, %v3011_v10  ;;  %v3097_v48 = vor.u32 4788187, %v3096_v53  ;;  %v3100_v43 = vcvt.s32.f32 %v3093_v39 }
 0x39d   :  { %v3016_v56 = vsel %vm3009_vm15, %v3012_v27, %v3015_v8  ;;  %v6319_v18 = vsel %vm6312_vm13, %v6315_v15, %v6318_v37  ;;  %v3183_v29 = vadd.s32 536870912, %v3182_v32  ;;  %v3240_v19 = vand.u32 31, %v3238_v31 }
 0x39e   :  { %v3017_v7 = vsel %vm3006_vm8, nan, %v3016_v56  ;;  %v6320_v54 = vsel %vm3006_vm8, nan, %v6319_v18  ;;  %v3098_v45 = vand.u32 2147483647, %v3097_v48  ;;  %v3111_v20 = vadd.s32 3, %v3107_v23 }
 0x39f   :  { %v7072_v17 = vsel %vm7047_vm3, %v3017_v7, %v6320_v54  ;;  %v10843_v62 = vshrl.u32 %v3183_v29, 30  ;;  %v3241_v49 = vsub.s32 32, %v3240_v19  ;;  %v10851_v2 = vand.u32 3, %v3107_v23  ;;  %v333_v29 = vpop.permute.xlu1 %332 }
 0x3a0   :  { %7105 = vst.msk [vmem:[%s11401_s4 + $0xc0] sm:$0xff] %vm7080_vm7, %v7072_v17  ;;  %v3101_v46 = vmul.f32 %v3100_v43, %v3098_v45  ;;  %v3233_v1 = vand.u32 8388607, %v3226_v12  ;;  %v3239_v26 = vshrl.u32 %v3238_v31, 5  ;;  %v3243_v6 = vshll.u32 %v11432_v14, %v3240_v19 }
 0x3a1   :  { %v3185_v51 = vshll.u32 %v10843_v62, 30  ;;  %v3244_v35 = vshrl.u32 %v11433_v25, %v3241_v49  ;;  %v3247_v42 = vshrl.u32 %v11434_v34, %v3241_v49  ;;  %v3250_v28 = vshrl.u32 %v11435_v24, %v3241_v49 }
 0x3a2   :  { %v3102_v61 = vxor.u32 2147483648, %v3101_v46  ;;  %v3253_v58 = vshrl.u32 %v11436_v22, %v3241_v49  ;;  %v3246_v3 = vshll.u32 %v11433_v25, %v3240_v19  ;;  %v3249_v0 = vshll.u32 %v11434_v34, %v3240_v19 }
 0x3a3   :  { %v10855_v21 = vsub.s32 %v3182_v32, %v3185_v51  ;;  %v3252_v50 = vshll.u32 %v11435_v24, %v3240_v19  ;;  %v10871_v52 = vand.u32 3, %v3111_v20  ;;  %v3245_v47 = vor.u32 %v3244_v35, %v3243_v6  ;;  %v11535_v51 = vld [vmem:[#allocation15_spill] sm:$0xff] }
 0x3a4   :  { %v3103_v44 = vsel %vm3020_vm14, %v3102_v61, %v3101_v46  ;;  %v3248_v63 = vor.u32 %v3247_v42, %v3246_v3  ;;  %v3251_v13 = vor.u32 %v3250_v28, %v3249_v0  ;;  %v3234_v10 = vor.u32 8388608, %v3233_v1  ;;  %v11531_v1 = vld [vmem:[#allocation13_spill] sm:$0xff] }
 0x3a5   :  { %v3106_v11 = vsel %vm10791_vm4, %v10521_v16, %v3103_v44  ;;  %v3188_v59 = vsub.s32 0, %v10855_v21  ;;  %v3254_v60 = vor.u32 %v3253_v58, %v3252_v50  ;;  %v3255_v36 = vshll.u32 %v11436_v22, %v3240_v19  ;;  %v337_v19 = vpop.permute.xlu0 %336 }
 0x3a6   :  { %7614 = vcosq.f32 %v3106_v11  ;;  %v3256_v39 = vshrl.u32 %v11437_v40, %v3241_v49  ;;  %vm3258_vm14 = vcmp.lt.s32.totalorder %v3239_v26, 1  ;;  %vm3124_vm9 = vcmp.lt.s32.totalorder %v10631_v4, 0 }
 0x3a7   :  { %7616 = vsinq.f32 %v3106_v11  ;;  %v7223_v55 = vmin.u32 %v3188_v59, %v10855_v21  ;;  %v3208_v41 = vsub.s32 4, %v10843_v62  ;;  %v3242_v8 = vshrl.u32 %v11432_v14, %v3241_v49  ;;  %v11533_v11 = vld [vmem:[#allocation12_spill] sm:$0xff] }
 0x3a8   :  { %vm3259_vm12 = vcmp.lt.s32.totalorder %v3239_v26, 2  ;;  %vm3117_vm2 = vcmp.eq.s32.totalorder %v10871_v52, 2  ;;  %vm6419_vm5 = vcmp.eq.s32.totalorder %v10851_v2, 2  ;;  %v3257_v37 = vor.u32 %v3256_v39, %v3255_v36 }
 0x3a9   :  { %v3190_v53 = vclz %v7223_v55  ;;  %vm3260_vm4 = vcmp.lt.s32.totalorder %v3239_v26, 3  ;;  %vm3261_vm15 = vcmp.lt.s32.totalorder %v3239_v26, 4  ;;  %v3266_v32 = vsel %vm3258_vm14, %v3245_v47, %v3248_v63  ;;  %v10924_v55 = vld [vmem:[%s11400_s1] ss:$0 sm:$0xff] }
 0x3aa   :  { %vm3114_vm13 = vcmp.eq.s32.totalorder %v10871_v52, 0  ;;  %vm6416_vm1 = vcmp.eq.s32.totalorder %v10851_v2, 0  ;;  %v3263_v27 = vsel %vm3261_vm15, %v3251_v13, 2102212464  ;;  %v3267_v15 = vsel %vm3261_vm15, %v3254_v60, 920167782 }
 0x3ab   :  { %v7224_v31 = vadd.s32 4294967294, %v3190_v53  ;;  %v3270_v48 = vsel %vm3258_vm14, %v3248_v63, %v3251_v13  ;;  %vm3113_vm8 = vcmp.lt.s32.totalorder %v10871_v52, 2  ;;  %vm6415_vm10 = vcmp.lt.s32.totalorder %v10851_v2, 2 }
 0x3ac   :  { %v3262_v23 = vsel %vm3258_vm14, %v3242_v8, %v3245_v47  ;;  %v3268_v56 = vsel %vm3260_vm4, %v3251_v13, %v3267_v15  ;;  %v3271_v18 = vsel %vm3261_vm15, %v3257_v37, 1326507024  ;;  %v3274_v43 = vshll.u32 %v3234_v10, 8 }
 0x3ad   :  { %vm3110_vm11 = vweird.f32 %v10521_v16  ;;  %vm7225_vm6 = vcmp.lt.s32.totalorder %v7224_v31, 0  ;;  %v3264_v7 = vsel %vm3260_vm4, %v3248_v63, %v3263_v27  ;;  %v3269_v54 = vsel %vm3259_vm12, %v3266_v32, %v3268_v56 }
 0x3ae   :  { %v3272_v45 = vsel %vm3260_vm4, %v3254_v60, %v3271_v18  ;;  %v3193_v17 = vsel %vm7225_vm6, 0, %v7224_v31  ;;  %v10894_v49 = vmul.u32.u64.low %v3274_v43, %v3269_v54  ;;  %v10895_v20 = vmul.u32.u64.high %v3274_v43, %v3269_v54, %v10894_v49 }
 0x3af   :  { %v3273_v46 = vsel %vm3259_vm12, %v3270_v48, %v3272_v45  ;;  %vm10900_vm0 = vcmp.le.f32.partialorder %v3122_v33, 0.7853982  ;;  %v3178_v61 = vadd.s32 %v10800_v5, %v10807_v57  ;;  %v3194_v35 = vsub.s32 32, %v3193_v17 }
 0x3b0   :  { %v3198_v42 = vsub.s32 4294967266, %v3193_v17  ;;  %vm11532_vm14 = vcmp.eq.s32.totalorder %v7901_v9, 1  ;;  %v7615_v58 = vpop.eup %7614  ;;  %v3265_v44 = vsel %vm3259_vm12, %v3262_v23, %v3264_v7  ;;  %v3195_v5 = vshll.u32 %v10855_v21, %v3193_v17 }
 0x3b1   :  { %v375_v28 = vsel %vm11532_vm14, %v11531_v1, %v333_v29  ;;  %v10910_v6 = vmul.u32.u64.low %v3274_v43, %v3273_v46  ;;  %v10911_v3 = vmul.u32.u64.high %v3274_v43, %v3273_v46, %v10910_v6  ;;  %vm11534_vm4 = vmmov %vm11532_vm14  ;;  %v7617_v59 = vpop.eup %7616  ;;  %v3118_v0 = vxor.u32 2147483648, %v7615_v58 }
 0x3b2   :  { %v376_v33 = vsel %vm11534_vm4, %v11533_v11, %v337_v19  ;;  %v3196_v57 = vshrl.u32 %v3178_v61, %v3194_v35  ;;  %v3199_v50 = vadd.s32 127, %v3198_v42  ;;  %v3115_v47 = vxor.u32 2147483648, %v7617_v59  ;;  %v341_v6 = vpop.permute.xlu1 %340 }
 0x3b3   :  { %v3209_v63 = vsel %vm3124_vm9, %v3208_v41, %v10843_v62  ;;  %v3284_v26 = vadd.s32 1, %v10895_v20  ;;  %v10927_v13 = vmul.f32 %v10924_v55, %v375_v28  ;;  %v3119_v21 = vsel %vm3117_vm2, %v3118_v0, %v7617_v59 }
 0x3b4   :  { %v6421_v60 = vsel %vm6419_vm5, %v3118_v0, %v7617_v59  ;;  %v3197_v10 = vor.u32 %v3196_v57, %v3195_v5  ;;  %v3200_v36 = vshll.u32 %v3199_v50, 23  ;;  %v3116_v62 = vsel %vm3114_vm13, %v7615_v58, %v3115_v47  ;;  %vm11536_vm5 = vmmov %vm11534_vm4 }
 0x3b5   :  { %v6418_v39 = vsel %vm6416_vm1, %v7615_v58, %v3115_v47  ;;  %v3281_v53 = vmul.u32 %v3274_v43, %v3265_v44  ;;  %vm3283_vm12 = vc.u32 %v10911_v3, %v10894_v49  ;;  %v3120_v41 = vsel %vm3113_vm8, %v3116_v62, %v3119_v21 }
 0x3b6   :  { %v6422_v8 = vsel %vm6415_vm10, %v6418_v39, %v6421_v60  ;;  %v3201_v37 = vor.u32 4788187, %v3200_v36  ;;  %v10944_v32 = vmul.f32 %v10924_v55, %v376_v33  ;;  %v3121_v31 = vsel %vm3110_vm11, nan, %v3120_v41 }
 0x3b7   :  { %v6423_v27 = vsel %vm3110_vm11, nan, %v6422_v8  ;;  %v3204_v15 = vcvt.s32.f32 %v3197_v10  ;;  %v3285_v48 = vsel %vm3283_vm12, %v3284_v26, %v10895_v20  ;;  %v3333_v2 = vand.u32 2139095040, %v10927_v13 }
 0x3b8   :  { %v7073_v52 = vsel %vm7047_vm3, %v3121_v31, %v6423_v27  ;;  %v3202_v23 = vand.u32 2147483647, %v3201_v37  ;;  %v3286_v56 = vadd.s32 %v3285_v48, %v3281_v53  ;;  %v3211_v18 = vsel %vm10900_vm0, 0, %v3209_v63 }
 0x3b9   :  { %7106 = vst.msk [vmem:[%s11401_s4 + $0xc8] sm:$0xff] %vm7080_vm7, %v7073_v52  ;;  %v3330_v16 = vand.u32 2147483647, %v10927_v13  ;;  %v3334_v7 = vshrl.u32 %v3333_v2, 23  ;;  %v3437_v54 = vand.u32 2139095040, %v10944_v32  ;;  %v3215_v19 = vadd.s32 3, %v3211_v18 }
 0x3ba   :  { %v3205_v43 = vmul.f32 %v3204_v15, %v3202_v23  ;;  %v3287_v29 = vadd.s32 536870912, %v3286_v56  ;;  %v10969_v58 = vand.u32 3, %v3211_v18  ;;  %v377_v50 = vsel %vm11536_vm5, %v11535_v51, %v341_v6 }
 0x3bb   :  { %v7230_v46 = vadd.s32 4294967169, %v3334_v7  ;;  %v3337_v20 = vand.u32 8388607, %v3330_v16  ;;  %v3438_v1 = vshrl.u32 %v3437_v54, 23  ;;  %v10971_v11 = vand.u32 3, %v3215_v19 }
 0x3bc   :  { %v3206_v45 = vxor.u32 2147483648, %v3205_v43  ;;  %v3288_v17 = vshrl.u32 %v3287_v29, 30  ;;  %vm10982_vm15 = vcmp.le.f32.partialorder %v3226_v12, 0.7853982  ;;  %vm6522_vm1 = vcmp.eq.s32.totalorder %v10969_v58, 2 }
 0x3bd   :  { %v3340_v42 = vadd.s32 1, %v7230_v46  ;;  %v3338_v59 = vor.u32 8388608, %v3337_v20  ;;  %v7234_v57 = vadd.s32 4294967169, %v3438_v1  ;;  %vm3221_vm13 = vcmp.eq.s32.totalorder %v10971_v11, 2 }
 0x3be   :  { %v3207_v61 = vsel %vm3124_vm9, %v3206_v45, %v3205_v43  ;;  %v3289_v35 = vshll.u32 %v3288_v17, 30  ;;  %v3312_v44 = vsub.s32 4, %v3288_v17  ;;  %vm3228_vm9 = vcmp.lt.s32.totalorder %v10757_v30, 0 }
 0x3bf   :  { %v3210_v28 = vsel %vm10900_vm0, %v10631_v4, %v3207_v61  ;;  %vm3341_vm2 = vcmp.gt.s32.totalorder %v3340_v42, 0  ;;  %v3282_v21 = vadd.s32 %v10894_v49, %v10911_v3  ;;  %vm3218_vm8 = vcmp.eq.s32.totalorder %v10971_v11, 0 }
 0x3c0   :  { %7618 = vcosq.f32 %v3210_v28  ;;  %v10973_v33 = vsub.s32 %v3286_v56, %v3289_v35  ;;  %v3342_v0 = vsel %vm3341_vm2, %v3340_v42, 0  ;;  %v3313_v63 = vsel %vm3228_vm9, %v3312_v44, %v3288_v17 }
 0x3c1   :  { %7620 = vsinq.f32 %v3210_v28  ;;  %v3344_v26 = vand.u32 31, %v3342_v0  ;;  %vm6519_vm10 = vcmp.eq.s32.totalorder %v10969_v58, 0  ;;  %v10995_v10 = vshll.u32 %v3338_v59, 8 }
 0x3c2   :  { %v3292_v5 = vsub.s32 0, %v10973_v33  ;;  %v3434_v36 = vand.u32 2147483647, %v10944_v32  ;;  %v10999_v62 = vmul.f32 %v10924_v55, %v377_v50  ;;  %vm3217_vm11 = vcmp.lt.s32.totalorder %v10971_v11, 2 }
 0x3c3   :  { %v3345_v12 = vsub.s32 32, %v3344_v26  ;;  %vm6518_vm6 = vcmp.lt.s32.totalorder %v10969_v58, 2  ;;  %v11005_v49 = vsel %vm10982_vm15, 0, %v3313_v63  ;;  %v11007_v3 = vshrl.u32 %v3342_v0, 5 }
 0x3c4   :  { %v7227_v60 = vmin.u32 %v3292_v5, %v10973_v33  ;;  %v11009_v53 = vadd.s32 1, %v7234_v57  ;;  %vm3214_vm0 = vweird.f32 %v10631_v4  ;;  %v3347_v41 = vshll.u32 %v11432_v14, %v3344_v26 }
 0x3c5   :  { %v3348_v8 = vshrl.u32 %v11433_v25, %v3345_v12  ;;  %v3350_v37 = vshll.u32 %v11433_v25, %v3344_v26  ;;  %v3351_v31 = vshrl.u32 %v11434_v34, %v3345_v12  ;;  %v3353_v15 = vshll.u32 %v11434_v34, %v3344_v26 }
 0x3c6   :  { %v3294_v39 = vclz %v7227_v60  ;;  %v3354_v48 = vshrl.u32 %v11435_v24, %v3345_v12  ;;  %v3357_v52 = vshrl.u32 %v11436_v22, %v3345_v12  ;;  %v3346_v23 = vshrl.u32 %v11432_v14, %v3345_v12 }
 0x3c7   :  { %v3349_v56 = vor.u32 %v3348_v8, %v3347_v41  ;;  %v3356_v2 = vshll.u32 %v11435_v24, %v3344_v26  ;;  %v3360_v18 = vshrl.u32 %v11437_v40, %v3345_v12  ;;  %v3352_v29 = vor.u32 %v3351_v31, %v3350_v37 }
 0x3c8   :  { %v7228_v27 = vadd.s32 4294967294, %v3294_v39  ;;  %v3355_v7 = vor.u32 %v3354_v48, %v3353_v15  ;;  %v3359_v54 = vshll.u32 %v11436_v22, %v3344_v26  ;;  %vm3445_vm4 = vcmp.gt.s32.totalorder %v11009_v53, 0 }
 0x3c9   :  { %v3358_v46 = vor.u32 %v3357_v52, %v3356_v2  ;;  %vm3362_vm12 = vcmp.lt.s32.totalorder %v11007_v3, 1  ;;  %vm3365_vm2 = vcmp.lt.s32.totalorder %v11007_v3, 4  ;;  %vm3363_vm5 = vcmp.lt.s32.totalorder %v11007_v3, 2 }
 0x3ca   :  { %v7619_v43 = vpop.eup %7618  ;;  %vm7229_vm14 = vcmp.lt.s32.totalorder %v7228_v27, 0  ;;  %v3361_v42 = vor.u32 %v3360_v18, %v3359_v54  ;;  %v3370_v58 = vsel %vm3362_vm12, %v3349_v56, %v3352_v29  ;;  %v3366_v12 = vsel %vm3362_vm12, %v3346_v23, %v3349_v56 }
 0x3cb   :  { %v7621_v45 = vpop.eup %7620  ;;  %v3222_v19 = vxor.u32 2147483648, %v7619_v43  ;;  %v3297_v17 = vsel %vm7229_vm14, 0, %v7228_v27  ;;  %v3371_v60 = vsel %vm3365_vm2, %v3358_v46, 920167782  ;;  %v3374_v31 = vsel %vm3362_vm12, %v3352_v29, %v3355_v7 }
 0x3cc   :  { %v3219_v20 = vxor.u32 2147483648, %v7621_v45  ;;  %v3298_v61 = vsub.s32 32, %v3297_v17  ;;  %v3302_v35 = vsub.s32 4294967266, %v3297_v17  ;;  %v3299_v44 = vshll.u32 %v10973_v33, %v3297_v17 }
 0x3cd   :  { %v3223_v1 = vsel %vm3221_vm13, %v3222_v19, %v7621_v45  ;;  %v6524_v28 = vsel %vm6522_vm1, %v3222_v19, %v7621_v45  ;;  %v3367_v33 = vsel %vm3365_vm2, %v3355_v7, 2102212464  ;;  %vm3364_vm13 = vcmp.lt.s32.totalorder %v11007_v3, 3 }
 0x3ce   :  { %v3220_v6 = vsel %vm3218_vm8, %v7619_v43, %v3219_v20  ;;  %v6521_v59 = vsel %vm6519_vm10, %v7619_v43, %v3219_v20  ;;  %v3300_v0 = vshrl.u32 %v3282_v21, %v3298_v61  ;;  %v3303_v5 = vadd.s32 127, %v3302_v35 }
 0x3cf   :  { %v3224_v57 = vsel %vm3217_vm11, %v3220_v6, %v3223_v1  ;;  %v6525_v51 = vsel %vm6518_vm6, %v6521_v59, %v6524_v28  ;;  %v3368_v39 = vsel %vm3364_vm13, %v3352_v29, %v3367_v33  ;;  %v3372_v41 = vsel %vm3364_vm13, %v3355_v7, %v3371_v60 }
 0x3d0   :  { %v3225_v50 = vsel %vm3214_vm0, nan, %v3224_v57  ;;  %v6526_v63 = vsel %vm3214_vm0, nan, %v6525_v51  ;;  %v3301_v26 = vor.u32 %v3300_v0, %v3299_v44  ;;  %v3304_v21 = vshll.u32 %v3303_v5, 23 }
 0x3d1   :  { %v7074_v11 = vsel %vm7047_vm3, %v3225_v50, %v6526_v63  ;;  %v3373_v37 = vsel %vm3363_vm5, %v3370_v58, %v3372_v41  ;;  %v3375_v27 = vsel %vm3365_vm2, %v3361_v42, 1326507024  ;;  %v3369_v23 = vsel %vm3363_vm5, %v3366_v12, %v3368_v39 }
 0x3d2   :  { %7107 = vst.msk [vmem:[%s11401_s4 + $0xd0] sm:$0xff] %vm7080_vm7, %v7074_v11  ;;  %v3305_v4 = vor.u32 4788187, %v3304_v21  ;;  %v3308_v8 = vcvt.s32.f32 %v3301_v26  ;;  %v3376_v48 = vsel %vm3364_vm13, %v3358_v46, %v3375_v27  ;;  %v3446_v18 = vsel %vm3445_vm4, %v11009_v53, 0 }
 0x3d3   :  { %v11066_v52 = vmul.u32.u64.low %v10995_v10, %v3373_v37  ;;  %v11067_v2 = vmul.u32.u64.high %v10995_v10, %v3373_v37, %v11066_v52  ;;  %v3377_v56 = vsel %vm3363_vm5, %v3374_v31, %v3376_v48  ;;  %v3541_v43 = vand.u32 2139095040, %v10999_v62 }
 0x3d4   :  { %v3306_v15 = vand.u32 2147483647, %v3305_v4  ;;  %v11079_v7 = vmul.u32.u64.low %v10995_v10, %v3377_v56  ;;  %v11080_v54 = vmul.u32.u64.high %v10995_v10, %v3377_v56, %v11079_v7  ;;  %v3441_v45 = vand.u32 8388607, %v3434_v36 }
 0x3d5   :  { %v3448_v19 = vand.u32 31, %v3446_v18  ;;  %v3319_v46 = vadd.s32 3, %v11005_v49  ;;  %v3385_v3 = vmul.u32 %v10995_v10, %v3369_v23  ;;  %v3388_v20 = vadd.s32 1, %v11067_v2 }
 0x3d6   :  { %v3309_v29 = vmul.f32 %v3308_v8, %v3306_v15  ;;  %v11087_v61 = vshrl.u32 %v3446_v18, 5  ;;  %v3542_v42 = vshrl.u32 %v3541_v43, 23  ;;  %vm3387_vm1 = vc.u32 %v11080_v54, %v11066_v52 }
 0x3d7   :  { %v3449_v53 = vsub.s32 32, %v3448_v19  ;;  %v3451_v35 = vshll.u32 %v11432_v14, %v3448_v19  ;;  %v3454_v28 = vshll.u32 %v11433_v25, %v3448_v19  ;;  %v3457_v44 = vshll.u32 %v11434_v34, %v3448_v19 }
 0x3d8   :  { %v3310_v17 = vxor.u32 2147483648, %v3309_v29  ;;  %v3389_v6 = vsel %vm3387_vm1, %v3388_v20, %v11067_v2  ;;  %v3460_v0 = vshll.u32 %v11435_v24, %v3448_v19  ;;  %v3463_v63 = vshll.u32 %v11436_v22, %v3448_v19 }
 0x3d9   :  { %v3452_v59 = vshrl.u32 %v11433_v25, %v3449_v53  ;;  %v3390_v5 = vadd.s32 %v3389_v6, %v3385_v3  ;;  %v3455_v57 = vshrl.u32 %v11434_v34, %v3449_v53  ;;  %v3458_v51 = vshrl.u32 %v11435_v24, %v3449_v53 }
 0x3da   :  { %v3311_v1 = vsel %vm3228_vm9, %v3310_v17, %v3309_v29  ;;  %v3461_v50 = vshrl.u32 %v11436_v22, %v3449_v53  ;;  %v3464_v11 = vshrl.u32 %v11437_v40, %v3449_v53  ;;  %v6620_v58 = vand.u32 3, %v11005_v49 }
 0x3db   :  { %v3314_v10 = vsel %vm10982_vm15, %v10757_v30, %v3311_v1  ;;  %v3453_v33 = vor.u32 %v3452_v59, %v3451_v35  ;;  %v3391_v47 = vadd.s32 536870912, %v3390_v5  ;;  %v3456_v26 = vor.u32 %v3455_v57, %v3454_v28 }
 0x3dc   :  { %7622 = vcosq.f32 %v3314_v10  ;;  %v3459_v21 = vor.u32 %v3458_v51, %v3457_v44  ;;  %v3442_v60 = vor.u32 8388608, %v3441_v45  ;;  %v3462_v4 = vor.u32 %v3461_v50, %v3460_v0 }
 0x3dd   :  { %7624 = vsinq.f32 %v3314_v10  ;;  %vm3466_vm9 = vcmp.lt.s32.totalorder %v11087_v61, 1  ;;  %v11109_v12 = vshrl.u32 %v3391_v47, 30  ;;  %v3465_v39 = vor.u32 %v3464_v11, %v3463_v63 }
 0x3de   :  { %vm3469_vm15 = vcmp.lt.s32.totalorder %v11087_v61, 4  ;;  %v3474_v41 = vsel %vm3466_vm9, %v3453_v33, %v3456_v26  ;;  %v3320_v8 = vand.u32 3, %v3319_v46  ;;  %vm3468_vm8 = vcmp.lt.s32.totalorder %v11087_v61, 3 }
 0x3df   :  { %v3475_v37 = vsel %vm3469_vm15, %v3462_v4, 920167782  ;;  %v7238_v31 = vadd.s32 4294967169, %v3542_v42  ;;  %v3393_v49 = vshll.u32 %v11109_v12, 30  ;;  %vm3467_vm10 = vcmp.lt.s32.totalorder %v11087_v61, 2 }
 0x3e0   :  { %v3476_v27 = vsel %vm3468_vm8, %v3459_v21, %v3475_v37  ;;  %v3478_v15 = vsel %vm3466_vm9, %v3456_v26, %v3459_v21  ;;  %vm3318_vm11 = vweird.f32 %v10757_v30  ;;  %v3479_v2 = vsel %vm3469_vm15, %v3465_v39, 1326507024 }
 0x3e1   :  { %v3477_v48 = vsel %vm3467_vm10, %v3474_v41, %v3476_v27  ;;  %v3482_v23 = vshll.u32 %v3442_v60, 8  ;;  %v3538_v56 = vand.u32 2147483647, %v10999_v62  ;;  %v11129_v18 = vsub.s32 %v3390_v5, %v3393_v49 }
 0x3e2   :  { %v3450_v43 = vshrl.u32 %v11432_v14, %v3449_v53  ;;  %v3480_v29 = vsel %vm3468_vm8, %v3462_v4, %v3479_v2  ;;  %v3548_v7 = vadd.s32 1, %v7238_v31  ;;  %v3471_v45 = vsel %vm3469_vm15, %v3459_v21, 2102212464 }
 0x3e3   :  { %v3481_v19 = vsel %vm3467_vm10, %v3478_v15, %v3480_v29  ;;  %v11138_v17 = vmul.u32.u64.low %v3482_v23, %v3477_v48  ;;  %v11139_v46 = vmul.u32.u64.high %v3482_v23, %v3477_v48, %v11138_v17  ;;  %vm3325_vm6 = vcmp.eq.s32.totalorder %v3320_v8, 2 }
 0x3e4   :  { %vm6621_vm0 = vcmp.lt.s32.totalorder %v6620_v58, 2  ;;  %vm6625_vm14 = vcmp.eq.s32.totalorder %v6620_v58, 2  ;;  %v3396_v20 = vsub.s32 0, %v11129_v18  ;;  %v3470_v42 = vsel %vm3466_vm9, %v3450_v43, %v3453_v33 }
 0x3e5   :  { %v11145_v1 = vmul.u32.u64.low %v3482_v23, %v3481_v19  ;;  %v11146_v28 = vmul.u32.u64.high %v3482_v23, %v3481_v19, %v11145_v1  ;;  %v3472_v6 = vsel %vm3468_vm8, %v3456_v26, %v3471_v45  ;;  %vm3549_vm4 = vcmp.gt.s32.totalorder %v3548_v7, 0 }
 0x3e6   :  { %v7623_v3 = vpop.eup %7622  ;;  %v7231_v10 = vmin.u32 %v3396_v20, %v11129_v18  ;;  %vm3322_vm12 = vcmp.eq.s32.totalorder %v3320_v8, 0  ;;  %vm6622_vm2 = vcmp.eq.s32.totalorder %v6620_v58, 0  ;;  %vm3321_vm5 = vcmp.lt.s32.totalorder %v3320_v8, 2 }
 0x3e7   :  { %v7625_v53 = vpop.eup %7624  ;;  %v3326_v35 = vxor.u32 2147483648, %v7623_v3  ;;  %v3473_v63 = vsel %vm3467_vm10, %v3470_v42, %v3472_v6  ;;  %v3550_v47 = vsel %vm3549_vm4, %v3548_v7, 0  ;;  %vm3491_vm13 = vc.u32 %v11146_v28, %v11138_v17 }
 0x3e8   :  { %v3323_v44 = vxor.u32 2147483648, %v7625_v53  ;;  %v3398_v51 = vclz %v7231_v10  ;;  %v3492_v58 = vadd.s32 1, %v11139_v46  ;;  %v3489_v61 = vmul.u32 %v3482_v23, %v3473_v63  ;;  %v345_v10 = vpop.permute.xlu0 %344 }
 0x3e9   :  { %v3327_v59 = vsel %vm3325_vm6, %v3326_v35, %v7625_v53  ;;  %v6627_v0 = vsel %vm6625_vm14, %v3326_v35, %v7625_v53  ;;  %v3552_v4 = vand.u32 31, %v3550_v47  ;;  %v3416_v30 = vsub.s32 4, %v11109_v12 }
 0x3ea   :  { %v3324_v5 = vsel %vm3322_vm12, %v7623_v3, %v3323_v44  ;;  %v6624_v57 = vsel %vm6622_vm2, %v7623_v3, %v3323_v44  ;;  %v7232_v11 = vadd.s32 4294967294, %v3398_v51  ;;  %v3493_v41 = vsel %vm3491_vm13, %v3492_v58, %v11139_v46 }
 0x3eb   :  { %v3328_v50 = vsel %vm3321_vm5, %v3324_v5, %v3327_v59  ;;  %v6628_v33 = vsel %vm6621_vm0, %v6624_v57, %v6627_v0  ;;  %v3545_v8 = vand.u32 8388607, %v3538_v56  ;;  %v3386_v37 = vadd.s32 %v11066_v52, %v11080_v54 }
 0x3ec   :  { %v3329_v21 = vsel %vm3318_vm11, nan, %v3328_v50  ;;  %v6629_v26 = vsel %vm3318_vm11, nan, %v6628_v33  ;;  %vm7233_vm1 = vcmp.lt.s32.totalorder %v7232_v11, 0  ;;  %v3494_v27 = vadd.s32 %v3493_v41, %v3489_v61 }
 0x3ed   :  { %v7075_v60 = vsel %vm7047_vm3, %v3329_v21, %v6629_v26  ;;  %v3401_v39 = vsel %vm7233_vm1, 0, %v7232_v11  ;;  %vm3332_vm9 = vcmp.lt.s32.totalorder %v10927_v13, 0  ;;  %v3553_v15 = vsub.s32 32, %v3552_v4  ;;  %v11541_v26 = vld [vmem:[#allocation14_spill] sm:$0xff] }
 0x3ee   :  { %7108 = vst.msk [vmem:[%s11401_s4 + $0xd8] sm:$0xff] %vm7080_vm7, %v7075_v60  ;;  %v3402_v31 = vsub.s32 32, %v3401_v39  ;;  %v3406_v49 = vsub.s32 4294967266, %v3401_v39  ;;  %v3403_v48 = vshll.u32 %v11129_v18, %v3401_v39  ;;  %v3495_v43 = vadd.s32 536870912, %v3494_v27 }
 0x3ef   :  { %v3417_v29 = vsel %vm3332_vm9, %v3416_v30, %v11109_v12  ;;  %v3546_v7 = vor.u32 8388608, %v3545_v8  ;;  %v3556_v45 = vshrl.u32 %v11433_v25, %v3553_v15  ;;  %v3559_v52 = vshrl.u32 %v11434_v34, %v3553_v15 }
 0x3f0   :  { %v3404_v2 = vshrl.u32 %v3386_v37, %v3402_v31  ;;  %v3407_v23 = vadd.s32 127, %v3406_v49  ;;  %v11180_v46 = vshrl.u32 %v3495_v43, 30  ;;  %v3565_v3 = vshrl.u32 %v11436_v22, %v3553_v15 }
 0x3f1   :  { %v11183_v20 = vshrl.u32 %v3550_v47, 5  ;;  %v3555_v18 = vshll.u32 %v11432_v14, %v3552_v4  ;;  %v3562_v53 = vshrl.u32 %v11435_v24, %v3553_v15  ;;  %v3564_v35 = vshll.u32 %v11435_v24, %v3552_v4 }
 0x3f2   :  { %v3405_v54 = vor.u32 %v3404_v2, %v3403_v48  ;;  %v3408_v19 = vshll.u32 %v3407_v23, 23  ;;  %v3497_v42 = vshll.u32 %v11180_v46, 30  ;;  %v3558_v1 = vshll.u32 %v11433_v25, %v3552_v4 }
 0x3f3   :  { %v3561_v44 = vshll.u32 %v11434_v34, %v3552_v4  ;;  %v3557_v6 = vor.u32 %v3556_v45, %v3555_v18  ;;  %v3566_v59 = vor.u32 %v3565_v3, %v3564_v35  ;;  %v3567_v0 = vshll.u32 %v11436_v22, %v3552_v4 }
 0x3f4   :  { %v3409_v12 = vor.u32 4788187, %v3408_v19  ;;  %v3568_v5 = vshrl.u32 %v11437_v40, %v3553_v15  ;;  %v3412_v51 = vcvt.s32.f32 %v3405_v54  ;;  %v11193_v50 = vsub.s32 %v3494_v27, %v3497_v42 }
 0x3f5   :  { %v3560_v33 = vor.u32 %v3559_v52, %v3558_v1  ;;  %vm11197_vm15 = vcmp.le.f32.partialorder %v3330_v16, 0.7853982  ;;  %v3563_v47 = vor.u32 %v3562_v53, %v3561_v44  ;;  %vm11542_vm8 = vcmp.eq.s32.totalorder %v7901_v9, 1 }
 0x3f6   :  { %v3410_v57 = vand.u32 2147483647, %v3409_v12  ;;  %v3569_v21 = vor.u32 %v3568_v5, %v3567_v0  ;;  %v378_v11 = vsel %vm11542_vm8, %v11541_v26, %v345_v10  ;;  %v3419_v58 = vsel %vm11197_vm15, 0, %v3417_v29 }
 0x3f7   :  { %v3500_v61 = vsub.s32 0, %v11193_v50  ;;  %vm3573_vm10 = vcmp.lt.s32.totalorder %v11183_v20, 4  ;;  %vm3570_vm11 = vcmp.lt.s32.totalorder %v11183_v20, 1  ;;  %vm3572_vm6 = vcmp.lt.s32.totalorder %v11183_v20, 3 }
 0x3f8   :  { %v3413_v60 = vmul.f32 %v3412_v51, %v3410_v57  ;;  %v3579_v16 = vsel %vm3573_vm10, %v3566_v59, 920167782  ;;  %v3586_v4 = vshll.u32 %v3546_v7, 8  ;;  %v3578_v30 = vsel %vm3570_vm11, %v3557_v6, %v3560_v33 }
 0x3f9   :  { %v7235_v9 = vmin.u32 %v3500_v61, %v11193_v50  ;;  %v3583_v41 = vsel %vm3573_vm10, %v3569_v21, 1326507024  ;;  %v3423_v8 = vadd.s32 3, %v3419_v58  ;;  %vm3571_vm0 = vcmp.lt.s32.totalorder %v11183_v20, 2 }
 0x3fa   :  { %v3414_v39 = vxor.u32 2147483648, %v3413_v60  ;;  %v3580_v37 = vsel %vm3572_vm6, %v3563_v47, %v3579_v16  ;;  %v3582_v31 = vsel %vm3570_vm11, %v3560_v33, %v3563_v47  ;;  %v3554_v48 = vshrl.u32 %v11432_v14, %v3553_v15 }
 0x3fb   :  { %v3502_v27 = vclz %v7235_v9  ;;  %v3575_v2 = vsel %vm3573_vm10, %v3563_v47, 2102212464  ;;  %v3581_v43 = vsel %vm3571_vm0, %v3578_v30, %v3580_v37  ;;  %v3584_v29 = vsel %vm3572_vm6, %v3566_v59, %v3583_v41 }
 0x3fc   :  { %v3415_v49 = vsel %vm3332_vm9, %v3414_v39, %v3413_v60  ;;  %v11235_v7 = vmul.f32 %v10924_v55, %v378_v11  ;;  %v3574_v15 = vsel %vm3570_vm11, %v3554_v48, %v3557_v6  ;;  %v3585_v52 = vsel %vm3571_vm0, %v3582_v31, %v3584_v29 }
 0x3fd   :  { %v3418_v23 = vsel %vm11197_vm15, %v10927_v13, %v3415_v49  ;;  %v7236_v45 = vadd.s32 4294967294, %v3502_v27  ;;  %v3576_v54 = vsel %vm3572_vm6, %v3560_v33, %v3575_v2  ;;  %vm3436_vm14 = vcmp.lt.s32.totalorder %v10944_v32, 0 }
 0x3fe   :  { %7626 = vcosq.f32 %v3418_v23  ;;  %v11243_v19 = vmul.u32.u64.low %v3586_v4, %v3585_v52  ;;  %v11244_v3 = vmul.u32.u64.high %v3586_v4, %v3585_v52, %v11243_v19  ;;  %v6723_v53 = vand.u32 3, %v3419_v58 }
 0x3ff   :  { %7628 = vsinq.f32 %v3418_v23  ;;  %vm7237_vm4 = vcmp.lt.s32.totalorder %v7236_v45, 0  ;;  %v11247_v55 = vmul.u32.u64.low %v3586_v4, %v3581_v43  ;;  %v11248_v18 = vmul.u32.u64.high %v3586_v4, %v3581_v43, %v11247_v55 }
 0x400   :  { %v3505_v35 = vsel %vm7237_vm4, 0, %v7236_v45  ;;  %v3520_v12 = vsub.s32 4, %v11180_v46  ;;  %v3645_v42 = vand.u32 2139095040, %v11235_v7  ;;  %v3490_v1 = vadd.s32 %v11138_v17, %v11146_v28 }
 0x401   :  { %v3506_v44 = vsub.s32 32, %v3505_v35  ;;  %v3510_v10 = vsub.s32 4294967266, %v3505_v35  ;;  %v3577_v6 = vsel %vm3571_vm0, %v3574_v15, %v3576_v54  ;;  %v3424_v59 = vand.u32 3, %v3423_v8 }
 0x402   :  { %vm11259_vm12 = vcmp.le.f32.partialorder %v3434_v36, 0.7853982  ;;  %vm3595_vm2 = vc.u32 %v11244_v3, %v11247_v55  ;;  %v3646_v5 = vshrl.u32 %v3645_v42, 23  ;;  %v3507_v57 = vshll.u32 %v11193_v50, %v3505_v35 }
 0x403   :  { %v3508_v51 = vshrl.u32 %v3490_v1, %v3506_v44  ;;  %v3511_v17 = vadd.s32 127, %v3510_v10  ;;  %v3596_v28 = vadd.s32 1, %v11248_v18  ;;  %vm3422_vm5 = vweird.f32 %v10927_v13 }
 0x404   :  { %vm6724_vm13 = vcmp.lt.s32.totalorder %v6723_v53, 2  ;;  %v3521_v36 = vsel %vm3436_vm14, %v3520_v12, %v11180_v46  ;;  %v3593_v20 = vmul.u32 %v3586_v4, %v3577_v6  ;;  %v7242_v33 = vadd.s32 4294967169, %v3646_v5 }
 0x405   :  { %vm6725_vm1 = vcmp.eq.s32.totalorder %v6723_v53, 0  ;;  %v3509_v63 = vor.u32 %v3508_v51, %v3507_v57  ;;  %v3512_v47 = vshll.u32 %v3511_v17, 23  ;;  %v3597_v21 = vsel %vm3595_vm2, %v3596_v28, %v11248_v18 }
 0x406   :  { %vm3425_vm9 = vcmp.lt.s32.totalorder %v3424_v59, 2  ;;  %vm6728_vm15 = vcmp.eq.s32.totalorder %v6723_v53, 2  ;;  %v3598_v50 = vadd.s32 %v3597_v21, %v3593_v20  ;;  %v3652_v26 = vadd.s32 1, %v7242_v33 }
 0x407   :  { %vm3426_vm8 = vcmp.eq.s32.totalorder %v3424_v59, 0  ;;  %vm3429_vm10 = vcmp.eq.s32.totalorder %v3424_v59, 2  ;;  %v3513_v60 = vor.u32 4788187, %v3512_v47  ;;  %v3523_v58 = vsel %vm11259_vm12, 0, %v3521_v36 }
 0x408   :  { %v7627_v11 = vpop.eup %7626  ;;  %v3599_v16 = vadd.s32 536870912, %v3598_v50  ;;  %v3642_v4 = vand.u32 2147483647, %v11235_v7  ;;  %vm3653_vm11 = vcmp.gt.s32.totalorder %v3652_v26, 0  ;;  %v3516_v30 = vcvt.s32.f32 %v3509_v63 }
 0x409   :  { %v7629_v61 = vpop.eup %7628  ;;  %v3430_v46 = vxor.u32 2147483648, %v7627_v11  ;;  %v3514_v9 = vand.u32 2147483647, %v3513_v60  ;;  %v3654_v41 = vsel %vm3653_vm11, %v3652_v26, 0  ;;  %v3527_v31 = vadd.s32 3, %v3523_v58 }
 0x40a   :  { %v3427_v39 = vxor.u32 2147483648, %v7629_v61  ;;  %v11276_v49 = vshrl.u32 %v3599_v16, 30  ;;  %v3656_v23 = vand.u32 31, %v3654_v41  ;;  %v3649_v15 = vand.u32 8388607, %v3642_v4 }
 0x40b   :  { %v3431_v8 = vsel %vm3429_vm10, %v3430_v46, %v7629_v61  ;;  %v6730_v37 = vsel %vm6728_vm15, %v3430_v46, %v7629_v61  ;;  %v3517_v2 = vmul.f32 %v3516_v30, %v3514_v9  ;;  %v11304_v10 = vand.u32 3, %v3527_v31 }
 0x40c   :  { %v3428_v27 = vsel %vm3426_vm8, %v7627_v11, %v3427_v39  ;;  %v6727_v48 = vsel %vm6725_vm1, %v7627_v11, %v3427_v39  ;;  %v3601_v45 = vshll.u32 %v11276_v49, 30  ;;  %v3657_v18 = vsub.s32 32, %v3656_v23 }
 0x40d   :  { %v3432_v43 = vsel %vm3425_vm9, %v3428_v27, %v3431_v8  ;;  %v6731_v29 = vsel %vm6724_vm13, %v6727_v48, %v6730_v37  ;;  %v3518_v19 = vxor.u32 2147483648, %v3517_v2  ;;  %v3650_v1 = vor.u32 8388608, %v3649_v15 }
 0x40e   :  { %v3433_v52 = vsel %vm3422_vm5, nan, %v3432_v43  ;;  %v6732_v54 = vsel %vm3422_vm5, nan, %v6731_v29  ;;  %v11291_v12 = vsub.s32 %v3598_v50, %v3601_v45  ;;  %v3660_v44 = vshrl.u32 %v11433_v25, %v3657_v18 }
 0x40f   :  { %v7076_v35 = vsel %vm7047_vm3, %v3433_v52, %v6732_v54  ;;  %v3519_v53 = vsel %vm3436_vm14, %v3518_v19, %v3517_v2  ;;  %v11306_v6 = vand.u32 3, %v3523_v58  ;;  %v3663_v59 = vshrl.u32 %v11434_v34, %v3657_v18 }
 0x410   :  { %7109 = vst.msk [vmem:[%s11401_s4 + $0xe0] sm:$0xff] %vm7080_vm7, %v7076_v35  ;;  %v3522_v13 = vsel %vm11259_vm12, %v10944_v32, %v3519_v53  ;;  %v3604_v42 = vsub.s32 0, %v11291_v12  ;;  %v3659_v57 = vshll.u32 %v11432_v14, %v3656_v23  ;;  %v3662_v0 = vshll.u32 %v11433_v25, %v3656_v23 }
 0x411   :  { %7630 = vcosq.f32 %v3522_v13  ;;  %v3594_v51 = vadd.s32 %v11247_v55, %v11244_v3  ;;  %v3655_v17 = vshrl.u32 %v3654_v41, 5  ;;  %v11314_v33 = vshll.u32 %v3650_v1, 8 }
 0x412   :  { %7632 = vsinq.f32 %v3522_v13  ;;  %v7239_v5 = vmin.u32 %v3604_v42, %v11291_v12  ;;  %v3661_v36 = vor.u32 %v3660_v44, %v3659_v57  ;;  %v3664_v20 = vor.u32 %v3663_v59, %v3662_v0 }
 0x413   :  { %vm3533_vm6 = vcmp.eq.s32.totalorder %v11304_v10, 2  ;;  %vm6831_vm0 = vcmp.eq.s32.totalorder %v11306_v6, 2  ;;  %v3665_v63 = vshll.u32 %v11434_v34, %v3656_v23  ;;  %v3666_v47 = vshrl.u32 %v11435_v24, %v3657_v18 }
 0x414   :  { %v3606_v28 = vclz %v7239_v5  ;;  %v3668_v21 = vshll.u32 %v11435_v24, %v3656_v23  ;;  %v3669_v25 = vshrl.u32 %v11436_v22, %v3657_v18  ;;  %vm3530_vm14 = vcmp.eq.s32.totalorder %v11304_v10, 0 }
 0x415   :  { %vm6828_vm4 = vcmp.eq.s32.totalorder %v11306_v6, 0  ;;  %v3658_v55 = vshrl.u32 %v11432_v14, %v3657_v18  ;;  %v3671_v50 = vshll.u32 %v11436_v22, %v3656_v23  ;;  %v3672_v26 = vshrl.u32 %v11437_v40, %v3657_v18 }
 0x416   :  { %v7240_v3 = vadd.s32 4294967294, %v3606_v28  ;;  %vm6827_vm12 = vcmp.lt.s32.totalorder %v11306_v6, 2  ;;  %v3667_v34 = vor.u32 %v3666_v47, %v3665_v63  ;;  %v3670_v11 = vor.u32 %v3669_v25, %v3668_v21 }
 0x417   :  { %vm3674_vm2 = vcmp.lt.s32.totalorder %v3655_v17, 1  ;;  %vm3675_vm5 = vcmp.lt.s32.totalorder %v3655_v17, 2  ;;  %vm3526_vm13 = vweird.f32 %v10944_v32  ;;  %v3673_v24 = vor.u32 %v3672_v26, %v3671_v50 }
 0x418   :  { %vm7241_vm1 = vcmp.lt.s32.totalorder %v7240_v3, 0  ;;  %vm3676_vm9 = vcmp.lt.s32.totalorder %v3655_v17, 3  ;;  %vm3677_vm15 = vcmp.lt.s32.totalorder %v3655_v17, 4  ;;  %v3682_v61 = vsel %vm3674_vm2, %v3661_v36, %v3664_v20 }
 0x419   :  { %v3609_v60 = vsel %vm7241_vm1, 0, %v7240_v3  ;;  %v3679_v58 = vsel %vm3677_vm15, %v3667_v34, 2102212464  ;;  %v3683_v14 = vsel %vm3677_vm15, %v3670_v11, 920167782  ;;  %v3678_v16 = vsel %vm3674_vm2, %v3658_v55, %v3661_v36 }
 0x41a   :  { %v3610_v46 = vsub.s32 32, %v3609_v60  ;;  %v3614_v22 = vsub.s32 4294967266, %v3609_v60  ;;  %v3686_v40 = vsel %vm3674_vm2, %v3664_v20, %v3667_v34  ;;  %v3611_v9 = vshll.u32 %v11291_v12, %v3609_v60 }
 0x41b   :  { %v7631_v39 = vpop.eup %7630  ;;  %v3680_v30 = vsel %vm3676_vm9, %v3664_v20, %v3679_v58  ;;  %v3684_v41 = vsel %vm3676_vm9, %v3667_v34, %v3683_v14  ;;  %v3687_v8 = vsel %vm3677_vm15, %v3673_v24, 1326507024  ;;  %vm3529_vm8 = vcmp.lt.s32.totalorder %v11304_v10, 2 }
 0x41c   :  { %v7633_v37 = vpop.eup %7632  ;;  %v3534_v31 = vxor.u32 2147483648, %v7631_v39  ;;  %v3612_v27 = vshrl.u32 %v3594_v51, %v3610_v46  ;;  %v3615_v48 = vadd.s32 127, %v3614_v22  ;;  %v3685_v2 = vsel %vm3675_vm5, %v3682_v61, %v3684_v41 }
 0x41d   :  { %v3531_v23 = vxor.u32 2147483648, %v7633_v37  ;;  %v3688_v43 = vsel %vm3676_vm9, %v3670_v11, %v3687_v8  ;;  %v11335_v29 = vmul.u32.u64.low %v11314_v33, %v3685_v2  ;;  %v11336_v45 = vmul.u32.u64.high %v11314_v33, %v3685_v2, %v11335_v29 }
 0x41e   :  { %v3535_v15 = vsel %vm3533_vm6, %v3534_v31, %v7633_v37  ;;  %v6833_v52 = vsel %vm6831_vm0, %v3534_v31, %v7633_v37  ;;  %v3613_v54 = vor.u32 %v3612_v27, %v3611_v9  ;;  %v3616_v19 = vshll.u32 %v3615_v48, 23 }
 0x41f   :  { %v3532_v18 = vsel %vm3530_vm14, %v7631_v39, %v3531_v23  ;;  %v6830_v35 = vsel %vm6828_vm4, %v7631_v39, %v3531_v23  ;;  %v3689_v12 = vsel %vm3675_vm5, %v3686_v40, %v3688_v43  ;;  %v3681_v1 = vsel %vm3675_vm5, %v3678_v16, %v3680_v30 }
 0x420   :  { %v3536_v53 = vsel %vm3529_vm8, %v3532_v18, %v3535_v15  ;;  %v6834_v13 = vsel %vm6827_vm12, %v6830_v35, %v6833_v52  ;;  %v3617_v42 = vor.u32 4788187, %v3616_v19  ;;  %v3620_v51 = vcvt.s32.f32 %v3613_v54 }
 0x421   :  { %v3537_v44 = vsel %vm3526_vm13, nan, %v3536_v53  ;;  %v6835_v59 = vsel %vm3526_vm13, nan, %v6834_v13  ;;  %v11357_v10 = vmul.u32.u64.low %v11314_v33, %v3689_v12  ;;  %v11358_v5 = vmul.u32.u64.high %v11314_v33, %v3689_v12, %v11357_v10 }
 0x422   :  { %v7077_v57 = vsel %vm7047_vm3, %v3537_v44, %v6835_v59  ;;  %v3618_v0 = vand.u32 2147483647, %v3617_v42  ;;  %v3700_v6 = vadd.s32 1, %v11336_v45  ;;  %v3624_v32 = vsub.s32 4, %v11276_v49 }
 0x423   :  { %7110 = vst.msk [vmem:[%s11401_s4 + $0xe8] sm:$0xff] %vm7080_vm7, %v7077_v57  ;;  %v3697_v28 = vmul.u32 %v11314_v33, %v3681_v1  ;;  %vm3699_vm10 = vc.u32 %v11358_v5, %v11335_v29  ;;  %vm3540_vm11 = vcmp.lt.s32.totalorder %v10999_v62, 0  ;;  %vm3539_vm6 = vcmp.le.f32.partialorder %v3538_v56, 0.7853982 }
 0x424   :  { %v3621_v17 = vmul.f32 %v3620_v51, %v3618_v0  ;;  %v3701_v20 = vsel %vm3699_vm10, %v3700_v6, %v11336_v45  ;;  %v3625_v21 = vsel %vm3540_vm11, %v3624_v32, %v11276_v49  ;;  %vm3630_vm13 = vweird.f32 %v10999_v62 }
 0x425   :  { %v3702_v63 = vadd.s32 %v3701_v20, %v3697_v28  ;;  %v3627_v33 = vsel %vm3539_vm6, 0, %v3625_v21  ;;  %v3698_v48 = vadd.s32 %v11335_v29, %v11358_v5  ;;  %vm3644_vm9 = vcmp.lt.s32.totalorder %v11235_v7, 0 }
 0x426   :  { %v3622_v36 = vxor.u32 2147483648, %v3621_v17  ;;  %v3631_v26 = vadd.s32 3, %v3627_v33  ;;  %v6929_v60 = vand.u32 3, %v3627_v33  ;;  %vm3643_vm15 = vcmp.le.f32.partialorder %v3642_v4, 0.7853982 }
 0x427   :  { %v3703_v3 = vadd.s32 536870912, %v3702_v63 }
 0x428   :  { %v3623_v47 = vsel %vm3540_vm11, %v3622_v36, %v3621_v17  ;;  %v3632_v24 = vand.u32 3, %v3631_v26  ;;  %vm6931_vm14 = vcmp.eq.s32.totalorder %v6929_v60, 0  ;;  %vm6934_vm4 = vcmp.eq.s32.totalorder %v6929_v60, 2 }
 0x429   :  { %v3626_v25 = vsel %vm3539_vm6, %v10999_v62, %v3623_v47  ;;  %v3704_v55 = vshrl.u32 %v3703_v3, 30  ;;  %vm6930_vm5 = vcmp.lt.s32.totalorder %v6929_v60, 2 }
 0x42a   :  { %7634 = vcosq.f32 %v3626_v25  ;;  %vm3637_vm0 = vcmp.eq.s32.totalorder %v3632_v24, 2  ;;  %vm3634_vm12 = vcmp.eq.s32.totalorder %v3632_v24, 0  ;;  %vm3633_vm2 = vcmp.lt.s32.totalorder %v3632_v24, 2 }
 0x42b   :  { %7636 = vsinq.f32 %v3626_v25  ;;  %v3705_v50 = vshll.u32 %v3704_v55, 30  ;;  %v3728_v12 = vsub.s32 4, %v3704_v55 }
 0x42d   :  { %v3706_v34 = vsub.s32 %v3702_v63, %v3705_v50  ;;  %v3729_v13 = vsel %vm3644_vm9, %v3728_v12, %v3704_v55 }
 0x42e   :  { %v3731_v1 = vsel %vm3643_vm15, 0, %v3729_v13 }
 0x42f   :  { %v3708_v11 = vsub.s32 0, %v3706_v34  ;;  %v3735_v44 = vadd.s32 3, %v3731_v1  ;;  %v7032_v10 = vand.u32 3, %v3731_v1 }
 0x431   :  { %v7243_v58 = vmin.u32 %v3708_v11, %v3706_v34  ;;  %v3736_v59 = vand.u32 3, %v3735_v44  ;;  %vm7037_vm10 = vcmp.eq.s32.totalorder %v7032_v10, 2  ;;  %vm7034_vm6 = vcmp.eq.s32.totalorder %v7032_v10, 0 }
 0x433   :  { %v3710_v46 = vclz %v7243_v58  ;;  %vm3741_vm8 = vcmp.eq.s32.totalorder %v3736_v59, 2  ;;  %vm3738_vm11 = vcmp.eq.s32.totalorder %v3736_v59, 0 }
 0x434   :  { %v7635_v61 = vpop.eup %7634 }
 0x435   :  { %v7637_v14 = vpop.eup %7636  ;;  %v3638_v56 = vxor.u32 2147483648, %v7635_v61  ;;  %v7244_v40 = vadd.s32 4294967294, %v3710_v46 }
 0x436   :  { %v3635_v22 = vxor.u32 2147483648, %v7637_v14 }
 0x437   :  { %v3639_v49 = vsel %vm3637_vm0, %v3638_v56, %v7637_v14  ;;  %v6936_v16 = vsel %vm6934_vm4, %v3638_v56, %v7637_v14  ;;  %vm7245_vm1 = vcmp.lt.s32.totalorder %v7244_v40, 0  ;;  %vm3737_vm0 = vcmp.lt.s32.totalorder %v3736_v59, 2 }
 0x438   :  { %v3636_v39 = vsel %vm3634_vm12, %v7635_v61, %v3635_v22  ;;  %v6933_v9 = vsel %vm6931_vm14, %v7635_v61, %v3635_v22  ;;  %v3713_v31 = vsel %vm7245_vm1, 0, %v7244_v40  ;;  %vm7033_vm14 = vcmp.lt.s32.totalorder %v7032_v10, 2 }
 0x439   :  { %v3640_v30 = vsel %vm3633_vm2, %v3636_v39, %v3639_v49  ;;  %v6937_v41 = vsel %vm6930_vm5, %v6933_v9, %v6936_v16  ;;  %v3714_v2 = vsub.s32 32, %v3713_v31  ;;  %v3718_v23 = vsub.s32 4294967266, %v3713_v31 }
 0x43a   :  { %v3641_v8 = vsel %vm3630_vm13, nan, %v3640_v30  ;;  %v6938_v37 = vsel %vm3630_vm13, nan, %v6937_v41  ;;  %v3715_v62 = vshll.u32 %v3706_v34, %v3713_v31  ;;  %vm3734_vm4 = vweird.f32 %v11235_v7 }
 0x43b   :  { %v7078_v27 = vsel %vm7047_vm3, %v3641_v8, %v6938_v37  ;;  %v3716_v43 = vshrl.u32 %v3698_v48, %v3714_v2  ;;  %v3719_v45 = vadd.s32 127, %v3718_v23 }
 0x43c   :  { %7111 = vst.msk [vmem:[%s11401_s4 + $0xf0] sm:$0xff] %vm7080_vm7, %v7078_v27 }
 0x43d   :  { %v3717_v15 = vor.u32 %v3716_v43, %v3715_v62  ;;  %v3720_v52 = vshll.u32 %v3719_v45, 23 }
 0x43f   :  { %v3721_v54 = vor.u32 4788187, %v3720_v52  ;;  %v3724_v18 = vcvt.s32.f32 %v3717_v15 }
 0x441   :  { %v3722_v19 = vand.u32 2147483647, %v3721_v54 }
 0x443   :  { %v3725_v35 = vmul.f32 %v3724_v18, %v3722_v19 }
 0x445   :  { %v3726_v53 = vxor.u32 2147483648, %v3725_v35 }
 0x447   :  { %v3727_v29 = vsel %vm3644_vm9, %v3726_v53, %v3725_v35 }
 0x448   :  { %v3730_v42 = vsel %vm3643_vm15, %v11235_v7, %v3727_v29 }
 0x449   :  { %7638 = vcosq.f32 %v3730_v42 }
 0x44a   :  { %7640 = vsinq.f32 %v3730_v42 }
 0x453   :  { %v7639_v5 = vpop.eup %7638 }
 0x454   :  { %v7641_v57 = vpop.eup %7640  ;;  %v3742_v0 = vxor.u32 2147483648, %v7639_v5 }
 0x455   :  { %v3739_v51 = vxor.u32 2147483648, %v7641_v57 }
 0x456   :  { %v3743_v6 = vsel %vm3741_vm8, %v3742_v0, %v7641_v57  ;;  %v7039_v4 = vsel %vm7037_vm10, %v3742_v0, %v7641_v57 }
 0x457   :  { %v3740_v17 = vsel %vm3738_vm11, %v7639_v5, %v3739_v51  ;;  %v7036_v32 = vsel %vm7034_vm6, %v7639_v5, %v3739_v51 }
 0x458   :  { %v3744_v28 = vsel %vm3737_vm0, %v3740_v17, %v3743_v6  ;;  %v7040_v36 = vsel %vm7033_vm14, %v7036_v32, %v7039_v4 }
 0x459   :  { %v3745_v20 = vsel %vm3734_vm4, nan, %v3744_v28  ;;  %v7041_v63 = vsel %vm3734_vm4, nan, %v7040_v36 }
 0x45a   :  { %v7079_v47 = vsel %vm7047_vm3, %v3745_v20, %v7041_v63 }
 0x45b   :  { %7112 = vst.msk [vmem:[%s11401_s4 + $0xf8] sm:$0xff] %vm7080_vm7, %v7079_v47 }

</bundles_post_ra>
